<compile_context>
chip_gen: v7x
topology: tpu7x:2x2x1
jax: 0.10.0
libtpu: 0.0.40
codegen_flags: <defaults>
</compile_context>

<pallas_src>
import functools

import jax
import jax.numpy as jnp
from jax.experimental import pallas as pl
from jax.experimental.pallas import tpu as pltpu

IN_DIM = 1
HIDDEN = 10
OUT_DIM = 4
BN_EPS = 1e-5
RHS_W = 16           # padded feature width of the streamed A @ H matmul operand
NUM_PHASES = 4       # A@x, A@h1, A@h2, A_w@s


def _ceil_to(v, m):
    return (v + m - 1) // m * m


def _hw_vmem_bytes():
    """Per-TensorCore VMEM capacity (generation aware), conservative fallback."""
    try:
        info = pltpu.get_tpu_info()
        for attr in ("vmem_capacity_bytes", "vmem_size_bytes", "vmem_bytes"):
            v = getattr(info, attr, None)
            if v:
                return int(v)
    except Exception:
        pass
    return 64 * 2 ** 20          # v7x-sized fallback: safe on every generation


def _footprint_bytes(tile, n_pad, n_adj_buffers):
    """Rough resident-VMEM estimate (lane-padded to 128, inputs double-buffered)."""
    per_row = (2 * 128 * 4       # x input (2 pipeline buffers)
               + 2 * 128 * 4     # s output (2 pipeline buffers)
               + 128 * 2         # rhs scratch (bf16)
               + 128 * 4         # agg scratch (f32)
               + 128 * 4         # h1|h2 scratch (f32)
               + 2 * 8 * 4)      # deg input (1, n_pad), 2 buffers
    return (n_adj_buffers * tile * tile * 2     # bf16 adjacency blocks
            + n_pad * per_row
            + tile * 128 * 4                    # per-row-tile k accumulator
            + (4 << 20))                        # params / semaphores / misc slack


def _pick_tiling(n):
    """Choose (tile, n_pad, vmem_limit): adjacency resident when it fits, else stream."""
    budget = int(_hw_vmem_bytes() * 0.85)
    n128 = _ceil_to(max(n, 1), 128)
    # Resident mode: the whole padded adjacency is one block -> HBM read exactly once.
    if _footprint_bytes(n128, n128, 2) <= budget:
        return n128, n128, budget
    # Streamed mode: triple-buffered (tile, tile) bf16 blocks, biggest tile that fits.
    for t in (2048, 1024, 512, 256, 128):
        n_pad = _ceil_to(n, t)
        if _footprint_bytes(t, n_pad, 3) <= budget:
            return t, n_pad, budget
    return 128, _ceil_to(n, 128), budget


def _make_kernel(n_real, n_pad, tile):
    inv_n = 1.0 / float(n_real)

    def _row_mask():
        rows = jax.lax.broadcasted_iota(jnp.int32, (n_pad, 1), 0)
        return (rows < n_real).astype(jnp.float32)

    def _pad_cols(v):
        pad = jnp.zeros((n_pad, RHS_W - v.shape[1]), jnp.float32)
        return jnp.concatenate([v, pad], axis=-1)

    def kernel(inv2m_ref, x_ref, deg_ref, adj_ref,
               w1_ref, b1_ref, g1_ref, be1_ref,
               w2_ref, b2_ref, g2_ref, be2_ref,
               w3_ref, b3_ref, g3_ref, be3_ref,
               wf_ref, bf_ref,
               s_ref, q_ref,
               rhs_ref, agg_ref, hcat_ref, acc_ref):
        p = pl.program_id(0)
        i = pl.program_id(1)
        k = pl.program_id(2)
        nt_i = pl.num_programs(1)
        nt_k = pl.num_programs(2)
        is_start = jnp.logical_and(i == 0, k == 0)

        def _gin_finalize(self_f32, w, b, g, be):
            # Fused GIN MLP (Lin o Lin, no nonlinearity) + exact full-graph
            # training-mode BatchNorm1d (padded rows masked out of the stats).
            mask = _row_mask()
            z = jnp.dot(self_f32 + agg_ref[...], w,
                        preferred_element_type=jnp.float32) + b
            zm = z * mask
            mu = jnp.sum(zm, axis=0, keepdims=True) * inv_n
            d = (z - mu) * mask
            var = jnp.sum(d * d, axis=0, keepdims=True) * inv_n
            h = (z - mu) * jax.lax.rsqrt(var + BN_EPS) * g + be
            return h * mask

        # ---- phase boundaries: run once per phase at (i, k) == (0, 0) ----
        @pl.when(jnp.logical_and(p == 0, is_start))
        def _():
            rhs_ref[...] = x_ref[...].astype(jnp.bfloat16)

        @pl.when(jnp.logical_and(p == 1, is_start))
        def _():
            h1 = _gin_finalize(x_ref[...], w1_ref[...], b1_ref[...],
                               g1_ref[...], be1_ref[...])
            hcat_ref[:, 0:HIDDEN] = h1
            rhs_ref[...] = _pad_cols(h1).astype(jnp.bfloat16)

        @pl.when(jnp.logical_and(p == 2, is_start))
        def _():
            h1 = hcat_ref[:, 0:HIDDEN]
            h2 = _gin_finalize(_pad_cols(h1), w2_ref[...], b2_ref[...],
                               g2_ref[...], be2_ref[...])
            hcat_ref[:, HIDDEN:2 * HIDDEN] = h2
            rhs_ref[...] = _pad_cols(h2).astype(jnp.bfloat16)

        @pl.when(jnp.logical_and(p == 3, is_start))
        def _():
            h2 = hcat_ref[:, HIDDEN:2 * HIDDEN]
            h3 = _gin_finalize(_pad_cols(h2), w3_ref[...], b3_ref[...],
                               g3_ref[...], be3_ref[...])
            cat = jnp.concatenate([hcat_ref[...], h3], axis=-1)     # (N, 3*HIDDEN)
            logits = jnp.dot(cat, wf_ref[...],
                             preferred_element_type=jnp.float32) + bf_ref[...]
            logits = logits - jnp.max(logits, axis=-1, keepdims=True)
            e = jnp.exp(logits)
            s = (e / jnp.sum(e, axis=-1, keepdims=True)) * _row_mask()
            s_ref[...] = s
            rhs_ref[...] = _pad_cols(s).astype(jnp.bfloat16)

        # ---- streamed aggregation: native bf16 x bf16 MXU matmul, f32 accumulate ----
        ioff = pl.multiple_of(i * tile, tile)
        koff = pl.multiple_of(k * tile, tile)
        contrib = jnp.dot(adj_ref[0], rhs_ref[pl.ds(koff, tile), :],
                          preferred_element_type=jnp.float32)

        @pl.when(k == 0)
        def _():
            acc_ref[...] = contrib

        @pl.when(k != 0)
        def _():
            acc_ref[...] += contrib

        @pl.when(k == nt_k - 1)
        def _():
            agg_ref[pl.ds(ioff, tile), :] = acc_ref[...]

        # ---- modularity epilogue on the very last grid step ----
        is_end = jnp.logical_and(
            p == NUM_PHASES - 1,
            jnp.logical_and(i == nt_i - 1, k == nt_k - 1))

        @pl.when(is_end)
        def _():
            inv2m = inv2m_ref[...]                    # (1, 1)
            s = s_ref[...]                            # (N, OUT)
            a_s = agg_ref[:, 0:OUT_DIM]               # (N, OUT) = A_w @ s
            d_s = jnp.dot(deg_ref[...], s,            # (1, N) @ (N, OUT) -> (1, OUT)
                          preferred_element_type=jnp.float32)
            sas = jnp.sum(jnp.sum(s * a_s, axis=0, keepdims=True),
                          axis=1, keepdims=True)                     # (1, 1)
            dss = jnp.sum(d_s * d_s, axis=1, keepdims=True)          # (1, 1)
            q_ref[...] = (sas - dss * inv2m) * inv2m

    return kernel


def cd_gcn_net_forward(x, edge_index, edge_attr, params):
    """Host glue: fuse/pad params, densify the graph in bf16, launch the kernel."""
    n = int(x.shape[0])
    tile, n_pad, vmem_limit = _pick_tiling(n)
    nt = n_pad // tile

    src, dst = edge_index[0], edge_index[1]
    # Message-passing operator (unweighted scatter-add, row = dst, col = src),
    # built directly in bf16 (0/1 edge counts are exact) to avoid an f32 N^2 temp.
    ones_e = jnp.ones(src.shape, jnp.bfloat16)
    a_msg = jnp.zeros((n_pad, n_pad), jnp.bfloat16).at[dst, src].add(ones_e)
    if edge_attr is None:
        w_e = jnp.ones((edge_index.shape[1],), jnp.float32)
        adj = a_msg[None]                      # one array reused for all four passes
    else:
        # TODO(synk): bf16 rounds arbitrary edge weights (~3 significant digits);
        #             keep an f32 A_w path if high-precision weighted modularity is needed.
        w_e = edge_attr.reshape(-1).astype(jnp.float32)
        a_w = jnp.zeros((n_pad, n_pad), jnp.float32).at[dst, src].add(w_e)
        adj = jnp.stack([a_msg, a_w.astype(jnp.bfloat16)])
    n_adj = adj.shape[0]

    # Degree / 1/(2m) on the host (O(E)); lane-dense (1, n_pad); guard 2m == 0.
    deg = jnp.zeros((1, n_pad), jnp.float32).at[0, dst].add(w_e)
    two_m = jnp.sum(w_e)
    inv2m = jnp.where(two_m > 0, 1.0 / jnp.maximum(two_m, 1e-30), 0.0)
    inv2m = inv2m.reshape(1, 1).astype(jnp.float32)

    # Pad input features IN_DIM -> RHS_W and nodes n -> n_pad.
    x_pad = jnp.zeros((n_pad, RHS_W), jnp.float32).at[:n, :IN_DIM].set(
        x.astype(jnp.float32))

    (w11, b11, w12, b12, g1, be1,
     w21, b21, w22, b22, g2, be2,
     w31, b31, w32, b32, g3, be3,
     wf, bf) = params

    def fuse(wa, ba, wb, bb):
        # Lin o Lin with no nonlinearity between -> one affine map, zero-padded
        # in fan-in to the RHS_W-wide operand.
        wfu = jnp.dot(wa, wb)
        bfu = jnp.dot(ba, wb) + bb
        wfu = jnp.zeros((RHS_W, wfu.shape[1]), jnp.float32).at[:wfu.shape[0]].set(wfu)
        return wfu, bfu

    w1f, b1f = fuse(w11, b11, w12, b12)
    w2f, b2f = fuse(w21, b21, w22, b22)
    w3f, b3f = fuse(w31, b31, w32, b32)

    ins = [inv2m, x_pad, deg, adj,
           w1f, b1f, g1, be1,
           w2f, b2f, g2, be2,
           w3f, b3f, g3, be3,
           wf, bf]

    const2 = lambda p, i, k: (0, 0)
    full_spec = lambda a: pl.BlockSpec(a.shape, const2)

    if n_adj == 2:
        adj_map = lambda p, i, k: (p // (NUM_PHASES - 1), i, k)  # phases 0-2 -> A, 3 -> A_w
    else:
        adj_map = lambda p, i, k: (0, i, k)

    if nt > 1:
        # Streamed: third pipeline buffer hides the serial phase-boundary finalize.
        try:
            adj_spec = pl.BlockSpec((1, tile, tile), adj_map,
                                    pipeline_mode=pl.Buffered(3))
        except TypeError:  # older BlockSpec without pipeline_mode support
            adj_spec = pl.BlockSpec((1, tile, tile), adj_map)
    else:
        # Resident: constant block index -> the whole bf16 adjacency is DMA'd once.
        adj_spec = pl.BlockSpec((1, tile, tile), adj_map)

    in_specs = ([full_spec(inv2m), full_spec(x_pad), full_spec(deg), adj_spec]
                + [full_spec(a) for a in ins[4:]])

    grid_spec = pltpu.PrefetchScalarGridSpec(
        num_scalar_prefetch=0,
        grid=(NUM_PHASES, nt, nt),
        in_specs=in_specs,
        out_specs=(pl.BlockSpec((n_pad, OUT_DIM), const2),
                   pl.BlockSpec((1, 1), const2)),
        scratch_shapes=[
            pltpu.VMEM((n_pad, RHS_W), jnp.bfloat16),      # rhs: current A @ H operand
            pltpu.VMEM((n_pad, RHS_W), jnp.float32),       # agg: finished A @ H result
            pltpu.VMEM((n_pad, 2 * HIDDEN), jnp.float32),  # h1 | h2 store
            pltpu.VMEM((tile, RHS_W), jnp.float32),        # per-row-tile k accumulator
        ])

    s_pad, q = pl.pallas_call(
        _make_kernel(n, n_pad, tile),
        grid_spec=grid_spec,
        out_shape=(jax.ShapeDtypeStruct((n_pad, OUT_DIM), jnp.float32),
                   jax.ShapeDtypeStruct((1, 1), jnp.float32)),
        compiler_params=pltpu.CompilerParams(
            dimension_semantics=("arbitrary", "arbitrary", "arbitrary"),
            vmem_limit_bytes=int(vmem_limit)),
    )(*ins)
    return s_pad[:n], q


def init_params(key):
    """Deterministic synthetic init (PyTorch Linear-style uniform bounds)."""
    def lin(k, fan_in, fan_out):
        bound = 1.0 / (fan_in ** 0.5)
        kw, kb = jax.random.split(k)
        w = jax.random.uniform(kw, (fan_in, fan_out), jnp.float32, -bound, bound)
        b = jax.random.uniform(kb, (1, fan_out), jnp.float32, -bound, bound)
        return w, b

    ks = jax.random.split(key, 7)
    ones = jnp.ones((1, HIDDEN), jnp.float32)
    zeros = jnp.zeros((1, HIDDEN), jnp.float32)
    w11, b11 = lin(ks[0], IN_DIM, HIDDEN)
    w12, b12 = lin(ks[1], HIDDEN, HIDDEN)
    w21, b21 = lin(ks[2], HIDDEN, HIDDEN)
    w22, b22 = lin(ks[3], HIDDEN, HIDDEN)
    w31, b31 = lin(ks[4], HIDDEN, HIDDEN)
    w32, b32 = lin(ks[5], HIDDEN, HIDDEN)
    wf, bf = lin(ks[6], 3 * HIDDEN, OUT_DIM)
    return [w11, b11, w12, b12, ones, zeros,
            w21, b21, w22, b22, ones, zeros,
            w31, b31, w32, b32, ones, zeros,
            wf, bf]


def reference_forward(x, edge_index, edge_attr, params):
    """Pure-JAX reference (full f32 precision) of the original PyTorch forward."""
    hp = jax.lax.Precision.HIGHEST
    mm = functools.partial(jnp.dot, precision=hp)
    n = x.shape[0]
    src, dst = edge_index[0], edge_index[1]
    a = jnp.zeros((n, n), jnp.float32).at[dst, src].add(1.0)
    w_e = (jnp.ones((edge_index.shape[1],), jnp.float32)
           if edge_attr is None else edge_attr.astype(jnp.float32))
    a_w = jnp.zeros((n, n), jnp.float32).at[dst, src].add(w_e)

    (w11, b11, w12, b12, g1, be1,
     w21, b21, w22, b22, g2, be2,
     w31, b31, w32, b32, g3, be3,
     wf, bf) = params

    def gin(h, w1, b1, w2, b2, g, be):
        z = h + mm(a, h)
        z = mm(z, w1) + b1
        z = mm(z, w2) + b2
        mu = jnp.mean(z, axis=0, keepdims=True)
        var = jnp.mean((z - mu) ** 2, axis=0, keepdims=True)
        return (z - mu) / jnp.sqrt(var + BN_EPS) * g + be

    h1 = gin(x.astype(jnp.float32), w11, b11, w12, b12, g1, be1)
    h2 = gin(h1, w21, b21, w22, b22, g2, be2)
    h3 = gin(h2, w31, b31, w32, b32, g3, be3)
    cat = jnp.concatenate([h1, h2, h3], axis=-1)
    logits = mm(cat, wf) + bf
    s = jax.nn.softmax(logits, axis=-1)

    deg = jnp.sum(a_w, axis=-1, keepdims=True)
    two_m = jnp.sum(deg)
    a_s = mm(a_w, s)
    d_s = jnp.sum(deg * s, axis=0, keepdims=True)
    q = (jnp.sum(s * a_s) - jnp.sum(d_s * d_s) / two_m) / two_m
    return s, q


if __name__ == "__main__":
    key = jax.random.PRNGKey(0)
    kx, kp = jax.random.split(key, 2)

    n_nodes = 16
    x = jax.random.normal(kx, (n_nodes, IN_DIM), jnp.float32)

    # Small deterministic graph: undirected ring stored as directed edges both ways.
    fwd = jnp.arange(n_nodes, dtype=jnp.int32)
    nxt = (fwd + 1) % n_nodes
    edge_index = jnp.stack([jnp.concatenate([fwd, nxt]),
                            jnp.concatenate([nxt, fwd])], axis=0)   # (2, 32)

    params = init_params(kp)

    s, q = jax.jit(cd_gcn_net_forward)(x, edge_index, None, params)
    jax.block_until_ready(s)
    jax.block_until_ready(q)
    assert s.shape == (n_nodes, OUT_DIM) and q.shape == (1, 1)

    s_ref, q_ref = jax.jit(reference_forward)(x, edge_index, None, params)
    jax.block_until_ready(s_ref)
    # Tolerance accounts for the deliberate bf16 MXU aggregation path vs the
    # full-f32 reference (adjacency is exact; only A@H operands are rounded).
    assert float(jnp.max(jnp.abs(s - s_ref))) < 2e-2
    assert float(jnp.abs(q[0, 0] - q_ref)) < 2e-2

    print("KERNEL_OK")
</pallas_src>

<mosaic_0001>
module attributes {stable_mosaic.version = 11 : i64} {
  func.func private @main(%arg0: i32) attributes {dimension_semantics = [#tpu.dimension_semantics<core_parallel>], iteration_bounds = array<i64: 2>, tpu.core_type = #tpu.core_type<sc_scalar_subcore>, window_params = []} {
    return
  }
}

module attributes {stable_mosaic.version = 11 : i64} {
  func.func private @main(%arg0: i32) attributes {dimension_semantics = [#tpu.dimension_semantics<core_parallel>], iteration_bounds = array<i64: 2>, tpu.core_type = #tpu.core_type<sc_scalar_subcore>, window_params = []} {
    return
  }
}

module attributes {stable_mosaic.version = 11 : i64} {
  func.func @kernel(%arg0: i32, %arg1: i32, %arg2: i32, %arg3: memref<1x1xf32, #tpu.memory_space<vmem>>, %arg4: memref<128x16xf32, #tpu.memory_space<vmem>>, %arg5: memref<1x128xf32, #tpu.memory_space<vmem>>, %arg6: memref<1x128x128xbf16, #tpu.memory_space<vmem>>, %arg7: memref<16x10xf32, #tpu.memory_space<vmem>>, %arg8: memref<1x10xf32, #tpu.memory_space<vmem>>, %arg9: memref<1x10xf32, #tpu.memory_space<vmem>>, %arg10: memref<1x10xf32, #tpu.memory_space<vmem>>, %arg11: memref<16x10xf32, #tpu.memory_space<vmem>>, %arg12: memref<1x10xf32, #tpu.memory_space<vmem>>, %arg13: memref<1x10xf32, #tpu.memory_space<vmem>>, %arg14: memref<1x10xf32, #tpu.memory_space<vmem>>, %arg15: memref<16x10xf32, #tpu.memory_space<vmem>>, %arg16: memref<1x10xf32, #tpu.memory_space<vmem>>, %arg17: memref<1x10xf32, #tpu.memory_space<vmem>>, %arg18: memref<1x10xf32, #tpu.memory_space<vmem>>, %arg19: memref<30x4xf32, #tpu.memory_space<vmem>>, %arg20: memref<1x4xf32, #tpu.memory_space<vmem>>, %arg21: memref<128x4xf32, #tpu.memory_space<vmem>>, %arg22: memref<1x1xf32, #tpu.memory_space<vmem>>, %arg23: memref<128x16xbf16, #tpu.memory_space<vmem>>, %arg24: memref<128x16xf32, #tpu.memory_space<vmem>>, %arg25: memref<128x20xf32, #tpu.memory_space<vmem>>, %arg26: memref<128x16xf32, #tpu.memory_space<vmem>>) attributes {dimension_semantics = [#tpu.dimension_semantics<arbitrary>, #tpu.dimension_semantics<arbitrary>, #tpu.dimension_semantics<arbitrary>], iteration_bounds = array<i64: 4, 1, 1>, scalar_prefetch = 0 : i64, scratch_operands = 4 : i64, tpu.core_type = #tpu.core_type<tc>, window_params = [{pipeline_mode = #tpu.pipeline_mode<synchronous>, transform_indices = @transform_0, window_bounds = array<i64: 1, 1>}, {pipeline_mode = #tpu.pipeline_mode<synchronous>, transform_indices = @transform_1, window_bounds = array<i64: 128, 16>}, {pipeline_mode = #tpu.pipeline_mode<synchronous>, transform_indices = @transform_2, window_bounds = array<i64: 1, 128>}, {transform_indices = @transform_3, window_bounds = array<i64: 1, 128, 128>}, {pipeline_mode = #tpu.pipeline_mode<synchronous>, transform_indices = @transform_4, window_bounds = array<i64: 16, 10>}, {pipeline_mode = #tpu.pipeline_mode<synchronous>, transform_indices = @transform_5, window_bounds = array<i64: 1, 10>}, {pipeline_mode = #tpu.pipeline_mode<synchronous>, transform_indices = @transform_6, window_bounds = array<i64: 1, 10>}, {pipeline_mode = #tpu.pipeline_mode<synchronous>, transform_indices = @transform_7, window_bounds = array<i64: 1, 10>}, {pipeline_mode = #tpu.pipeline_mode<synchronous>, transform_indices = @transform_8, window_bounds = array<i64: 16, 10>}, {pipeline_mode = #tpu.pipeline_mode<synchronous>, transform_indices = @transform_9, window_bounds = array<i64: 1, 10>}, {pipeline_mode = #tpu.pipeline_mode<synchronous>, transform_indices = @transform_10, window_bounds = array<i64: 1, 10>}, {pipeline_mode = #tpu.pipeline_mode<synchronous>, transform_indices = @transform_11, window_bounds = array<i64: 1, 10>}, {pipeline_mode = #tpu.pipeline_mode<synchronous>, transform_indices = @transform_12, window_bounds = array<i64: 16, 10>}, {pipeline_mode = #tpu.pipeline_mode<synchronous>, transform_indices = @transform_13, window_bounds = array<i64: 1, 10>}, {pipeline_mode = #tpu.pipeline_mode<synchronous>, transform_indices = @transform_14, window_bounds = array<i64: 1, 10>}, {pipeline_mode = #tpu.pipeline_mode<synchronous>, transform_indices = @transform_15, window_bounds = array<i64: 1, 10>}, {pipeline_mode = #tpu.pipeline_mode<synchronous>, transform_indices = @transform_16, window_bounds = array<i64: 30, 4>}, {pipeline_mode = #tpu.pipeline_mode<synchronous>, transform_indices = @transform_17, window_bounds = array<i64: 1, 4>}, {pipeline_mode = #tpu.pipeline_mode<synchronous>, transform_indices = @transform_18, window_bounds = array<i64: 128, 4>}, {pipeline_mode = #tpu.pipeline_mode<synchronous>, transform_indices = @transform_19, window_bounds = array<i64: 1, 1>}]} {
    %c0_i32 = arith.constant 0 : i32
    %0 = arith.cmpi eq, %arg1, %c0_i32 : i32
    %c0_i32_0 = arith.constant 0 : i32
    %1 = arith.cmpi eq, %arg2, %c0_i32_0 : i32
    %2 = arith.andi %0, %1 : i1
    %c0_i32_1 = arith.constant 0 : i32
    %3 = arith.cmpi eq, %arg0, %c0_i32_1 : i32
    %4 = arith.andi %3, %2 : i1
    %5 = arith.extui %4 : i1 to i32
    %c0_i32_2 = arith.constant 0 : i32
    %6 = arith.cmpi ne, %5, %c0_i32_2 : i32
    scf.if %6 {
      %c0_20 = arith.constant 0 : index
      %c0_21 = arith.constant 0 : index
      %44 = vector.load %arg4[%c0_20, %c0_21] : memref<128x16xf32, #tpu.memory_space<vmem>>, vector<128x16xf32>
      %45 = arith.truncf %44 : vector<128x16xf32> to vector<128x16xbf16>
      %c0_22 = arith.constant 0 : index
      %c0_23 = arith.constant 0 : index
      %46 = vector.load %arg23[%c0_22, %c0_23] : memref<128x16xbf16, #tpu.memory_space<vmem>>, vector<128x16xbf16>
      tpu.vector_store %arg23[%c0_22, %c0_23], %45 {strides = array<i32>} : memref<128x16xbf16, #tpu.memory_space<vmem>>, vector<128x16xbf16>,
    } else {
    }
    %c1_i32 = arith.constant 1 : i32
    %7 = arith.cmpi eq, %arg0, %c1_i32 : i32
    %8 = arith.andi %7, %2 : i1
    %9 = arith.extui %8 : i1 to i32
    %c0_i32_3 = arith.constant 0 : i32
    %10 = arith.cmpi ne, %9, %c0_i32_3 : i32
    scf.if %10 {
      %c0_20 = arith.constant 0 : index
      %c0_21 = arith.constant 0 : index
      %44 = vector.load %arg4[%c0_20, %c0_21] : memref<128x16xf32, #tpu.memory_space<vmem>>, vector<128x16xf32>
      %c0_22 = arith.constant 0 : index
      %c0_23 = arith.constant 0 : index
      %45 = vector.load %arg7[%c0_22, %c0_23] : memref<16x10xf32, #tpu.memory_space<vmem>>, vector<16x10xf32>
      %c0_24 = arith.constant 0 : index
      %c0_25 = arith.constant 0 : index
      %46 = vector.load %arg8[%c0_24, %c0_25] : memref<1x10xf32, #tpu.memory_space<vmem>>, vector<1x10xf32>
      %c0_26 = arith.constant 0 : index
      %c0_27 = arith.constant 0 : index
      %47 = vector.load %arg9[%c0_26, %c0_27] : memref<1x10xf32, #tpu.memory_space<vmem>>, vector<1x10xf32>
      %c0_28 = arith.constant 0 : index
      %c0_29 = arith.constant 0 : index
      %48 = vector.load %arg10[%c0_28, %c0_29] : memref<1x10xf32, #tpu.memory_space<vmem>>, vector<1x10xf32>
      %49 = tpu.iota {dimensions = array<i32: 0>} : vector<128x1xi32>
      %c16_i32 = arith.constant 16 : i32
      %50 = vector.broadcast %c16_i32 : i32 to vector<128x1xi32>
      %51 = arith.cmpi slt, %49, %50 : vector<128x1xi32>
      %52 = arith.extui %51 : vector<128x1xi1> to vector<128x1xi32>
      %53 = arith.sitofp %52 : vector<128x1xi32> to vector<128x1xf32>
      %c0_30 = arith.constant 0 : index
      %c0_31 = arith.constant 0 : index
      %54 = vector.load %arg24[%c0_30, %c0_31] : memref<128x16xf32, #tpu.memory_space<vmem>>, vector<128x16xf32>
      %55 = arith.addf %44, %54 : vector<128x16xf32>
      %cst_32 = arith.constant dense<0.000000e+00> : vector<128x10xf32>
      %56 = tpu.matmul %55, %45, %cst_32 {dimension_numbers = #tpu.dot_dimension_numbers<[1], [0], [0], [1], [0, 0, 1, 1], [], []>} : vector<128x16xf32>, vector<16x10xf32>, vector<128x10xf32> -> vector<128x10xf32>
      %57 = vector.broadcast %46 : vector<1x10xf32> to vector<128x10xf32>
      %58 = arith.addf %56, %57 : vector<128x10xf32>
      %59 = vector.broadcast %53 : vector<128x1xf32> to vector<128x10xf32>
      %60 = arith.mulf %58, %59 : vector<128x10xf32>
      %cst_33 = arith.constant dense<0.000000e+00> : vector<10xf32>
      %61 = vector.multi_reduction <add>, %60, %cst_33 [0] : vector<128x10xf32> to vector<10xf32>
      %62 = vector.shape_cast %61 : vector<10xf32> to vector<1x10xf32>
      %cst_34 = arith.constant 6.250000e-02 : f32
      %63 = vector.broadcast %cst_34 : f32 to vector<1x10xf32>
      %64 = arith.mulf %62, %63 : vector<1x10xf32>
      %65 = vector.broadcast %64 : vector<1x10xf32> to vector<128x10xf32>
      %66 = arith.subf %58, %65 : vector<128x10xf32>
      %67 = vector.broadcast %53 : vector<128x1xf32> to vector<128x10xf32>
      %68 = arith.mulf %66, %67 : vector<128x10xf32>
      %69 = arith.mulf %68, %68 : vector<128x10xf32>
      %cst_35 = arith.constant dense<0.000000e+00> : vector<10xf32>
      %70 = vector.multi_reduction <add>, %69, %cst_35 [0] : vector<128x10xf32> to vector<10xf32>
      %71 = vector.shape_cast %70 : vector<10xf32> to vector<1x10xf32>
      %cst_36 = arith.constant 6.250000e-02 : f32
      %72 = vector.broadcast %cst_36 : f32 to vector<1x10xf32>
      %73 = arith.mulf %71, %72 : vector<1x10xf32>
      %74 = vector.broadcast %64 : vector<1x10xf32> to vector<128x10xf32>
      %75 = arith.subf %58, %74 : vector<128x10xf32>
      %cst_37 = arith.constant 9.99999974E-6 : f32
      %76 = vector.broadcast %cst_37 : f32 to vector<1x10xf32>
      %77 = arith.addf %73, %76 : vector<1x10xf32>
      %78 = math.rsqrt %77 : vector<1x10xf32>
      %79 = vector.broadcast %78 : vector<1x10xf32> to vector<128x10xf32>
      %80 = arith.mulf %75, %79 : vector<128x10xf32>
      %81 = vector.broadcast %47 : vector<1x10xf32> to vector<128x10xf32>
      %82 = arith.mulf %80, %81 : vector<128x10xf32>
      %83 = vector.broadcast %48 : vector<1x10xf32> to vector<128x10xf32>
      %84 = arith.addf %82, %83 : vector<128x10xf32>
      %85 = vector.broadcast %53 : vector<128x1xf32> to vector<128x10xf32>
      %86 = arith.mulf %84, %85 : vector<128x10xf32>
      %c0_38 = arith.constant 0 : index
      %c0_39 = arith.constant 0 : index
      %87 = vector.load %arg25[%c0_38, %c0_39] : memref<128x20xf32, #tpu.memory_space<vmem>>, vector<128x10xf32>
      tpu.vector_store %arg25[%c0_38, %c0_39], %86 {strides = array<i32>} : memref<128x20xf32, #tpu.memory_space<vmem>>, vector<128x10xf32>,
      %cst_40 = arith.constant 0.000000e+00 : f32
      %88 = vector.broadcast %cst_40 : f32 to vector<128x6xf32>
      %89 = tpu.concatenate %86, %88 in 1 : vector<128x10xf32>, vector<128x6xf32> -> vector<128x16xf32>
      %90 = arith.truncf %89 : vector<128x16xf32> to vector<128x16xbf16>
      %c0_41 = arith.constant 0 : index
      %c0_42 = arith.constant 0 : index
      %91 = vector.load %arg23[%c0_41, %c0_42] : memref<128x16xbf16, #tpu.memory_space<vmem>>, vector<128x16xbf16>
      tpu.vector_store %arg23[%c0_41, %c0_42], %90 {strides = array<i32>} : memref<128x16xbf16, #tpu.memory_space<vmem>>, vector<128x16xbf16>,
    } else {
    }
    %c2_i32 = arith.constant 2 : i32
    %11 = arith.cmpi eq, %arg0, %c2_i32 : i32
    %12 = arith.andi %11, %2 : i1
    %13 = arith.extui %12 : i1 to i32
    %c0_i32_4 = arith.constant 0 : i32
    %14 = arith.cmpi ne, %13, %c0_i32_4 : i32
    scf.if %14 {
      %c0_20 = arith.constant 0 : index
      %c0_21 = arith.constant 0 : index
      %44 = vector.load %arg25[%c0_20, %c0_21] : memref<128x20xf32, #tpu.memory_space<vmem>>, vector<128x10xf32>
      %cst_22 = arith.constant 0.000000e+00 : f32
      %45 = vector.broadcast %cst_22 : f32 to vector<128x6xf32>
      %46 = tpu.concatenate %44, %45 in 1 : vector<128x10xf32>, vector<128x6xf32> -> vector<128x16xf32>
      %c0_23 = arith.constant 0 : index
      %c0_24 = arith.constant 0 : index
      %47 = vector.load %arg11[%c0_23, %c0_24] : memref<16x10xf32, #tpu.memory_space<vmem>>, vector<16x10xf32>
      %c0_25 = arith.constant 0 : index
      %c0_26 = arith.constant 0 : index
      %48 = vector.load %arg12[%c0_25, %c0_26] : memref<1x10xf32, #tpu.memory_space<vmem>>, vector<1x10xf32>
      %c0_27 = arith.constant 0 : index
      %c0_28 = arith.constant 0 : index
      %49 = vector.load %arg13[%c0_27, %c0_28] : memref<1x10xf32, #tpu.memory_space<vmem>>, vector<1x10xf32>
      %c0_29 = arith.constant 0 : index
      %c0_30 = arith.constant 0 : index
      %50 = vector.load %arg14[%c0_29, %c0_30] : memref<1x10xf32, #tpu.memory_space<vmem>>, vector<1x10xf32>
      %51 = tpu.iota {dimensions = array<i32: 0>} : vector<128x1xi32>
      %c16_i32 = arith.constant 16 : i32
      %52 = vector.broadcast %c16_i32 : i32 to vector<128x1xi32>
      %53 = arith.cmpi slt, %51, %52 : vector<128x1xi32>
      %54 = arith.extui %53 : vector<128x1xi1> to vector<128x1xi32>
      %55 = arith.sitofp %54 : vector<128x1xi32> to vector<128x1xf32>
      %c0_31 = arith.constant 0 : index
      %c0_32 = arith.constant 0 : index
      %56 = vector.load %arg24[%c0_31, %c0_32] : memref<128x16xf32, #tpu.memory_space<vmem>>, vector<128x16xf32>
      %57 = arith.addf %46, %56 : vector<128x16xf32>
      %cst_33 = arith.constant dense<0.000000e+00> : vector<128x10xf32>
      %58 = tpu.matmul %57, %47, %cst_33 {dimension_numbers = #tpu.dot_dimension_numbers<[1], [0], [0], [1], [0, 0, 1, 1], [], []>} : vector<128x16xf32>, vector<16x10xf32>, vector<128x10xf32> -> vector<128x10xf32>
      %59 = vector.broadcast %48 : vector<1x10xf32> to vector<128x10xf32>
      %60 = arith.addf %58, %59 : vector<128x10xf32>
      %61 = vector.broadcast %55 : vector<128x1xf32> to vector<128x10xf32>
      %62 = arith.mulf %60, %61 : vector<128x10xf32>
      %cst_34 = arith.constant dense<0.000000e+00> : vector<10xf32>
      %63 = vector.multi_reduction <add>, %62, %cst_34 [0] : vector<128x10xf32> to vector<10xf32>
      %64 = vector.shape_cast %63 : vector<10xf32> to vector<1x10xf32>
      %cst_35 = arith.constant 6.250000e-02 : f32
      %65 = vector.broadcast %cst_35 : f32 to vector<1x10xf32>
      %66 = arith.mulf %64, %65 : vector<1x10xf32>
      %67 = vector.broadcast %66 : vector<1x10xf32> to vector<128x10xf32>
      %68 = arith.subf %60, %67 : vector<128x10xf32>
      %69 = vector.broadcast %55 : vector<128x1xf32> to vector<128x10xf32>
      %70 = arith.mulf %68, %69 : vector<128x10xf32>
      %71 = arith.mulf %70, %70 : vector<128x10xf32>
      %cst_36 = arith.constant dense<0.000000e+00> : vector<10xf32>
      %72 = vector.multi_reduction <add>, %71, %cst_36 [0] : vector<128x10xf32> to vector<10xf32>
      %73 = vector.shape_cast %72 : vector<10xf32> to vector<1x10xf32>
      %cst_37 = arith.constant 6.250000e-02 : f32
      %74 = vector.broadcast %cst_37 : f32 to vector<1x10xf32>
      %75 = arith.mulf %73, %74 : vector<1x10xf32>
      %76 = vector.broadcast %66 : vector<1x10xf32> to vector<128x10xf32>
      %77 = arith.subf %60, %76 : vector<128x10xf32>
      %cst_38 = arith.constant 9.99999974E-6 : f32
      %78 = vector.broadcast %cst_38 : f32 to vector<1x10xf32>
      %79 = arith.addf %75, %78 : vector<1x10xf32>
      %80 = math.rsqrt %79 : vector<1x10xf32>
      %81 = vector.broadcast %80 : vector<1x10xf32> to vector<128x10xf32>
      %82 = arith.mulf %77, %81 : vector<128x10xf32>
      %83 = vector.broadcast %49 : vector<1x10xf32> to vector<128x10xf32>
      %84 = arith.mulf %82, %83 : vector<128x10xf32>
      %85 = vector.broadcast %50 : vector<1x10xf32> to vector<128x10xf32>
      %86 = arith.addf %84, %85 : vector<128x10xf32>
      %87 = vector.broadcast %55 : vector<128x1xf32> to vector<128x10xf32>
      %88 = arith.mulf %86, %87 : vector<128x10xf32>
      %c0_39 = arith.constant 0 : index
      %c10 = arith.constant 10 : index
      %89 = vector.load %arg25[%c0_39, %c10] : memref<128x20xf32, #tpu.memory_space<vmem>>, vector<128x10xf32>
      tpu.vector_store %arg25[%c0_39, %c10], %88 {strides = array<i32>} : memref<128x20xf32, #tpu.memory_space<vmem>>, vector<128x10xf32>,
      %cst_40 = arith.constant 0.000000e+00 : f32
      %90 = vector.broadcast %cst_40 : f32 to vector<128x6xf32>
      %91 = tpu.concatenate %88, %90 in 1 : vector<128x10xf32>, vector<128x6xf32> -> vector<128x16xf32>
      %92 = arith.truncf %91 : vector<128x16xf32> to vector<128x16xbf16>
      %c0_41 = arith.constant 0 : index
      %c0_42 = arith.constant 0 : index
      %93 = vector.load %arg23[%c0_41, %c0_42] : memref<128x16xbf16, #tpu.memory_space<vmem>>, vector<128x16xbf16>
      tpu.vector_store %arg23[%c0_41, %c0_42], %92 {strides = array<i32>} : memref<128x16xbf16, #tpu.memory_space<vmem>>, vector<128x16xbf16>,
    } else {
    }
    %c3_i32 = arith.constant 3 : i32
    %15 = arith.cmpi eq, %arg0, %c3_i32 : i32
    %16 = arith.andi %15, %2 : i1
    %17 = arith.extui %16 : i1 to i32
    %c0_i32_5 = arith.constant 0 : i32
    %18 = arith.cmpi ne, %17, %c0_i32_5 : i32
    scf.if %18 {
      %c0_20 = arith.constant 0 : index
      %c10 = arith.constant 10 : index
      %44 = vector.load %arg25[%c0_20, %c10] : memref<128x20xf32, #tpu.memory_space<vmem>>, vector<128x10xf32>
      %cst_21 = arith.constant 0.000000e+00 : f32
      %45 = vector.broadcast %cst_21 : f32 to vector<128x6xf32>
      %46 = tpu.concatenate %44, %45 in 1 : vector<128x10xf32>, vector<128x6xf32> -> vector<128x16xf32>
      %c0_22 = arith.constant 0 : index
      %c0_23 = arith.constant 0 : index
      %47 = vector.load %arg15[%c0_22, %c0_23] : memref<16x10xf32, #tpu.memory_space<vmem>>, vector<16x10xf32>
      %c0_24 = arith.constant 0 : index
      %c0_25 = arith.constant 0 : index
      %48 = vector.load %arg16[%c0_24, %c0_25] : memref<1x10xf32, #tpu.memory_space<vmem>>, vector<1x10xf32>
      %c0_26 = arith.constant 0 : index
      %c0_27 = arith.constant 0 : index
      %49 = vector.load %arg17[%c0_26, %c0_27] : memref<1x10xf32, #tpu.memory_space<vmem>>, vector<1x10xf32>
      %c0_28 = arith.constant 0 : index
      %c0_29 = arith.constant 0 : index
      %50 = vector.load %arg18[%c0_28, %c0_29] : memref<1x10xf32, #tpu.memory_space<vmem>>, vector<1x10xf32>
      %51 = tpu.iota {dimensions = array<i32: 0>} : vector<128x1xi32>
      %c16_i32 = arith.constant 16 : i32
      %52 = vector.broadcast %c16_i32 : i32 to vector<128x1xi32>
      %53 = arith.cmpi slt, %51, %52 : vector<128x1xi32>
      %54 = arith.extui %53 : vector<128x1xi1> to vector<128x1xi32>
      %55 = arith.sitofp %54 : vector<128x1xi32> to vector<128x1xf32>
      %c0_30 = arith.constant 0 : index
      %c0_31 = arith.constant 0 : index
      %56 = vector.load %arg24[%c0_30, %c0_31] : memref<128x16xf32, #tpu.memory_space<vmem>>, vector<128x16xf32>
      %57 = arith.addf %46, %56 : vector<128x16xf32>
      %cst_32 = arith.constant dense<0.000000e+00> : vector<128x10xf32>
      %58 = tpu.matmul %57, %47, %cst_32 {dimension_numbers = #tpu.dot_dimension_numbers<[1], [0], [0], [1], [0, 0, 1, 1], [], []>} : vector<128x16xf32>, vector<16x10xf32>, vector<128x10xf32> -> vector<128x10xf32>
      %59 = vector.broadcast %48 : vector<1x10xf32> to vector<128x10xf32>
      %60 = arith.addf %58, %59 : vector<128x10xf32>
      %61 = vector.broadcast %55 : vector<128x1xf32> to vector<128x10xf32>
      %62 = arith.mulf %60, %61 : vector<128x10xf32>
      %cst_33 = arith.constant dense<0.000000e+00> : vector<10xf32>
      %63 = vector.multi_reduction <add>, %62, %cst_33 [0] : vector<128x10xf32> to vector<10xf32>
      %64 = vector.shape_cast %63 : vector<10xf32> to vector<1x10xf32>
      %cst_34 = arith.constant 6.250000e-02 : f32
      %65 = vector.broadcast %cst_34 : f32 to vector<1x10xf32>
      %66 = arith.mulf %64, %65 : vector<1x10xf32>
      %67 = vector.broadcast %66 : vector<1x10xf32> to vector<128x10xf32>
      %68 = arith.subf %60, %67 : vector<128x10xf32>
      %69 = vector.broadcast %55 : vector<128x1xf32> to vector<128x10xf32>
      %70 = arith.mulf %68, %69 : vector<128x10xf32>
      %71 = arith.mulf %70, %70 : vector<128x10xf32>
      %cst_35 = arith.constant dense<0.000000e+00> : vector<10xf32>
      %72 = vector.multi_reduction <add>, %71, %cst_35 [0] : vector<128x10xf32> to vector<10xf32>
      %73 = vector.shape_cast %72 : vector<10xf32> to vector<1x10xf32>
      %cst_36 = arith.constant 6.250000e-02 : f32
      %74 = vector.broadcast %cst_36 : f32 to vector<1x10xf32>
      %75 = arith.mulf %73, %74 : vector<1x10xf32>
      %76 = vector.broadcast %66 : vector<1x10xf32> to vector<128x10xf32>
      %77 = arith.subf %60, %76 : vector<128x10xf32>
      %cst_37 = arith.constant 9.99999974E-6 : f32
      %78 = vector.broadcast %cst_37 : f32 to vector<1x10xf32>
      %79 = arith.addf %75, %78 : vector<1x10xf32>
      %80 = math.rsqrt %79 : vector<1x10xf32>
      %81 = vector.broadcast %80 : vector<1x10xf32> to vector<128x10xf32>
      %82 = arith.mulf %77, %81 : vector<128x10xf32>
      %83 = vector.broadcast %49 : vector<1x10xf32> to vector<128x10xf32>
      %84 = arith.mulf %82, %83 : vector<128x10xf32>
      %85 = vector.broadcast %50 : vector<1x10xf32> to vector<128x10xf32>
      %86 = arith.addf %84, %85 : vector<128x10xf32>
      %87 = vector.broadcast %55 : vector<128x1xf32> to vector<128x10xf32>
      %88 = arith.mulf %86, %87 : vector<128x10xf32>
      %c0_38 = arith.constant 0 : index
      %c0_39 = arith.constant 0 : index
      %89 = vector.load %arg25[%c0_38, %c0_39] : memref<128x20xf32, #tpu.memory_space<vmem>>, vector<128x20xf32>
      %90 = tpu.concatenate %89, %88 in 1 : vector<128x20xf32>, vector<128x10xf32> -> vector<128x30xf32>
      %c0_40 = arith.constant 0 : index
      %c0_41 = arith.constant 0 : index
      %91 = vector.load %arg19[%c0_40, %c0_41] : memref<30x4xf32, #tpu.memory_space<vmem>>, vector<30x4xf32>
      %cst_42 = arith.constant dense<0.000000e+00> : vector<128x4xf32>
      %92 = tpu.matmul %90, %91, %cst_42 {dimension_numbers = #tpu.dot_dimension_numbers<[1], [0], [0], [1], [0, 0, 1, 1], [], []>} : vector<128x30xf32>, vector<30x4xf32>, vector<128x4xf32> -> vector<128x4xf32>
      %c0_43 = arith.constant 0 : index
      %c0_44 = arith.constant 0 : index
      %93 = vector.load %arg20[%c0_43, %c0_44] : memref<1x4xf32, #tpu.memory_space<vmem>>, vector<1x4xf32>
      %94 = vector.broadcast %93 : vector<1x4xf32> to vector<128x4xf32>
      %95 = arith.addf %92, %94 : vector<128x4xf32>
      %cst_45 = arith.constant dense<0xFF800000> : vector<128xf32>
      %96 = vector.multi_reduction <maximumf>, %95, %cst_45 [1] : vector<128x4xf32> to vector<128xf32>
      %97 = vector.shape_cast %96 : vector<128xf32> to vector<128x1xf32>
      %98 = vector.broadcast %97 : vector<128x1xf32> to vector<128x4xf32>
      %99 = arith.subf %95, %98 : vector<128x4xf32>
      %100 = math.exp %99 : vector<128x4xf32>
      %cst_46 = arith.constant dense<0.000000e+00> : vector<128xf32>
      %101 = vector.multi_reduction <add>, %100, %cst_46 [1] : vector<128x4xf32> to vector<128xf32>
      %102 = vector.shape_cast %101 : vector<128xf32> to vector<128x1xf32>
      %103 = vector.broadcast %102 : vector<128x1xf32> to vector<128x4xf32>
      %104 = arith.divf %100, %103 : vector<128x4xf32>
      %105 = tpu.iota {dimensions = array<i32: 0>} : vector<128x1xi32>
      %c16_i32_47 = arith.constant 16 : i32
      %106 = vector.broadcast %c16_i32_47 : i32 to vector<128x1xi32>
      %107 = arith.cmpi slt, %105, %106 : vector<128x1xi32>
      %108 = arith.extui %107 : vector<128x1xi1> to vector<128x1xi32>
      %109 = arith.sitofp %108 : vector<128x1xi32> to vector<128x1xf32>
      %110 = vector.broadcast %109 : vector<128x1xf32> to vector<128x4xf32>
      %111 = arith.mulf %104, %110 : vector<128x4xf32>
      %c0_48 = arith.constant 0 : index
      %c0_49 = arith.constant 0 : index
      %112 = vector.load %arg21[%c0_48, %c0_49] : memref<128x4xf32, #tpu.memory_space<vmem>>, vector<128x4xf32>
      tpu.vector_store %arg21[%c0_48, %c0_49], %111 {strides = array<i32>} : memref<128x4xf32, #tpu.memory_space<vmem>>, vector<128x4xf32>,
      %cst_50 = arith.constant 0.000000e+00 : f32
      %113 = vector.broadcast %cst_50 : f32 to vector<128x12xf32>
      %114 = tpu.concatenate %111, %113 in 1 : vector<128x4xf32>, vector<128x12xf32> -> vector<128x16xf32>
      %115 = arith.truncf %114 : vector<128x16xf32> to vector<128x16xbf16>
      %c0_51 = arith.constant 0 : index
      %c0_52 = arith.constant 0 : index
      %116 = vector.load %arg23[%c0_51, %c0_52] : memref<128x16xbf16, #tpu.memory_space<vmem>>, vector<128x16xbf16>
      tpu.vector_store %arg23[%c0_51, %c0_52], %115 {strides = array<i32>} : memref<128x16xbf16, #tpu.memory_space<vmem>>, vector<128x16xbf16>,
    } else {
    }
    %c128_i32 = arith.constant 128 : i32
    %19 = arith.muli %arg1, %c128_i32 : i32
    %20 = tpu.assume_multiple %19, 128 : i32
    %c128_i32_6 = arith.constant 128 : i32
    %21 = arith.muli %arg2, %c128_i32_6 : i32
    %22 = tpu.assume_multiple %21, 128 : i32
    %c0 = arith.constant 0 : index
    %c0_7 = arith.constant 0 : index
    %c0_8 = arith.constant 0 : index
    %23 = vector.load %arg6[%c0, %c0_7, %c0_8] : memref<1x128x128xbf16, #tpu.memory_space<vmem>>, vector<1x128x128xbf16>
    %24 = vector.shape_cast %23 : vector<1x128x128xbf16> to vector<128x128xbf16>
    %25 = arith.index_cast %22 : i32 to index
    %c0_9 = arith.constant 0 : index
    %26 = vector.load %arg23[%25, %c0_9] : memref<128x16xbf16, #tpu.memory_space<vmem>>, vector<128x16xbf16>
    %cst = arith.constant dense<0.000000e+00> : vector<128x16xf32>
    %27 = tpu.matmul %24, %26, %cst {dimension_numbers = #tpu.dot_dimension_numbers<[1], [0], [0], [1], [0, 0, 1, 1], [], []>} : vector<128x128xbf16>, vector<128x16xbf16>, vector<128x16xf32> -> vector<128x16xf32>
    %c0_i32_10 = arith.constant 0 : i32
    %28 = arith.cmpi eq, %arg2, %c0_i32_10 : i32
    %29 = arith.extui %28 : i1 to i32
    %c0_i32_11 = arith.constant 0 : i32
    %30 = arith.cmpi ne, %29, %c0_i32_11 : i32
    scf.if %30 {
      %c0_20 = arith.constant 0 : index
      %c0_21 = arith.constant 0 : index
      %44 = vector.load %arg26[%c0_20, %c0_21] : memref<128x16xf32, #tpu.memory_space<vmem>>, vector<128x16xf32>
      tpu.vector_store %arg26[%c0_20, %c0_21], %27 {strides = array<i32>} : memref<128x16xf32, #tpu.memory_space<vmem>>, vector<128x16xf32>,
    } else {
    }
    %c0_i32_12 = arith.constant 0 : i32
    %31 = arith.cmpi ne, %arg2, %c0_i32_12 : i32
    %32 = arith.extui %31 : i1 to i32
    %c0_i32_13 = arith.constant 0 : i32
    %33 = arith.cmpi ne, %32, %c0_i32_13 : i32
    scf.if %33 {
      %c0_20 = arith.constant 0 : index
      %c0_21 = arith.constant 0 : index
      %44 = vector.load %arg26[%c0_20, %c0_21] : memref<128x16xf32, #tpu.memory_space<vmem>>, vector<128x16xf32>
      %45 = arith.addf %44, %27 : vector<128x16xf32>
      %c0_22 = arith.constant 0 : index
      %c0_23 = arith.constant 0 : index
      %46 = vector.load %arg26[%c0_22, %c0_23] : memref<128x16xf32, #tpu.memory_space<vmem>>, vector<128x16xf32>
      tpu.vector_store %arg26[%c0_22, %c0_23], %45 {strides = array<i32>} : memref<128x16xf32, #tpu.memory_space<vmem>>, vector<128x16xf32>,
    } else {
    }
    %c0_i32_14 = arith.constant 0 : i32
    %34 = arith.cmpi eq, %arg2, %c0_i32_14 : i32
    %35 = arith.extui %34 : i1 to i32
    %c0_i32_15 = arith.constant 0 : i32
    %36 = arith.cmpi ne, %35, %c0_i32_15 : i32
    scf.if %36 {
      %c0_20 = arith.constant 0 : index
      %c0_21 = arith.constant 0 : index
      %44 = vector.load %arg26[%c0_20, %c0_21] : memref<128x16xf32, #tpu.memory_space<vmem>>, vector<128x16xf32>
      %45 = arith.index_cast %20 : i32 to index
      %c0_22 = arith.constant 0 : index
      %46 = vector.load %arg24[%45, %c0_22] : memref<128x16xf32, #tpu.memory_space<vmem>>, vector<128x16xf32>
      tpu.vector_store %arg24[%45, %c0_22], %44 {strides = array<i32>} : memref<128x16xf32, #tpu.memory_space<vmem>>, vector<128x16xf32>,
    } else {
    }
    %c3_i32_16 = arith.constant 3 : i32
    %37 = arith.cmpi eq, %arg0, %c3_i32_16 : i32
    %c0_i32_17 = arith.constant 0 : i32
    %38 = arith.cmpi eq, %arg1, %c0_i32_17 : i32
    %c0_i32_18 = arith.constant 0 : i32
    %39 = arith.cmpi eq, %arg2, %c0_i32_18 : i32
    %40 = arith.andi %38, %39 : i1
    %41 = arith.andi %37, %40 : i1
    %42 = arith.extui %41 : i1 to i32
    %c0_i32_19 = arith.constant 0 : i32
    %43 = arith.cmpi ne, %42, %c0_i32_19 : i32
    scf.if %43 {
      %c0_20 = arith.constant 0 : index
      %c0_21 = arith.constant 0 : index
      %44 = vector.load %arg3[%c0_20, %c0_21] : memref<1x1xf32, #tpu.memory_space<vmem>>, vector<1x1xf32>
      %c0_22 = arith.constant 0 : index
      %c0_23 = arith.constant 0 : index
      %45 = vector.load %arg21[%c0_22, %c0_23] : memref<128x4xf32, #tpu.memory_space<vmem>>, vector<128x4xf32>
      %c0_24 = arith.constant 0 : index
      %c0_25 = arith.constant 0 : index
      %46 = vector.load %arg24[%c0_24, %c0_25] : memref<128x16xf32, #tpu.memory_space<vmem>>, vector<128x4xf32>
      %c0_26 = arith.constant 0 : index
      %c0_27 = arith.constant 0 : index
      %47 = vector.load %arg5[%c0_26, %c0_27] : memref<1x128xf32, #tpu.memory_space<vmem>>, vector<1x128xf32>
      %cst_28 = arith.constant dense<0.000000e+00> : vector<1x4xf32>
      %48 = tpu.matmul %47, %45, %cst_28 {dimension_numbers = #tpu.dot_dimension_numbers<[1], [0], [0], [1], [0, 0, 1, 1], [], []>} : vector<1x128xf32>, vector<128x4xf32>, vector<1x4xf32> -> vector<1x4xf32>
      %49 = arith.mulf %45, %46 : vector<128x4xf32>
      %cst_29 = arith.constant dense<0.000000e+00> : vector<4xf32>
      %50 = vector.multi_reduction <add>, %49, %cst_29 [0] : vector<128x4xf32> to vector<4xf32>
      %51 = vector.shape_cast %50 : vector<4xf32> to vector<1x4xf32>
      %cst_30 = arith.constant dense<0.000000e+00> : vector<1xf32>
      %52 = vector.multi_reduction <add>, %51, %cst_30 [1] : vector<1x4xf32> to vector<1xf32>
      %53 = vector.shape_cast %52 : vector<1xf32> to vector<1x1xf32>
      %54 = arith.mulf %48, %48 : vector<1x4xf32>
      %cst_31 = arith.constant dense<0.000000e+00> : vector<1xf32>
      %55 = vector.multi_reduction <add>, %54, %cst_31 [1] : vector<1x4xf32> to vector<1xf32>
      %56 = vector.shape_cast %55 : vector<1xf32> to vector<1x1xf32>
      %57 = arith.mulf %56, %44 : vector<1x1xf32>
      %58 = arith.subf %53, %57 : vector<1x1xf32>
      %59 = arith.mulf %58, %44 : vector<1x1xf32>
      %c0_32 = arith.constant 0 : index
      %c0_33 = arith.constant 0 : index
      %60 = vector.load %arg22[%c0_32, %c0_33] : memref<1x1xf32, #tpu.memory_space<vmem>>, vector<1x1xf32>
      tpu.vector_store %arg22[%c0_32, %c0_33], %59 {strides = array<i32>} : memref<1x1xf32, #tpu.memory_space<vmem>>, vector<1x1xf32>,
    } else {
    }
    return
  }
  func.func @transform_0(%arg0: i32, %arg1: i32, %arg2: i32) -> (i32, i32) {
    %c0_i32 = arith.constant 0 : i32
    %c0_i32_0 = arith.constant 0 : i32
    %c0_i32_1 = arith.constant 0 : i32
    return %c0_i32, %c0_i32_0 : i32, i32
  }
  func.func @transform_1(%arg0: i32, %arg1: i32, %arg2: i32) -> (i32, i32) {
    %c0_i32 = arith.constant 0 : i32
    %c0_i32_0 = arith.constant 0 : i32
    %c0_i32_1 = arith.constant 0 : i32
    return %c0_i32, %c0_i32_0 : i32, i32
  }
  func.func @transform_2(%arg0: i32, %arg1: i32, %arg2: i32) -> (i32, i32) {
    %c0_i32 = arith.constant 0 : i32
    %c0_i32_0 = arith.constant 0 : i32
    %c0_i32_1 = arith.constant 0 : i32
    return %c0_i32, %c0_i32_0 : i32, i32
  }
  func.func @transform_3(%arg0: i32, %arg1: i32, %arg2: i32) -> (i32, i32, i32) {
    %c0_i32 = arith.constant 0 : i32
    %c0_i32_0 = arith.constant 0 : i32
    return %c0_i32, %arg1, %arg2 : i32, i32, i32
  }
  func.func @transform_4(%arg0: i32, %arg1: i32, %arg2: i32) -> (i32, i32) {
    %c0_i32 = arith.constant 0 : i32
    %c0_i32_0 = arith.constant 0 : i32
    %c0_i32_1 = arith.constant 0 : i32
    return %c0_i32, %c0_i32_0 : i32, i32
  }
  func.func @transform_5(%arg0: i32, %arg1: i32, %arg2: i32) -> (i32, i32) {
    %c0_i32 = arith.constant 0 : i32
    %c0_i32_0 = arith.constant 0 : i32
    %c0_i32_1 = arith.constant 0 : i32
    return %c0_i32, %c0_i32_0 : i32, i32
  }
  func.func @transform_6(%arg0: i32, %arg1: i32, %arg2: i32) -> (i32, i32) {
    %c0_i32 = arith.constant 0 : i32
    %c0_i32_0 = arith.constant 0 : i32
    %c0_i32_1 = arith.constant 0 : i32
    return %c0_i32, %c0_i32_0 : i32, i32
  }
  func.func @transform_7(%arg0: i32, %arg1: i32, %arg2: i32) -> (i32, i32) {
    %c0_i32 = arith.constant 0 : i32
    %c0_i32_0 = arith.constant 0 : i32
    %c0_i32_1 = arith.constant 0 : i32
    return %c0_i32, %c0_i32_0 : i32, i32
  }
  func.func @transform_8(%arg0: i32, %arg1: i32, %arg2: i32) -> (i32, i32) {
    %c0_i32 = arith.constant 0 : i32
    %c0_i32_0 = arith.constant 0 : i32
    %c0_i32_1 = arith.constant 0 : i32
    return %c0_i32, %c0_i32_0 : i32, i32
  }
  func.func @transform_9(%arg0: i32, %arg1: i32, %arg2: i32) -> (i32, i32) {
    %c0_i32 = arith.constant 0 : i32
    %c0_i32_0 = arith.constant 0 : i32
    %c0_i32_1 = arith.constant 0 : i32
    return %c0_i32, %c0_i32_0 : i32, i32
  }
  func.func @transform_10(%arg0: i32, %arg1: i32, %arg2: i32) -> (i32, i32) {
    %c0_i32 = arith.constant 0 : i32
    %c0_i32_0 = arith.constant 0 : i32
    %c0_i32_1 = arith.constant 0 : i32
    return %c0_i32, %c0_i32_0 : i32, i32
  }
  func.func @transform_11(%arg0: i32, %arg1: i32, %arg2: i32) -> (i32, i32) {
    %c0_i32 = arith.constant 0 : i32
    %c0_i32_0 = arith.constant 0 : i32
    %c0_i32_1 = arith.constant 0 : i32
    return %c0_i32, %c0_i32_0 : i32, i32
  }
  func.func @transform_12(%arg0: i32, %arg1: i32, %arg2: i32) -> (i32, i32) {
    %c0_i32 = arith.constant 0 : i32
    %c0_i32_0 = arith.constant 0 : i32
    %c0_i32_1 = arith.constant 0 : i32
    return %c0_i32, %c0_i32_0 : i32, i32
  }
  func.func @transform_13(%arg0: i32, %arg1: i32, %arg2: i32) -> (i32, i32) {
    %c0_i32 = arith.constant 0 : i32
    %c0_i32_0 = arith.constant 0 : i32
    %c0_i32_1 = arith.constant 0 : i32
    return %c0_i32, %c0_i32_0 : i32, i32
  }
  func.func @transform_14(%arg0: i32, %arg1: i32, %arg2: i32) -> (i32, i32) {
    %c0_i32 = arith.constant 0 : i32
    %c0_i32_0 = arith.constant 0 : i32
    %c0_i32_1 = arith.constant 0 : i32
    return %c0_i32, %c0_i32_0 : i32, i32
  }
  func.func @transform_15(%arg0: i32, %arg1: i32, %arg2: i32) -> (i32, i32) {
    %c0_i32 = arith.constant 0 : i32
    %c0_i32_0 = arith.constant 0 : i32
    %c0_i32_1 = arith.constant 0 : i32
    return %c0_i32, %c0_i32_0 : i32, i32
  }
  func.func @transform_16(%arg0: i32, %arg1: i32, %arg2: i32) -> (i32, i32) {
    %c0_i32 = arith.constant 0 : i32
    %c0_i32_0 = arith.constant 0 : i32
    %c0_i32_1 = arith.constant 0 : i32
    return %c0_i32, %c0_i32_0 : i32, i32
  }
  func.func @transform_17(%arg0: i32, %arg1: i32, %arg2: i32) -> (i32, i32) {
    %c0_i32 = arith.constant 0 : i32
    %c0_i32_0 = arith.constant 0 : i32
    %c0_i32_1 = arith.constant 0 : i32
    return %c0_i32, %c0_i32_0 : i32, i32
  }
  func.func @transform_18(%arg0: i32, %arg1: i32, %arg2: i32) -> (i32, i32) {
    %c0_i32 = arith.constant 0 : i32
    %c0_i32_0 = arith.constant 0 : i32
    %c0_i32_1 = arith.constant 0 : i32
    return %c0_i32, %c0_i32_0 : i32, i32
  }
  func.func @transform_19(%arg0: i32, %arg1: i32, %arg2: i32) -> (i32, i32) {
    %c0_i32 = arith.constant 0 : i32
    %c0_i32_0 = arith.constant 0 : i32
    %c0_i32_1 = arith.constant 0 : i32
    return %c0_i32, %c0_i32_0 : i32, i32
  }
}

</mosaic_0001>

<bundles_post_ra>
// kernel: cd_gcn_net_forward.1
= control target key start
LH: loop header
LB: loop body
LE: loop exit
PB: predicated region body
PF: predicated region fallthrough
CT: control target
= control target key end

     0   :  { %s5801_s0 = inlined_call_operand.<no memory space> [shape: f32[1,1], index: 0, kind: input, shape index: {}]   ;;  %s5802_s1 = inlined_call_operand.vmem [shape: f32[128,16], index: 1, kind: input, shape index: {}]   ;;  %s5803_s2 = inlined_call_operand.vmem [shape: f32[1,128], index: 2, kind: input, shape index: {}]   ;;  %s5804_s3 = inlined_call_operand.vmem [shape: bf16[1,128,128], index: 3, kind: input, shape index: {}]   ;;  %s5805_s4 = inlined_call_operand.vmem [shape: f32[16,10], index: 4, kind: input, shape index: {}]   ;;  %s5806_s5 = inlined_call_operand.vmem [shape: f32[1,10], index: 5, kind: input, shape index: {}]   ;;  %s5807_s6 = inlined_call_operand.vmem [shape: f32[1,10], index: 6, kind: input, shape index: {}]   ;;  %s5808_s7 = inlined_call_operand.vmem [shape: f32[1,10], index: 7, kind: input, shape index: {}]   ;;  %s5809_s8 = inlined_call_operand.vmem [shape: f32[16,10], index: 8, kind: input, shape index: {}]   ;;  %s5810_s9 = inlined_call_operand.vmem [shape: f32[1,10], index: 9, kind: input, shape index: {}]   ;;  %s5811_s10 = inlined_call_operand.vmem [shape: f32[1,10], index: 10, kind: input, shape index: {}]   ;;  %s5812_s11 = inlined_call_operand.vmem [shape: f32[1,10], index: 11, kind: input, shape index: {}]   ;;  %s5813_s12 = inlined_call_operand.vmem [shape: f32[16,10], index: 12, kind: input, shape index: {}]   ;;  %s5814_s13 = inlined_call_operand.vmem [shape: f32[1,10], index: 13, kind: input, shape index: {}]   ;;  %s5815_s14 = inlined_call_operand.vmem [shape: f32[1,10], index: 14, kind: input, shape index: {}]   ;;  %s5816_s15 = inlined_call_operand.vmem [shape: f32[1,10], index: 15, kind: input, shape index: {}]   ;;  %s5817_s16 = inlined_call_operand.vmem [shape: f32[30,4], index: 16, kind: input, shape index: {}]   ;;  %s5818_s17 = inlined_call_operand.vmem [shape: f32[1,4], index: 17, kind: input, shape index: {}]   ;;  %s5819_s18 = inlined_call_operand.vmem [shape: f32[128,4], index: 18, kind: output, shape index: {0}]   ;;  %s5820_s19 = inlined_call_operand.hbm [shape: f32[1,1], index: 19, kind: output, shape index: {1}]  }
   0x1   :  { %5824 = sst [smem:[#allocation10_spill]] %s5801_s0 }
   0x2   :  { %5825 = sst [smem:[#allocation11_spill]] %s5802_s1  ;;  %s5828_s20 = sld [smem:[#allocation10_spill]] }
   0x3   :  { %5826 = sst [smem:[#allocation12_spill]] %s5803_s2 }
   0x4   :  { %5827 = sst [smem:[#allocation13_spill]] %s5804_s3 }
   0x8   :  { %v25_v0 = vstv %s5828_s20 }
   0x9   :  { %26 = vst [vmem:[#allocation6] sm:$0x1] %v25_v0 }
   0xa   :  { %27 = vsyncpa [#allocation8], 0  ;;  %s4346_s21 = smov 0   ;;  %s4348_s1 = smov 0  }
   0xb   :  { %s4350_s22 = smov 0  }
   0xc LB: > { %s52_s23 = sadd.s32 1, %s4229_s1  ;;  %p3613_p1 = scmp.ge.s32.totalorder %s4233_s22, 1  ;;  %s4233_s22 = sphi %s4350_s22, %s33_s22   ;;  %s4229_s1 = sphi %s4348_s1, %s5836_s1   ;;  %s4225_s21 = sphi %s4346_s21, %s5835_s21  }
   0xd   : > { %p54_p0 = scmp.ge.s32.totalorder %s52_s23, 4  ;;  %p558_p2 = scmp.lt.s32.totalorder %s4233_s22, 5 }
   0xf   : > { %s5838_s23 = smov (%p54_p0, %s52_s23), 0  ;;  %p559_p3 = pnand %p3613_p1, %p558_p2 }
  0x10   : > { %p626_p4 = scmp.eq.s32.totalorder (!%p559_p3), %s4225_s21, 0 }
  0x11   : > { %562 = sbr.rel (%p559_p3) target bundleno = 2714 (0xa9a), region = 92 }
  0x18   : > { %630 = sbr.rel (!%p626_p4) target bundleno = 39 (0x27), region = 96  ;;  %s5829_s3 = sld [smem:[#allocation11_spill]] (%p626_p4)  ;;  %vm655_vm0 = vcmask (%p626_p4), 130048  }
  0x1e   : > { %v631_v1 = vld [vmem:[%s5829_s3] sm:$0xff] (%p626_p4)  ;;  %v632_v2 = vld [vmem:[%s5829_s3 + $0x8] sm:$0xff] (%p626_p4)  ;;  %v633_v3 = vld [vmem:[%s5829_s3 + $0x10] sm:$0xff] (%p626_p4) }
  0x1f   : > { %v647_v4 = vpack.c.bf16 %v632_v2, %v631_v1  ;;  %v634_v5 = vld [vmem:[%s5829_s3 + $0x18] sm:$0xff]  ;;  %v635_v6 = vld [vmem:[%s5829_s3 + $0x20] sm:$0xff]  ;;  %v636_v7 = vld [vmem:[%s5829_s3 + $0x28] sm:$0xff] }
  0x20   : > { %v648_v8 = vpack.c.bf16 %v634_v5, %v633_v3  ;;  %v649_v9 = vpack.c.bf16 %v636_v7, %v635_v6  ;;  %v637_v10 = vld [vmem:[%s5829_s3 + $0x30] sm:$0xff]  ;;  %v638_v11 = vld [vmem:[%s5829_s3 + $0x38] sm:$0xff]  ;;  %v639_v12 = vld [vmem:[%s5829_s3 + $0x40] sm:$0xff] }
  0x21   : > { %656 = vst.msk [vmem:[#allocation2] sm:$0xff] %vm655_vm0, %v647_v4  ;;  %v650_v13 = vpack.c.bf16 %v638_v11, %v637_v10  ;;  %v640_v14 = vld [vmem:[%s5829_s3 + $0x48] sm:$0xff]  ;;  %v641_v15 = vld [vmem:[%s5829_s3 + $0x50] sm:$0xff]  ;;  %v642_v16 = vld [vmem:[%s5829_s3 + $0x58] sm:$0xff] }
  0x22   : > { %657 = vst.msk [vmem:[#allocation2 + $0x8] sm:$0xff] %vm655_vm0, %v648_v8  ;;  %658 = vst.msk [vmem:[#allocation2 + $0x10] sm:$0xff] %vm655_vm0, %v649_v9  ;;  %v651_v17 = vpack.c.bf16 %v640_v14, %v639_v12  ;;  %v652_v18 = vpack.c.bf16 %v642_v16, %v641_v15  ;;  %v643_v19 = vld [vmem:[%s5829_s3 + $0x60] sm:$0xff]  ;;  %v644_v20 = vld [vmem:[%s5829_s3 + $0x68] sm:$0xff] }
  0x23   : > { %v645_v21 = vld [vmem:[%s5829_s3 + $0x70] sm:$0xff]  ;;  %659 = vst.msk [vmem:[#allocation2 + $0x18] sm:$0xff] %vm655_vm0, %v650_v13  ;;  %v653_v22 = vpack.c.bf16 %v644_v20, %v643_v19  ;;  %v646_v23 = vld [vmem:[%s5829_s3 + $0x78] sm:$0xff] }
  0x24   : > { %660 = vst.msk [vmem:[#allocation2 + $0x20] sm:$0xff] %vm655_vm0, %v651_v17  ;;  %661 = vst.msk [vmem:[#allocation2 + $0x28] sm:$0xff] %vm655_vm0, %v652_v18  ;;  %v654_v24 = vpack.c.bf16 %v646_v23, %v645_v21 }
  0x25   : > { %662 = vst.msk [vmem:[#allocation2 + $0x30] sm:$0xff] %vm655_vm0, %v653_v22 }
  0x26   : > { %663 = vst.msk [vmem:[#allocation2 + $0x38] sm:$0xff] %vm655_vm0, %v654_v24 }
  0x27 PF: > { %p664_p5 = scmp.eq.s32.totalorder %s4225_s21, 1 }
  0x28   : > { %v685_v25 = vld [vmem:[%s5805_s4] sm:$0xff] (%p664_p5)  ;;  %v686_v26 = vld [vmem:[%s5805_s4 + $0x8] sm:$0xff] (%p664_p5)  ;;  %s5830_s30 = sld [smem:[#allocation11_spill]] (%p664_p5)  ;;  %vm793_vm1 = vcmask (%p664_p5), 130048   ;;  %v757_v34 = vld [vmem:[#allocation3 + $0x10] sm:$0xff] (%p664_p5)  ;;  %vm1003_vm2 = vcmask (%p664_p5), 80896  }
  0x29   : > { %668 = sbr.rel (!%p664_p5) target bundleno = 403 (0x193), region = 100  ;;  %v3999_v28 = vpack.c.bf16 (%p664_p5), %v686_v26, %v685_v25  ;;  %v755_v29 = vld [vmem:[#allocation3] sm:$0xff] (%p664_p5)  ;;  %v756_v31 = vld [vmem:[#allocation3 + $0x8] sm:$0xff] (%p664_p5)  ;;  %v758_v38 = vld [vmem:[#allocation3 + $0x18] sm:$0xff] (%p664_p5) }
  0x2a   : > { %v759_v40 = vld [vmem:[#allocation3 + $0x20] sm:$0xff] (%p664_p5)  ;;  %v760_v42 = vld [vmem:[#allocation3 + $0x28] sm:$0xff] (%p664_p5)  ;;  %v765_v50 = vld [vmem:[#allocation3 + $0x50] sm:$0xff] (%p664_p5) }
  0x2b   : > { %4000 = vmatprep.subr.bf16.mxu0 (%p664_p5), %v3999_v28  ;;  %4045 = vmatprep.subr.bf16.mxu1 (%p664_p5), %v3999_v28  ;;  %v763_v44 = vld [vmem:[#allocation3 + $0x40] sm:$0xff] (%p664_p5)  ;;  %v764_v48 = vld [vmem:[#allocation3 + $0x48] sm:$0xff] (%p664_p5)  ;;  %v766_v55 = vld [vmem:[#allocation3 + $0x58] sm:$0xff] (%p664_p5) }
  0x2c   : > { %4002 = vmatpush3.bf16.msra.mxu0 (%p664_p5), %v3999_v28  ;;  %4046 = vmatpush3.bf16.msra.mxu1 (%p664_p5), %v3999_v28  ;;  %v761_v58 = vld [vmem:[#allocation3 + $0x30] sm:$0xff] (%p664_p5)  ;;  %v767_v59 = vld [vmem:[#allocation3 + $0x60] sm:$0xff] (%p664_p5)  ;;  %v768_v1 = vld [vmem:[#allocation3 + $0x68] sm:$0xff] (%p664_p5) }
  0x2d   : > { %v762_v3 = vld [vmem:[#allocation3 + $0x38] sm:$0xff] (%p664_p5)  ;;  %v769_v5 = vld [vmem:[#allocation3 + $0x70] sm:$0xff] (%p664_p5)  ;;  %v4498_v12 = vld [vmem:[%s5806_s5] ss:$0 sm:$0xff] (%p664_p5) }
  0x2e   : > { %v669_v27 = vld [vmem:[%s5830_s30] sm:$0xff] (%p664_p5)  ;;  %v670_v30 = vld [vmem:[%s5830_s30 + $0x8] sm:$0xff] (%p664_p5)  ;;  %v671_v33 = vld [vmem:[%s5830_s30 + $0x10] sm:$0xff] (%p664_p5) }
  0x2f   : > { %v771_v32 = vadd.f32 (%p664_p5), %v755_v29, %v669_v27  ;;  %v772_v35 = vadd.f32 (%p664_p5), %v756_v31, %v670_v30  ;;  %v773_v36 = vadd.f32 (%p664_p5), %v757_v34, %v671_v33  ;;  %v672_v37 = vld [vmem:[%s5830_s30 + $0x18] sm:$0xff] (%p664_p5)  ;;  %v673_v39 = vld [vmem:[%s5830_s30 + $0x20] sm:$0xff] (%p664_p5)  ;;  %v674_v41 = vld [vmem:[%s5830_s30 + $0x28] sm:$0xff] (%p664_p5) }
  0x30   : > { %v677_v43 = vld [vmem:[%s5830_s30 + $0x40] sm:$0xff]  ;;  %v678_v45 = vld [vmem:[%s5830_s30 + $0x48] sm:$0xff]  ;;  %v774_v46 = vadd.f32 %v758_v38, %v672_v37  ;;  %v679_v49 = vld [vmem:[%s5830_s30 + $0x50] sm:$0xff]  ;;  %v775_v51 = vadd.f32 %v759_v40, %v673_v39  ;;  %v776_v61 = vadd.f32 %v760_v42, %v674_v41 }
  0x31   : > { %3820 = vmatprep.mubr.msk.f32.mxu0 %vm793_vm1, %v771_v32  ;;  %v779_v47 = vadd.f32 %v763_v44, %v677_v43  ;;  %v780_v52 = vadd.f32 %v764_v48, %v678_v45  ;;  %v781_v53 = vadd.f32 %v765_v50, %v679_v49  ;;  %v680_v54 = vld [vmem:[%s5830_s30 + $0x58] sm:$0xff]  ;;  %v681_v56 = vld [vmem:[%s5830_s30 + $0x60] sm:$0xff]  ;;  %v675_v57 = vld [vmem:[%s5830_s30 + $0x30] sm:$0xff] }
  0x32   : > { %3821 = vmatmul.mubr.msk.f32.vlgmr.msra.gmra.mrb[0].mxu0 %vm793_vm1, %v772_v35  ;;  %v782_v60 = vadd.f32 %v766_v55, %v680_v54  ;;  %v676_v62 = vld [vmem:[%s5830_s30 + $0x38] sm:$0xff]  ;;  %v783_v63 = vadd.f32 %v767_v59, %v681_v56  ;;  %v682_v0 = vld [vmem:[%s5830_s30 + $0x68] sm:$0xff]  ;;  %v777_v2 = vadd.f32 %v761_v58, %v675_v57  ;;  %v683_v4 = vld [vmem:[%s5830_s30 + $0x70] sm:$0xff] }
  0x33   : > { %3823 = vmatprep.mubr.msk.f32.mxu0 %vm793_vm1, %v773_v36  ;;  %3832 = vmatprep.mubr.msk.f32.mxu1 %vm793_vm1, %v779_v47  ;;  %v784_v6 = vadd.f32 %v768_v1, %v682_v0  ;;  %v778_v7 = vadd.f32 %v762_v3, %v676_v62  ;;  %v785_v8 = vadd.f32 %v769_v5, %v683_v4  ;;  %v684_v9 = vld [vmem:[%s5830_s30 + $0x78] sm:$0xff] }
  0x34   : > { %3833 = vmatmul.mubr.msk.f32.vlgmr.msra.gmra.mrb[0].mxu1 %vm793_vm1, %v780_v52  ;;  %v770_v10 = vld [vmem:[#allocation3 + $0x78] sm:$0xff] }
  0x35   : > { %3835 = vmatprep.mubr.msk.f32.mxu1 %vm793_vm1, %v781_v53  ;;  %v786_v11 = vadd.f32 %v770_v10, %v684_v9 }
  0x36   : > { %3824 = vmatmul.mubr.msk.f32.gmra.mrb[2].mxu0 %vm793_vm1, %v774_v46 }
  0x37   : > { %3826 = vmatprep.mubr.msk.f32.mxu0 %vm793_vm1, %v775_v51 }
  0x38   : > { %3836 = vmatmul.mubr.msk.f32.gmra.mrb[2].mxu1 %vm793_vm1, %v782_v60 }
  0x39   : > { %3838 = vmatprep.mubr.msk.f32.mxu1 %vm793_vm1, %v783_v63 }
  0x3a   : > { %3827 = vmatmul.mubr.msk.f32.gmra.mrb[4].mxu0 %vm793_vm1, %v776_v61 }
  0x3b   : > { %3829 = vmatprep.mubr.msk.f32.mxu0 %vm793_vm1, %v777_v2 }
  0x3c   : > { %3839 = vmatmul.mubr.msk.f32.gmra.mrb[4].mxu1 %vm793_vm1, %v784_v6 }
  0x3d   : > { %3841 = vmatprep.mubr.msk.f32.mxu1 %vm793_vm1, %v785_v8 }
  0x3e   : > { %3830 = vmatmul.mubr.msk.f32.gmra.mrb[6].mxu0 %vm793_vm1, %v778_v7 }
  0x40   : > { %3842 = vmatmul.mubr.msk.f32.gmra.mrb[6].mxu1 %vm793_vm1, %v786_v11 }
 0x105   : > { %v3822_v13 = vpop.f32.mrb[0].mxu0 }
 0x106   : > { %v4501_v14 = vadd.f32 %v3822_v13, %v4498_v12  ;;  %v908_v15 = vpop.f32.mrb[1].mxu0 }
 0x107   : > { %v4504_v16 = vadd.f32 %v4498_v12, %v908_v15  ;;  %v3834_v18 = vpop.f32.mrb[0].mxu1 }
 0x108   : > { %v1005_v17 = vsel %vm1003_vm2, %v4501_v14, 0.0  ;;  %v948_v21 = vpop.f32.mrb[1].mxu1  ;;  %v954_v49 = vadd.f32 %v3834_v18, %v4498_v12 }
 0x109   : > { %v1004_v19 = vsel %vm1003_vm2, %v4504_v16, 0.0  ;;  %v3825_v20 = vpop.f32.mrb[2].mxu0  ;;  %v4526_v36 = vadd.f32 %v4498_v12, %v948_v21 }
 0x10a   : > { %v1006_v22 = vadd.f32 %v1005_v17, %v1004_v19  ;;  %v4511_v23 = vadd.f32 %v3825_v20, %v4498_v12  ;;  %v918_v24 = vpop.f32.mrb[3].mxu0  ;;  %v996_v60 = vmul.f32 0.0, %v954_v49 }
 0x10b   : > { %v4514_v25 = vadd.f32 %v4498_v12, %v918_v24  ;;  %v3837_v26 = vpop.f32.mrb[2].mxu1  ;;  %v995_v50 = vmul.f32 0.0, %v4526_v36 }
 0x10c   : > { %v990_v27 = vmul.f32 0.0, %v4511_v23  ;;  %v958_v30 = vpop.f32.mrb[3].mxu1  ;;  %v964_v61 = vadd.f32 %v3837_v26, %v4498_v12  ;;  %v1021_v3 = vsel %vm1003_vm2, %v996_v60, 0.0 }
 0x10d   : > { %v989_v28 = vmul.f32 0.0, %v4514_v25  ;;  %v3828_v29 = vpop.f32.mrb[4].mxu0  ;;  %v959_v55 = vadd.f32 %v4498_v12, %v958_v30  ;;  %v1019_v63 = vsel %vm1003_vm2, %v995_v50, 0.0 }
 0x10e   : > { %v4519_v31 = vadd.f32 %v3828_v29, %v4498_v12  ;;  %v928_v32 = vpop.f32.mrb[5].mxu0  ;;  %v1009_v38 = vsel %vm1003_vm2, %v990_v27, 0.0  ;;  %v998_v5 = vmul.f32 0.0, %v964_v61 }
 0x10f   : > { %v1007_v33 = vsel %vm1003_vm2, %v989_v28, 0.0  ;;  %v4523_v34 = vadd.f32 %v4498_v12, %v928_v32  ;;  %v3840_v37 = vpop.f32.mrb[4].mxu1  ;;  %v997_v0 = vmul.f32 0.0, %v959_v55 }
 0x110   : > { %v1008_v35 = vadd.f32 %v1007_v33, %v1006_v22  ;;  %v992_v39 = vmul.f32 0.0, %v4519_v31  ;;  %v968_v42 = vpop.f32.mrb[5].mxu1  ;;  %v974_v7 = vadd.f32 %v3840_v37, %v4498_v12  ;;  %v1025_v11 = vsel %vm1003_vm2, %v998_v5, 0.0 }
 0x111   : > { %v991_v40 = vmul.f32 0.0, %v4523_v34  ;;  %v3831_v41 = vpop.f32.mrb[6].mxu0  ;;  %v969_v1 = vadd.f32 %v4498_v12, %v968_v42  ;;  %v1023_v6 = vsel %vm1003_vm2, %v997_v0, 0.0 }
 0x112   : > { %v1010_v43 = vadd.f32 %v1009_v38, %v1008_v35  ;;  %v944_v44 = vadd.f32 %v3831_v41, %v4498_v12  ;;  %v938_v45 = vpop.f32.mrb[7].mxu0  ;;  %v1013_v52 = vsel %vm1003_vm2, %v992_v39, 0.0  ;;  %v1000_v15 = vmul.f32 0.0, %v974_v7 }
 0x113   : > { %v1011_v46 = vsel %vm1003_vm2, %v991_v40, 0.0  ;;  %v939_v47 = vadd.f32 %v4498_v12, %v938_v45  ;;  %v3843_v51 = vpop.f32.mrb[6].mxu1  ;;  %v999_v8 = vmul.f32 0.0, %v969_v1 }
 0x114   : > { %v1012_v48 = vadd.f32 %v1011_v46, %v1010_v43  ;;  %v994_v53 = vmul.f32 0.0, %v944_v44  ;;  %v978_v56 = vpop.f32.mrb[7].mxu1  ;;  %v984_v18 = vadd.f32 %v3843_v51, %v4498_v12  ;;  %v1029_v22 = vsel %vm1003_vm2, %v1000_v15, 0.0 }
 0x115   : > { %v993_v54 = vmul.f32 0.0, %v939_v47  ;;  %v979_v9 = vadd.f32 %v4498_v12, %v978_v56  ;;  %v1027_v17 = vsel %vm1003_vm2, %v999_v8, 0.0 }
 0x116   : > { %v1014_v57 = vadd.f32 %v1013_v52, %v1012_v48  ;;  %v1017_v62 = vsel %vm1003_vm2, %v994_v53, 0.0  ;;  %v1002_v24 = vmul.f32 0.0, %v984_v18 }
 0x117   : > { %v1015_v58 = vsel %vm1003_vm2, %v993_v54, 0.0  ;;  %v1001_v19 = vmul.f32 0.0, %v979_v9 }
 0x118   : > { %v1016_v59 = vadd.f32 %v1015_v58, %v1014_v57  ;;  %v1033_v29 = vsel %vm1003_vm2, %v1002_v24, 0.0 }
 0x119   : > { %v1031_v26 = vsel %vm1003_vm2, %v1001_v19, 0.0 }
 0x11a   : > { %v1018_v2 = vadd.f32 %v1017_v62, %v1016_v59 }
 0x11c   : > { %v1020_v4 = vadd.f32 %v1019_v63, %v1018_v2 }
 0x11e   : > { %v1022_v10 = vadd.f32 %v1021_v3, %v1020_v4 }
 0x120   : > { %v1024_v13 = vadd.f32 %v1023_v6, %v1022_v10 }
 0x122   : > { %v1026_v20 = vadd.f32 %v1025_v11, %v1024_v13 }
 0x124   : > { %v1028_v21 = vadd.f32 %v1027_v17, %v1026_v20 }
 0x126   : > { %v1030_v27 = vadd.f32 %v1029_v22, %v1028_v21 }
 0x128   : > { %v1032_v28 = vadd.f32 %v1031_v26, %v1030_v27 }
 0x12a   : > { %v1034_v30 = vadd.f32 %v1033_v29, %v1032_v28 }
 0x12c   : > { %v1035_v32 = vrot.slane %v1034_v30, 4 }
 0x12e   : > { %v1036_v33 = vadd.f32 %v1035_v32, %v1034_v30 }
 0x130   : > { %v1037_v35 = vrot.slane %v1036_v33, 2 }
 0x132   : > { %v1038_v37 = vadd.f32 %v1037_v35, %v1036_v33 }
 0x134   : > { %v1039_v38 = vrot.slane %v1038_v37, 1 }
 0x136   : > { %v1040_v39 = vadd.f32 %v1039_v38, %v1038_v37 }
 0x138   : > { %v1041_v12 = vmul.f32 0.0625, %v1040_v39 }
 0x13a   : > { %v4554_v40 = vsub.f32 %v4504_v16, %v1041_v12  ;;  %v4557_v41 = vsub.f32 %v4501_v14, %v1041_v12  ;;  %v4560_v42 = vsub.f32 %v4514_v25, %v1041_v12  ;;  %v4563_v43 = vsub.f32 %v4511_v23, %v1041_v12 }
 0x13b   : > { %v4566_v45 = vsub.f32 %v4523_v34, %v1041_v12  ;;  %v4569_v46 = vsub.f32 %v4519_v31, %v1041_v12  ;;  %v4571_v48 = vsub.f32 %v939_v47, %v1041_v12  ;;  %v4573_v50 = vsub.f32 %v944_v44, %v1041_v12 }
 0x13c   : > { %v4576_v16 = vsub.f32 %v4526_v36, %v1041_v12  ;;  %v4578_v14 = vsub.f32 %v954_v49, %v1041_v12  ;;  %v4580_v25 = vsub.f32 %v959_v55, %v1041_v12  ;;  %v4582_v51 = vsub.f32 %v964_v61, %v1041_v12 }
 0x13d   : > { %v4584_v23 = vsub.f32 %v969_v1, %v1041_v12  ;;  %v4586_v34 = vsub.f32 %v974_v7, %v1041_v12  ;;  %v4588_v52 = vsub.f32 %v979_v9, %v1041_v12  ;;  %v4590_v31 = vsub.f32 %v984_v18, %v1041_v12 }
 0x13e   : > { %v1060_v44 = vmul.f32 0.0, %v4560_v42  ;;  %v1061_v47 = vmul.f32 0.0, %v4563_v43  ;;  %v1074_v36 = vmul.f32 %v4554_v40, %v4554_v40  ;;  %v1075_v49 = vmul.f32 %v4557_v41, %v4557_v41 }
 0x13f   : > { %v1062_v54 = vmul.f32 0.0, %v4566_v45  ;;  %v1063_v55 = vmul.f32 0.0, %v4569_v46  ;;  %v1064_v61 = vmul.f32 0.0, %v4571_v48  ;;  %v1065_v0 = vmul.f32 0.0, %v4573_v50 }
 0x140   : > { %v1076_v53 = vmul.f32 %v1060_v44, %v1060_v44  ;;  %v1077_v56 = vmul.f32 %v1061_v47, %v1061_v47  ;;  %v1090_v57 = vsel %vm1003_vm2, %v1074_v36, 0.0  ;;  %v1091_v58 = vsel %vm1003_vm2, %v1075_v49, 0.0 }
 0x141   : > { %v1092_v59 = vadd.f32 %v1091_v58, %v1090_v57  ;;  %v1078_v62 = vmul.f32 %v1062_v54, %v1062_v54  ;;  %v1079_v1 = vmul.f32 %v1063_v55, %v1063_v55  ;;  %v1066_v4 = vmul.f32 0.0, %v4576_v16 }
 0x142   : > { %v1093_v60 = vsel %vm1003_vm2, %v1076_v53, 0.0  ;;  %v1095_v2 = vsel %vm1003_vm2, %v1077_v56, 0.0  ;;  %v1080_v5 = vmul.f32 %v1064_v61, %v1064_v61  ;;  %v1067_v8 = vmul.f32 0.0, %v4578_v14 }
 0x143   : > { %v1094_v63 = vadd.f32 %v1093_v60, %v1092_v59  ;;  %v1097_v6 = vsel %vm1003_vm2, %v1078_v62, 0.0  ;;  %v1081_v9 = vmul.f32 %v1065_v0, %v1065_v0  ;;  %v1099_v10 = vsel %vm1003_vm2, %v1079_v1, 0.0 }
 0x144   : > { %v1068_v13 = vmul.f32 0.0, %v4580_v25  ;;  %v1082_v15 = vmul.f32 %v1066_v4, %v1066_v4  ;;  %v1101_v17 = vsel %vm1003_vm2, %v1080_v5, 0.0  ;;  %v1069_v19 = vmul.f32 0.0, %v4582_v51 }
 0x145   : > { %v1096_v3 = vadd.f32 %v1095_v2, %v1094_v63  ;;  %v1083_v20 = vmul.f32 %v1067_v8, %v1067_v8  ;;  %v1103_v21 = vsel %vm1003_vm2, %v1081_v9, 0.0  ;;  %v1070_v24 = vmul.f32 0.0, %v4584_v23 }
 0x146   : > { %v1084_v26 = vmul.f32 %v1068_v13, %v1068_v13  ;;  %v1105_v27 = vsel %vm1003_vm2, %v1082_v15, 0.0  ;;  %v1071_v29 = vmul.f32 0.0, %v4586_v34  ;;  %v1085_v30 = vmul.f32 %v1069_v19, %v1069_v19 }
 0x147   : > { %v1098_v7 = vadd.f32 %v1097_v6, %v1096_v3  ;;  %v1107_v32 = vsel %vm1003_vm2, %v1083_v20, 0.0  ;;  %v1072_v35 = vmul.f32 0.0, %v4588_v52  ;;  %v1086_v37 = vmul.f32 %v1070_v24, %v1070_v24 }
 0x148   : > { %v1109_v38 = vsel %vm1003_vm2, %v1084_v26, 0.0  ;;  %v1073_v12 = vmul.f32 0.0, %v4590_v31  ;;  %v1087_v44 = vmul.f32 %v1071_v29, %v1071_v29  ;;  %v1111_v47 = vsel %vm1003_vm2, %v1085_v30, 0.0 }
 0x149   : > { %v1100_v11 = vadd.f32 %v1099_v10, %v1098_v7  ;;  %v1088_v49 = vmul.f32 %v1072_v35, %v1072_v35  ;;  %v1113_v53 = vsel %vm1003_vm2, %v1086_v37, 0.0 }
 0x14a   : > { %v1089_v55 = vmul.f32 %v1073_v12, %v1073_v12  ;;  %v1115_v56 = vsel %vm1003_vm2, %v1087_v44, 0.0 }
 0x14b   : > { %v1102_v18 = vadd.f32 %v1101_v17, %v1100_v11  ;;  %v1117_v58 = vsel %vm1003_vm2, %v1088_v49, 0.0  ;;  %v3633_v11 = vld [vmem:[%s5807_s6] ss:$0 sm:$0xff] }
 0x14c   : > { %v1119_v60 = vsel %vm1003_vm2, %v1089_v55, 0.0 }
 0x14d   : > { %v1104_v22 = vadd.f32 %v1103_v21, %v1102_v18 }
 0x14f   : > { %v1106_v28 = vadd.f32 %v1105_v27, %v1104_v22 }
 0x151   : > { %v1108_v33 = vadd.f32 %v1107_v32, %v1106_v28 }
 0x153   : > { %v1110_v39 = vadd.f32 %v1109_v38, %v1108_v33 }
 0x155   : > { %v1112_v36 = vadd.f32 %v1111_v47, %v1110_v39 }
 0x157   : > { %v1114_v54 = vadd.f32 %v1113_v53, %v1112_v36 }
 0x159   : > { %v1116_v57 = vadd.f32 %v1115_v56, %v1114_v54 }
 0x15b   : > { %v1118_v59 = vadd.f32 %v1117_v58, %v1116_v57 }
 0x15d   : > { %v1120_v61 = vadd.f32 %v1119_v60, %v1118_v59 }
 0x15f   : > { %v1121_v62 = vrot.slane %v1120_v61, 4 }
 0x161   : > { %v1122_v63 = vadd.f32 %v1121_v62, %v1120_v61 }
 0x163   : > { %v1123_v0 = vrot.slane %v1122_v63, 2 }
 0x165   : > { %v1124_v1 = vadd.f32 %v1123_v0, %v1122_v63 }
 0x167   : > { %v1125_v2 = vrot.slane %v1124_v1, 1 }
 0x169   : > { %v1126_v3 = vadd.f32 %v1125_v2, %v1124_v1 }
 0x16b   : > { %v1127_v4 = vmul.f32 0.0625, %v1126_v3 }
 0x16d   : > { %v1128_v5 = vadd.f32 1e-05, %v1127_v4 }
 0x16f   : > { %4103 = vrsqrt.f32 %v1128_v5 }
 0x179   : > { %v4104_v6 = vpop.eup %4103 }
 0x17a   : > { %v1130_v7 = vmul.f32 %v4104_v6, %v4554_v40  ;;  %v1131_v8 = vmul.f32 %v4104_v6, %v4557_v41  ;;  %v1132_v9 = vmul.f32 %v4104_v6, %v4560_v42  ;;  %v1133_v10 = vmul.f32 %v4104_v6, %v4563_v43 }
 0x17b   : > { %v1134_v13 = vmul.f32 %v4104_v6, %v4566_v45  ;;  %v1135_v15 = vmul.f32 %v4104_v6, %v4569_v46  ;;  %v1136_v17 = vmul.f32 %v4104_v6, %v4571_v48  ;;  %v1137_v18 = vmul.f32 %v4104_v6, %v4573_v50 }
 0x17c   : > { %v1138_v40 = vmul.f32 %v4104_v6, %v4576_v16  ;;  %v1139_v41 = vmul.f32 %v4104_v6, %v4578_v14  ;;  %v1140_v42 = vmul.f32 %v4104_v6, %v4580_v25  ;;  %v1141_v43 = vmul.f32 %v4104_v6, %v4582_v51  ;;  %v3634_v16 = vld [vmem:[%s5808_s7] ss:$0 sm:$0xff] }
 0x17d   : > { %v1142_v19 = vmul.f32 %v4104_v6, %v4584_v23  ;;  %v1143_v20 = vmul.f32 %v4104_v6, %v4586_v34  ;;  %v1144_v45 = vmul.f32 %v4104_v6, %v4588_v52  ;;  %v1145_v46 = vmul.f32 %v4104_v6, %v4590_v31 }
 0x17e   : > { %v1152_v21 = vmul.f32 %v3633_v11, %v1130_v7  ;;  %v1153_v48 = vmul.f32 %v3633_v11, %v1131_v8  ;;  %v1154_v22 = vmul.f32 %v3633_v11, %v1132_v9  ;;  %v1155_v50 = vmul.f32 %v3633_v11, %v1133_v10 }
 0x17f   : > { %v1156_v14 = vmul.f32 %v3633_v11, %v1134_v13  ;;  %v1157_v25 = vmul.f32 %v3633_v11, %v1135_v15  ;;  %v1158_v24 = vmul.f32 %v3633_v11, %v1136_v17  ;;  %v1159_v51 = vmul.f32 %v3633_v11, %v1137_v18 }
 0x180   : > { %v1160_v26 = vmul.f32 %v3633_v11, %v1138_v40  ;;  %v1161_v23 = vmul.f32 %v3633_v11, %v1139_v41  ;;  %v1162_v27 = vmul.f32 %v3633_v11, %v1140_v42  ;;  %v1163_v34 = vmul.f32 %v3633_v11, %v1141_v43 }
 0x181   : > { %v1164_v28 = vmul.f32 %v3633_v11, %v1142_v19  ;;  %v1165_v52 = vmul.f32 %v3633_v11, %v1143_v20  ;;  %v1166_v29 = vmul.f32 %v3633_v11, %v1144_v45  ;;  %v1167_v31 = vmul.f32 %v3633_v11, %v1145_v46 }
 0x182   : > { %v1174_v30 = vadd.f32 %v3634_v16, %v1152_v21  ;;  %v1175_v32 = vadd.f32 %v3634_v16, %v1153_v48  ;;  %v1176_v33 = vadd.f32 %v3634_v16, %v1154_v22  ;;  %v1177_v35 = vadd.f32 %v3634_v16, %v1155_v50 }
 0x183   : > { %v1178_v37 = vadd.f32 %v3634_v16, %v1156_v14  ;;  %v1179_v38 = vadd.f32 %v3634_v16, %v1157_v25  ;;  %v1180_v39 = vadd.f32 %v3634_v16, %v1158_v24  ;;  %v1181_v12 = vadd.f32 %v3634_v16, %v1159_v51 }
 0x184   : > { %v1182_v44 = vadd.f32 %v3634_v16, %v1160_v26  ;;  %v1183_v47 = vadd.f32 %v3634_v16, %v1161_v23  ;;  %v1184_v36 = vadd.f32 %v3634_v16, %v1162_v27  ;;  %v1185_v49 = vadd.f32 %v3634_v16, %v1163_v34  ;;  %1206 = vst.msk [vmem:[#allocation4] sm:$0xff] %vm1003_vm2, %v1174_v30 }
 0x185   : > { %1207 = vst.msk [vmem:[#allocation4 + $0x8] sm:$0xff] %vm1003_vm2, %v1175_v32  ;;  %v1186_v53 = vadd.f32 %v3634_v16, %v1164_v28  ;;  %v1187_v54 = vadd.f32 %v3634_v16, %v1165_v52  ;;  %v1188_v55 = vadd.f32 %v3634_v16, %v1166_v29  ;;  %v1189_v56 = vadd.f32 %v3634_v16, %v1167_v31 }
 0x186   : > { %v1192_v57 = vmul.f32 0.0, %v1176_v33  ;;  %v1193_v58 = vmul.f32 0.0, %v1177_v35  ;;  %v1194_v59 = vmul.f32 0.0, %v1178_v37  ;;  %v1195_v60 = vmul.f32 0.0, %v1179_v38 }
 0x187   : > { %v1196_v61 = vmul.f32 0.0, %v1180_v39  ;;  %v1197_v62 = vmul.f32 0.0, %v1181_v12  ;;  %v1198_v63 = vmul.f32 0.0, %v1182_v44  ;;  %v1199_v0 = vmul.f32 0.0, %v1183_v47 }
 0x188   : > { %v1200_v1 = vmul.f32 0.0, %v1184_v36  ;;  %v1201_v2 = vmul.f32 0.0, %v1185_v49  ;;  %v1202_v3 = vmul.f32 0.0, %v1186_v53  ;;  %v1203_v4 = vmul.f32 0.0, %v1187_v54  ;;  %1208 = vst.msk [vmem:[#allocation4 + $0x10] sm:$0xff] %vm1003_vm2, %v1192_v57  ;;  %1209 = vst.msk [vmem:[#allocation4 + $0x18] sm:$0xff] %vm1003_vm2, %v1193_v58 }
 0x189   : > { %1210 = vst.msk [vmem:[#allocation4 + $0x20] sm:$0xff] %vm1003_vm2, %v1194_v59  ;;  %1211 = vst.msk [vmem:[#allocation4 + $0x28] sm:$0xff] %vm1003_vm2, %v1195_v60  ;;  %v1204_v5 = vmul.f32 0.0, %v1188_v55  ;;  %v1205_v6 = vmul.f32 0.0, %v1189_v56  ;;  %v1222_v7 = vsel %vm1003_vm2, %v1174_v30, 0.0  ;;  %v1223_v8 = vsel %vm1003_vm2, %v1175_v32, 0.0 }
 0x18a   : > { %1212 = vst.msk [vmem:[#allocation4 + $0x30] sm:$0xff] %vm1003_vm2, %v1196_v61  ;;  %1213 = vst.msk [vmem:[#allocation4 + $0x38] sm:$0xff] %vm1003_vm2, %v1197_v62  ;;  %v1224_v9 = vsel %vm1003_vm2, %v1192_v57, 0.0  ;;  %v1225_v10 = vsel %vm1003_vm2, %v1193_v58, 0.0  ;;  %v1226_v11 = vsel %vm1003_vm2, %v1194_v59, 0.0  ;;  %v1227_v13 = vsel %vm1003_vm2, %v1195_v60, 0.0 }
 0x18b   : > { %1214 = vst.msk [vmem:[#allocation4 + $0x40] sm:$0xff] %vm1003_vm2, %v1198_v63  ;;  %1215 = vst.msk [vmem:[#allocation4 + $0x48] sm:$0xff] %vm1003_vm2, %v1199_v0  ;;  %v1228_v15 = vsel %vm1003_vm2, %v1196_v61, 0.0  ;;  %v1229_v17 = vsel %vm1003_vm2, %v1197_v62, 0.0  ;;  %v1230_v18 = vsel %vm1003_vm2, %v1198_v63, 0.0  ;;  %v1231_v40 = vsel %vm1003_vm2, %v1199_v0, 0.0 }
 0x18c   : > { %1216 = vst.msk [vmem:[#allocation4 + $0x50] sm:$0xff] %vm1003_vm2, %v1200_v1  ;;  %1217 = vst.msk [vmem:[#allocation4 + $0x58] sm:$0xff] %vm1003_vm2, %v1201_v2  ;;  %v1232_v41 = vsel %vm1003_vm2, %v1200_v1, 0.0  ;;  %v1233_v42 = vsel %vm1003_vm2, %v1201_v2, 0.0  ;;  %v1234_v43 = vsel %vm1003_vm2, %v1202_v3, 0.0  ;;  %v1235_v19 = vsel %vm1003_vm2, %v1203_v4, 0.0 }
 0x18d   : > { %1218 = vst.msk [vmem:[#allocation4 + $0x60] sm:$0xff] %vm1003_vm2, %v1202_v3  ;;  %1219 = vst.msk [vmem:[#allocation4 + $0x68] sm:$0xff] %vm1003_vm2, %v1203_v4  ;;  %v1236_v20 = vsel %vm1003_vm2, %v1204_v5, 0.0  ;;  %v1237_v45 = vsel %vm1003_vm2, %v1205_v6, 0.0  ;;  %v1238_v46 = vpack.c.bf16 %v1223_v8, %v1222_v7  ;;  %v1239_v21 = vpack.c.bf16 %v1225_v10, %v1224_v9 }
 0x18e   : > { %1220 = vst.msk [vmem:[#allocation4 + $0x70] sm:$0xff] %vm1003_vm2, %v1204_v5  ;;  %1221 = vst.msk [vmem:[#allocation4 + $0x78] sm:$0xff] %vm1003_vm2, %v1205_v6  ;;  %v1240_v48 = vpack.c.bf16 %v1227_v13, %v1226_v11  ;;  %v1241_v22 = vpack.c.bf16 %v1229_v17, %v1228_v15  ;;  %v1242_v50 = vpack.c.bf16 %v1231_v40, %v1230_v18 }
 0x18f   : > { %v1243_v16 = vpack.c.bf16 %v1233_v42, %v1232_v41  ;;  %v1244_v14 = vpack.c.bf16 %v1235_v19, %v1234_v43  ;;  %v1245_v25 = vpack.c.bf16 %v1237_v45, %v1236_v20  ;;  %1246 = vst.msk [vmem:[#allocation2] sm:$0xff] %vm793_vm1, %v1238_v46  ;;  %1247 = vst.msk [vmem:[#allocation2 + $0x8] sm:$0xff] %vm793_vm1, %v1239_v21 }
 0x190   : > { %1248 = vst.msk [vmem:[#allocation2 + $0x10] sm:$0xff] %vm793_vm1, %v1240_v48  ;;  %1249 = vst.msk [vmem:[#allocation2 + $0x18] sm:$0xff] %vm793_vm1, %v1241_v22 }
 0x191   : > { %1250 = vst.msk [vmem:[#allocation2 + $0x20] sm:$0xff] %vm793_vm1, %v1242_v50  ;;  %1251 = vst.msk [vmem:[#allocation2 + $0x28] sm:$0xff] %vm793_vm1, %v1243_v16 }
 0x192   : > { %1252 = vst.msk [vmem:[#allocation2 + $0x30] sm:$0xff] %vm793_vm1, %v1244_v14  ;;  %1253 = vst.msk [vmem:[#allocation2 + $0x38] sm:$0xff] %vm793_vm1, %v1245_v25 }
 0x193 PF: > { %p1254_p6 = scmp.eq.s32.totalorder %s4225_s21, 2 }
 0x194   : > { %v1292_v24 = vld [vmem:[%s5809_s8] sm:$0xff] (%p1254_p6)  ;;  %v1293_v51 = vld [vmem:[%s5809_s8 + $0x8] sm:$0xff] (%p1254_p6)  ;;  %vm1275_vm3 = vcmask (%p1254_p6), 80896   ;;  %vm1400_vm4 = vcmask (%p1254_p6), 130048   ;;  %v1261_v30 = vld [vmem:[#allocation4 + $0x10] sm:$0xff] (%p1254_p6)  ;;  %s4235_s26 = smov (%p1254_p6), 10  }
 0x195   : > { %1258 = sbr.rel (!%p1254_p6) target bundleno = 891 (0x37b), region = 104  ;;  %v1259_v26 = vld [vmem:[#allocation4] sm:$0xff] (%p1254_p6)  ;;  %v4003_v23 = vpack.c.bf16 (%p1254_p6), %v1293_v51, %v1292_v24  ;;  %v1260_v28 = vld [vmem:[#allocation4 + $0x8] sm:$0xff] (%p1254_p6)  ;;  %v1364_v32 = vld [vmem:[#allocation3 + $0x10] sm:$0xff] (%p1254_p6)  ;;  %v1278_v37 = vsel (%p1254_p6), %vm1275_vm3, %v1261_v30, 0.0  ;;  %vm1876_vm5 = vcmask (%p1254_p6), 162896  }
 0x196   : > { %v1276_v27 = vsel (%p1254_p6), %vm1275_vm3, %v1259_v26, 0.0  ;;  %v1362_v34 = vld [vmem:[#allocation3] sm:$0xff] (%p1254_p6)  ;;  %v1363_v52 = vld [vmem:[#allocation3 + $0x8] sm:$0xff] (%p1254_p6)  ;;  %v1277_v31 = vsel (%p1254_p6), %vm1275_vm3, %v1260_v28, 0.0  ;;  %v1262_v33 = vld [vmem:[#allocation4 + $0x18] sm:$0xff] (%p1254_p6)  ;;  %v1380_v39 = vadd.f32 (%p1254_p6), %v1364_v32, %v1278_v37 }
 0x197   : > { %v1378_v29 = vadd.f32 (%p1254_p6), %v1362_v34, %v1276_v27  ;;  %4004 = vmatprep.subr.bf16.mxu0 (%p1254_p6), %v4003_v23  ;;  %v1379_v35 = vadd.f32 (%p1254_p6), %v1363_v52, %v1277_v31  ;;  %v1263_v38 = vld [vmem:[#allocation4 + $0x20] sm:$0xff] (%p1254_p6)  ;;  %4047 = vmatprep.subr.bf16.mxu1 (%p1254_p6), %v4003_v23  ;;  %v1279_v12 = vsel (%p1254_p6), %vm1275_vm3, %v1262_v33, 0.0  ;;  %v1365_v44 = vld [vmem:[#allocation3 + $0x18] sm:$0xff] (%p1254_p6)  ;;  %v1264_v49 = vld [vmem:[#allocation4 + $0x28] sm:$0xff] (%p1254_p6) }
 0x198   : > { %4006 = vmatpush3.bf16.msra.mxu0 (%p1254_p6), %v4003_v23  ;;  %v1280_v47 = vsel (%p1254_p6), %vm1275_vm3, %v1263_v38, 0.0  ;;  %v1366_v36 = vld [vmem:[#allocation3 + $0x20] sm:$0xff] (%p1254_p6)  ;;  %v1265_v53 = vld [vmem:[#allocation4 + $0x30] sm:$0xff] (%p1254_p6)  ;;  %4048 = vmatpush3.bf16.msra.mxu1 (%p1254_p6), %v4003_v23  ;;  %v1367_v54 = vld [vmem:[#allocation3 + $0x28] sm:$0xff] (%p1254_p6)  ;;  %v1381_v58 = vadd.f32 (%p1254_p6), %v1365_v44, %v1279_v12  ;;  %v1281_v2 = vsel (%p1254_p6), %vm1275_vm3, %v1264_v49, 0.0 }
 0x199   : > { %3848 = vmatprep.mubr.msk.f32.mxu0 (%p1254_p6), %vm1400_vm4, %v1378_v29  ;;  %v1267_v55 = vld [vmem:[#allocation4 + $0x40] sm:$0xff] (%p1254_p6)  ;;  %v1268_v57 = vld [vmem:[#allocation4 + $0x48] sm:$0xff] (%p1254_p6)  ;;  %v1382_v59 = vadd.f32 (%p1254_p6), %v1366_v36, %v1280_v47  ;;  %v1368_v60 = vld [vmem:[#allocation3 + $0x30] sm:$0xff] (%p1254_p6)  ;;  %v1282_v9 = vsel (%p1254_p6), %vm1275_vm3, %v1265_v53, 0.0  ;;  %v1383_v41 = vadd.f32 (%p1254_p6), %v1367_v54, %v1281_v2 }
 0x19a   : > { %v1370_v56 = vld [vmem:[#allocation3 + $0x40] sm:$0xff] (%p1254_p6)  ;;  %v1284_v61 = vsel (%p1254_p6), %vm1275_vm3, %v1267_v55, 0.0  ;;  %v1285_v62 = vsel (%p1254_p6), %vm1275_vm3, %v1268_v57, 0.0  ;;  %v1371_v63 = vld [vmem:[#allocation3 + $0x48] sm:$0xff] (%p1254_p6)  ;;  %v1269_v0 = vld [vmem:[#allocation4 + $0x50] sm:$0xff] (%p1254_p6)  ;;  %v1384_v43 = vadd.f32 (%p1254_p6), %v1368_v60, %v1282_v9 }
 0x19b   : > { %3849 = vmatmul.mubr.msk.f32.vlgmr.msra.gmra.mrb[0].mxu0 (%p1254_p6), %vm1400_vm4, %v1379_v35  ;;  %v1372_v1 = vld [vmem:[#allocation3 + $0x50] sm:$0xff] (%p1254_p6)  ;;  %v1386_v3 = vadd.f32 (%p1254_p6), %v1370_v56, %v1284_v61  ;;  %v1387_v4 = vadd.f32 (%p1254_p6), %v1371_v63, %v1285_v62  ;;  %v1286_v5 = vsel (%p1254_p6), %vm1275_vm3, %v1269_v0, 0.0  ;;  %v1270_v6 = vld [vmem:[#allocation4 + $0x58] sm:$0xff] (%p1254_p6)  ;;  %v1271_v8 = vld [vmem:[#allocation4 + $0x60] sm:$0xff] (%p1254_p6) }
 0x19c   : > { %3851 = vmatprep.mubr.msk.f32.mxu0 %vm1400_vm4, %v1380_v39  ;;  %v1373_v7 = vld [vmem:[#allocation3 + $0x58] sm:$0xff]  ;;  %v1388_v11 = vadd.f32 %v1372_v1, %v1286_v5  ;;  %v1287_v13 = vsel %vm1275_vm3, %v1270_v6, 0.0  ;;  %v1288_v15 = vsel %vm1275_vm3, %v1271_v8, 0.0  ;;  %v1374_v17 = vld [vmem:[#allocation3 + $0x60] sm:$0xff]  ;;  %v1272_v18 = vld [vmem:[#allocation4 + $0x68] sm:$0xff] }
 0x19d   : > { %v1266_v10 = vld [vmem:[#allocation4 + $0x38] sm:$0xff]  ;;  %3860 = vmatprep.mubr.msk.f32.mxu1 %vm1400_vm4, %v1386_v3  ;;  %v1273_v40 = vld [vmem:[#allocation4 + $0x70] sm:$0xff]  ;;  %v1389_v42 = vadd.f32 %v1373_v7, %v1287_v13  ;;  %v1390_v45 = vadd.f32 %v1374_v17, %v1288_v15  ;;  %v1289_v46 = vsel %vm1275_vm3, %v1272_v18, 0.0  ;;  %v1375_v21 = vld [vmem:[#allocation3 + $0x68] sm:$0xff] }
 0x19e   : > { %3861 = vmatmul.mubr.msk.f32.vlgmr.msra.gmra.mrb[0].mxu1 %vm1400_vm4, %v1387_v4  ;;  %v1283_v19 = vsel %vm1275_vm3, %v1266_v10, 0.0  ;;  %v1369_v20 = vld [vmem:[#allocation3 + $0x38] sm:$0xff]  ;;  %v1290_v48 = vsel %vm1275_vm3, %v1273_v40, 0.0  ;;  %v1376_v22 = vld [vmem:[#allocation3 + $0x70] sm:$0xff]  ;;  %v1391_v14 = vadd.f32 %v1375_v21, %v1289_v46  ;;  %v4730_v23 = vld [vmem:[%s5810_s9] ss:$0 sm:$0xff] }
 0x19f   : > { %3852 = vmatmul.mubr.msk.f32.gmra.mrb[2].mxu0 %vm1400_vm4, %v1381_v58  ;;  %3863 = vmatprep.mubr.msk.f32.mxu1 %vm1400_vm4, %v1388_v11  ;;  %v1274_v50 = vld [vmem:[#allocation4 + $0x78] sm:$0xff]  ;;  %v1385_v16 = vadd.f32 %v1369_v20, %v1283_v19  ;;  %v1392_v25 = vadd.f32 %v1376_v22, %v1290_v48 }
 0x1a0   : > { %3854 = vmatprep.mubr.msk.f32.mxu0 %vm1400_vm4, %v1382_v59  ;;  %v1291_v24 = vsel %vm1275_vm3, %v1274_v50, 0.0  ;;  %v1377_v51 = vld [vmem:[#allocation3 + $0x78] sm:$0xff] }
 0x1a1   : > { %v1393_v26 = vadd.f32 %v1377_v51, %v1291_v24 }
 0x1a2   : > { %3864 = vmatmul.mubr.msk.f32.gmra.mrb[2].mxu1 %vm1400_vm4, %v1389_v42 }
 0x1a3   : > { %3855 = vmatmul.mubr.msk.f32.gmra.mrb[4].mxu0 %vm1400_vm4, %v1383_v41  ;;  %3866 = vmatprep.mubr.msk.f32.mxu1 %vm1400_vm4, %v1390_v45 }
 0x1a4   : > { %3857 = vmatprep.mubr.msk.f32.mxu0 %vm1400_vm4, %v1384_v43 }
 0x1a6   : > { %3867 = vmatmul.mubr.msk.f32.gmra.mrb[4].mxu1 %vm1400_vm4, %v1391_v14 }
 0x1a7   : > { %3858 = vmatmul.mubr.msk.f32.gmra.mrb[6].mxu0 %vm1400_vm4, %v1385_v16  ;;  %3869 = vmatprep.mubr.msk.f32.mxu1 %vm1400_vm4, %v1392_v25 }
 0x1aa   : > { %3870 = vmatmul.mubr.msk.f32.gmra.mrb[6].mxu1 %vm1400_vm4, %v1393_v26 }
 0x26e   : > { %v3850_v27 = vpop.f32.mrb[0].mxu0 }
 0x26f   : > { %v4733_v34 = vadd.f32 %v3850_v27, %v4730_v23  ;;  %v1515_v28 = vpop.f32.mrb[1].mxu0 }
 0x270   : > { %v4736_v52 = vadd.f32 %v4730_v23, %v1515_v28 }
 0x271   : > { %v1611_v29 = vsel %vm1275_vm3, %v4733_v34, 0.0  ;;  %v3862_v32 = vpop.f32.mrb[0].mxu1 }
 0x272   : > { %v1610_v31 = vsel %vm1275_vm3, %v4736_v52, 0.0  ;;  %v3853_v30 = vpop.f32.mrb[2].mxu0  ;;  %v1555_v38 = vpop.f32.mrb[1].mxu1  ;;  %v1561_v7 = vadd.f32 %v3862_v32, %v4730_v23 }
 0x273   : > { %v1612_v33 = vadd.f32 %v1611_v29, %v1610_v31  ;;  %v4743_v35 = vadd.f32 %v3853_v30, %v4730_v23  ;;  %v1525_v37 = vpop.f32.mrb[3].mxu0  ;;  %v4758_v58 = vadd.f32 %v4730_v23, %v1555_v38 }
 0x274   : > { %v4746_v39 = vadd.f32 %v4730_v23, %v1525_v37  ;;  %v1603_v42 = vmul.f32 0.0, %v1561_v7 }
 0x275   : > { %v1597_v12 = vmul.f32 0.0, %v4743_v35  ;;  %v3865_v36 = vpop.f32.mrb[2].mxu1  ;;  %v1602_v8 = vmul.f32 0.0, %v4758_v58 }
 0x276   : > { %v1596_v44 = vmul.f32 0.0, %v4746_v39  ;;  %v3856_v47 = vpop.f32.mrb[4].mxu0  ;;  %v1565_v54 = vpop.f32.mrb[3].mxu1  ;;  %v1571_v43 = vadd.f32 %v3865_v36, %v4730_v23  ;;  %v1627_v48 = vsel %vm1275_vm3, %v1603_v42, 0.0 }
 0x277   : > { %v4751_v49 = vadd.f32 %v3856_v47, %v4730_v23  ;;  %v1535_v53 = vpop.f32.mrb[5].mxu0  ;;  %v1615_v59 = vsel %vm1275_vm3, %v1597_v12, 0.0  ;;  %v1566_v13 = vadd.f32 %v4730_v23, %v1565_v54  ;;  %v1625_v20 = vsel %vm1275_vm3, %v1602_v8, 0.0 }
 0x278   : > { %v1613_v55 = vsel %vm1275_vm3, %v1596_v44, 0.0  ;;  %v4755_v56 = vadd.f32 %v4730_v23, %v1535_v53  ;;  %v1605_v50 = vmul.f32 0.0, %v1571_v43 }
 0x279   : > { %v1614_v57 = vadd.f32 %v1613_v55, %v1612_v33  ;;  %v1599_v60 = vmul.f32 0.0, %v4751_v49  ;;  %v3868_v63 = vpop.f32.mrb[4].mxu1  ;;  %v1604_v45 = vmul.f32 0.0, %v1566_v13 }
 0x27a   : > { %v1598_v61 = vmul.f32 0.0, %v4755_v56  ;;  %v3859_v62 = vpop.f32.mrb[6].mxu0  ;;  %v1575_v3 = vpop.f32.mrb[5].mxu1  ;;  %v1581_v14 = vadd.f32 %v3868_v63, %v4730_v23  ;;  %v1631_v26 = vsel %vm1275_vm3, %v1605_v50, 0.0 }
 0x27b   : > { %v1616_v0 = vadd.f32 %v1615_v59, %v1614_v57  ;;  %v1551_v1 = vadd.f32 %v3859_v62, %v4730_v23  ;;  %v1545_v2 = vpop.f32.mrb[7].mxu0  ;;  %v1619_v9 = vsel %vm1275_vm3, %v1599_v60, 0.0  ;;  %v1576_v46 = vadd.f32 %v4730_v23, %v1575_v3 }
 0x27c   : > { %v1617_v4 = vsel %vm1275_vm3, %v1598_v61, 0.0  ;;  %v1546_v5 = vadd.f32 %v4730_v23, %v1545_v2  ;;  %v1629_v16 = vsel %vm1275_vm3, %v1604_v45, 0.0  ;;  %v1607_v28 = vmul.f32 0.0, %v1581_v14 }
 0x27d   : > { %v1618_v6 = vadd.f32 %v1617_v4, %v1616_v0  ;;  %v1601_v10 = vmul.f32 0.0, %v1551_v1  ;;  %v3871_v15 = vpop.f32.mrb[6].mxu1  ;;  %v1606_v25 = vmul.f32 0.0, %v1576_v46 }
 0x27e   : > { %v1600_v11 = vmul.f32 0.0, %v1546_v5  ;;  %v1585_v18 = vpop.f32.mrb[7].mxu1  ;;  %v1591_v31 = vadd.f32 %v3871_v15, %v4730_v23  ;;  %v1635_v37 = vsel %vm1275_vm3, %v1607_v28, 0.0 }
 0x27f   : > { %v1620_v17 = vadd.f32 %v1619_v9, %v1618_v6  ;;  %v1623_v19 = vsel %vm1275_vm3, %v1601_v10, 0.0  ;;  %v1586_v24 = vadd.f32 %v4730_v23, %v1585_v18  ;;  %v1633_v29 = vsel %vm1275_vm3, %v1606_v25, 0.0 }
 0x280   : > { %v1621_v40 = vsel %vm1275_vm3, %v1600_v11, 0.0  ;;  %v1609_v38 = vmul.f32 0.0, %v1591_v31 }
 0x281   : > { %v1622_v41 = vadd.f32 %v1621_v40, %v1620_v17  ;;  %v1608_v30 = vmul.f32 0.0, %v1586_v24 }
 0x282   : > { %v1639_v36 = vsel %vm1275_vm3, %v1609_v38, 0.0 }
 0x283   : > { %v1624_v21 = vadd.f32 %v1623_v19, %v1622_v41  ;;  %v1637_v12 = vsel %vm1275_vm3, %v1608_v30, 0.0 }
 0x285   : > { %v1626_v22 = vadd.f32 %v1625_v20, %v1624_v21 }
 0x287   : > { %v1628_v51 = vadd.f32 %v1627_v48, %v1626_v22 }
 0x289   : > { %v1630_v27 = vadd.f32 %v1629_v16, %v1628_v51 }
 0x28b   : > { %v1632_v32 = vadd.f32 %v1631_v26, %v1630_v27 }
 0x28d   : > { %v1634_v33 = vadd.f32 %v1633_v29, %v1632_v32 }
 0x28f   : > { %v1636_v44 = vadd.f32 %v1635_v37, %v1634_v33 }
 0x291   : > { %v1638_v47 = vadd.f32 %v1637_v12, %v1636_v44 }
 0x293   : > { %v1640_v53 = vadd.f32 %v1639_v36, %v1638_v47 }
 0x295   : > { %v1641_v54 = vrot.slane %v1640_v53, 4 }
 0x297   : > { %v1642_v55 = vadd.f32 %v1641_v54, %v1640_v53 }
 0x299   : > { %v1643_v57 = vrot.slane %v1642_v55, 2 }
 0x29b   : > { %v1644_v59 = vadd.f32 %v1643_v57, %v1642_v55 }
 0x29d   : > { %v1645_v60 = vrot.slane %v1644_v59, 1 }
 0x29f   : > { %v1646_v61 = vadd.f32 %v1645_v60, %v1644_v59 }
 0x2a1   : > { %v1647_v23 = vmul.f32 0.0625, %v1646_v61 }
 0x2a3   : > { %v4786_v62 = vsub.f32 %v4736_v52, %v1647_v23  ;;  %v4789_v63 = vsub.f32 %v4733_v34, %v1647_v23  ;;  %v4792_v0 = vsub.f32 %v4746_v39, %v1647_v23  ;;  %v4795_v2 = vsub.f32 %v4743_v35, %v1647_v23 }
 0x2a4   : > { %v4798_v3 = vsub.f32 %v4755_v56, %v1647_v23  ;;  %v4801_v4 = vsub.f32 %v4751_v49, %v1647_v23  ;;  %v4803_v6 = vsub.f32 %v1546_v5, %v1647_v23  ;;  %v4805_v8 = vsub.f32 %v1551_v1, %v1647_v23 }
 0x2a5   : > { %v4808_v52 = vsub.f32 %v4758_v58, %v1647_v23  ;;  %v4810_v34 = vsub.f32 %v1561_v7, %v1647_v23  ;;  %v4812_v39 = vsub.f32 %v1566_v13, %v1647_v23  ;;  %v4814_v9 = vsub.f32 %v1571_v43, %v1647_v23 }
 0x2a6   : > { %v4816_v35 = vsub.f32 %v1576_v46, %v1647_v23  ;;  %v4818_v56 = vsub.f32 %v1581_v14, %v1647_v23  ;;  %v4820_v10 = vsub.f32 %v1586_v24, %v1647_v23  ;;  %v4822_v49 = vsub.f32 %v1591_v31, %v1647_v23 }
 0x2a7   : > { %v1666_v1 = vmul.f32 0.0, %v4792_v0  ;;  %v1667_v5 = vmul.f32 0.0, %v4795_v2  ;;  %v1680_v58 = vmul.f32 %v4786_v62, %v4786_v62  ;;  %v1681_v7 = vmul.f32 %v4789_v63, %v4789_v63 }
 0x2a8   : > { %v1668_v13 = vmul.f32 0.0, %v4798_v3  ;;  %v1669_v15 = vmul.f32 0.0, %v4801_v4  ;;  %v1670_v43 = vmul.f32 0.0, %v4803_v6  ;;  %v1671_v45 = vmul.f32 0.0, %v4805_v8 }
 0x2a9   : > { %v1682_v11 = vmul.f32 %v1666_v1, %v1666_v1  ;;  %v1683_v17 = vmul.f32 %v1667_v5, %v1667_v5  ;;  %v1696_v18 = vsel %vm1275_vm3, %v1680_v58, 0.0  ;;  %v1697_v40 = vsel %vm1275_vm3, %v1681_v7, 0.0 }
 0x2aa   : > { %v1698_v41 = vadd.f32 %v1697_v40, %v1696_v18  ;;  %v1684_v19 = vmul.f32 %v1668_v13, %v1668_v13  ;;  %v1685_v46 = vmul.f32 %v1669_v15, %v1669_v15  ;;  %v1672_v22 = vmul.f32 0.0, %v4808_v52 }
 0x2ab   : > { %v1699_v42 = vsel %vm1275_vm3, %v1682_v11, 0.0  ;;  %v1701_v21 = vsel %vm1275_vm3, %v1683_v17, 0.0  ;;  %v1686_v50 = vmul.f32 %v1670_v43, %v1670_v43  ;;  %v1673_v25 = vmul.f32 0.0, %v4810_v34 }
 0x2ac   : > { %v1700_v20 = vadd.f32 %v1699_v42, %v1698_v41  ;;  %v1703_v16 = vsel %vm1275_vm3, %v1684_v19, 0.0  ;;  %v1687_v24 = vmul.f32 %v1671_v45, %v1671_v45  ;;  %v1705_v51 = vsel %vm1275_vm3, %v1685_v46, 0.0 }
 0x2ad   : > { %v1674_v27 = vmul.f32 0.0, %v4812_v39  ;;  %v1688_v28 = vmul.f32 %v1672_v22, %v1672_v22  ;;  %v1707_v29 = vsel %vm1275_vm3, %v1686_v50, 0.0  ;;  %v1675_v30 = vmul.f32 0.0, %v4814_v9 }
 0x2ae   : > { %v1702_v48 = vadd.f32 %v1701_v21, %v1700_v20  ;;  %v1689_v32 = vmul.f32 %v1673_v25, %v1673_v25  ;;  %v1709_v33 = vsel %vm1275_vm3, %v1687_v24, 0.0  ;;  %v1676_v38 = vmul.f32 0.0, %v4816_v35 }
 0x2af   : > { %v1690_v12 = vmul.f32 %v1674_v27, %v1674_v27  ;;  %v1711_v44 = vsel %vm1275_vm3, %v1688_v28, 0.0  ;;  %v1677_v36 = vmul.f32 0.0, %v4818_v56  ;;  %v1691_v53 = vmul.f32 %v1675_v30, %v1675_v30  ;;  %v4876_v27 = vld [vmem:[%s5812_s11] ss:$0 sm:$0xff] }
 0x2b0   : > { %v1704_v14 = vadd.f32 %v1703_v16, %v1702_v48  ;;  %v1713_v54 = vsel %vm1275_vm3, %v1689_v32, 0.0  ;;  %v1678_v57 = vmul.f32 0.0, %v4820_v10  ;;  %v1692_v59 = vmul.f32 %v1676_v38, %v1676_v38 }
 0x2b1   : > { %v1715_v60 = vsel %vm1275_vm3, %v1690_v12, 0.0  ;;  %v1679_v23 = vmul.f32 0.0, %v4822_v49  ;;  %v1693_v1 = vmul.f32 %v1677_v36, %v1677_v36  ;;  %v1717_v5 = vsel %vm1275_vm3, %v1691_v53, 0.0 }
 0x2b2   : > { %v1706_v26 = vadd.f32 %v1705_v51, %v1704_v14  ;;  %v1694_v7 = vmul.f32 %v1678_v57, %v1678_v57  ;;  %v1719_v11 = vsel %vm1275_vm3, %v1692_v59, 0.0  ;;  %v4863_v14 = vld [vmem:[%s5811_s10] ss:$0 sm:$0xff] }
 0x2b3   : > { %v1695_v15 = vmul.f32 %v1679_v23, %v1679_v23  ;;  %v1721_v17 = vsel %vm1275_vm3, %v1693_v1, 0.0 }
 0x2b4   : > { %v1708_v31 = vadd.f32 %v1707_v29, %v1706_v26  ;;  %v1723_v40 = vsel %vm1275_vm3, %v1694_v7, 0.0 }
 0x2b5   : > { %v1725_v42 = vsel %vm1275_vm3, %v1695_v15, 0.0 }
 0x2b6   : > { %v1710_v37 = vadd.f32 %v1709_v33, %v1708_v31 }
 0x2b8   : > { %v1712_v47 = vadd.f32 %v1711_v44, %v1710_v37 }
 0x2ba   : > { %v1714_v55 = vadd.f32 %v1713_v54, %v1712_v47 }
 0x2bc   : > { %v1716_v61 = vadd.f32 %v1715_v60, %v1714_v55 }
 0x2be   : > { %v1718_v58 = vadd.f32 %v1717_v5, %v1716_v61 }
 0x2c0   : > { %v1720_v13 = vadd.f32 %v1719_v11, %v1718_v58 }
 0x2c2   : > { %v1722_v18 = vadd.f32 %v1721_v17, %v1720_v13 }
 0x2c4   : > { %v1724_v41 = vadd.f32 %v1723_v40, %v1722_v18 }
 0x2c6   : > { %v1726_v43 = vadd.f32 %v1725_v42, %v1724_v41 }
 0x2c8   : > { %v1727_v19 = vrot.slane %v1726_v43, 4 }
 0x2ca   : > { %v1728_v20 = vadd.f32 %v1727_v19, %v1726_v43 }
 0x2cc   : > { %v1729_v45 = vrot.slane %v1728_v20, 2 }
 0x2ce   : > { %v1730_v46 = vadd.f32 %v1729_v45, %v1728_v20 }
 0x2d0   : > { %v1731_v21 = vrot.slane %v1730_v46, 1 }
 0x2d2   : > { %v1732_v48 = vadd.f32 %v1731_v21, %v1730_v46 }
 0x2d4   : > { %v1733_v22 = vmul.f32 0.0625, %v1732_v48 }
 0x2d6   : > { %v1734_v50 = vadd.f32 1e-05, %v1733_v22 }
 0x2d8   : > { %4105 = vrsqrt.f32 %v1734_v50 }
 0x2e2   : > { %v4858_v16 = vpop.eup %4105 }
 0x2e3   : > { %v1750_v25 = vmul.f32 %v4858_v16, %v4820_v10  ;;  %v1736_v24 = vmul.f32 %v4858_v16, %v4786_v62  ;;  %v1738_v51 = vmul.f32 %v4858_v16, %v4792_v0  ;;  %v1737_v26 = vmul.f32 %v4858_v16, %v4789_v63 }
 0x2e4   : > { %v1739_v28 = vmul.f32 %v4858_v16, %v4795_v2  ;;  %v1740_v10 = vmul.f32 %v4858_v16, %v4798_v3  ;;  %v1741_v62 = vmul.f32 %v4858_v16, %v4801_v4  ;;  %v1742_v0 = vmul.f32 %v4858_v16, %v4803_v6 }
 0x2e5   : > { %v1758_v29 = vmul.f32 %v4863_v14, %v1736_v24  ;;  %v1760_v63 = vmul.f32 %v4863_v14, %v1738_v51  ;;  %v1759_v31 = vmul.f32 %v4863_v14, %v1737_v26  ;;  %v1743_v30 = vmul.f32 %v4858_v16, %v4805_v8 }
 0x2e6   : > { %v1761_v2 = vmul.f32 %v4863_v14, %v1739_v28  ;;  %v1762_v32 = vmul.f32 %v4863_v14, %v1740_v10  ;;  %v1763_v3 = vmul.f32 %v4863_v14, %v1741_v62  ;;  %v1764_v4 = vmul.f32 %v4863_v14, %v1742_v0 }
 0x2e7   : > { %v1780_v33 = vadd.f32 %v4876_v27, %v1758_v29  ;;  %v1782_v6 = vadd.f32 %v4876_v27, %v1760_v63  ;;  %v1781_v37 = vadd.f32 %v4876_v27, %v1759_v31  ;;  %v1765_v38 = vmul.f32 %v4863_v14, %v1743_v30 }
 0x2e8   : > { %v1783_v12 = vadd.f32 %v4876_v27, %v1761_v2  ;;  %v1784_v8 = vadd.f32 %v4876_v27, %v1762_v32  ;;  %v1785_v44 = vadd.f32 %v4876_v27, %v1763_v3  ;;  %v1786_v47 = vadd.f32 %v4876_v27, %v1764_v4 }
 0x2e9   : > { %1828 = vrot.lane.b32.xlu0 %v1780_v33, %s4235_s26  ;;  %v1893_v36 = vsel %vm1275_vm3, %v1780_v33, 0.0  ;;  %v1798_v53 = vmul.f32 0.0, %v1782_v6  ;;  %v1894_v54 = vsel %vm1275_vm3, %v1781_v37, 0.0  ;;  %v1787_v55 = vadd.f32 %v4876_v27, %v1765_v38 }
 0x2ea   : > { %v1909_v57 = vpack.c.bf16 %v1894_v54, %v1893_v36  ;;  %v1799_v59 = vmul.f32 0.0, %v1783_v12  ;;  %v1800_v60 = vmul.f32 0.0, %v1784_v8  ;;  %v1801_v61 = vmul.f32 0.0, %v1785_v44 }
 0x2eb   : > { %1832 = vrot.lane.b32.xlu1 %v1798_v53, %s4235_s26  ;;  %v1895_v23 = vsel %vm1275_vm3, %v1798_v53, 0.0  ;;  %v1802_v1 = vmul.f32 0.0, %v1786_v47  ;;  %v1803_v5 = vmul.f32 0.0, %v1787_v55  ;;  %v1744_v58 = vmul.f32 %v4858_v16, %v4808_v52 }
 0x2ec   : > { %1917 = vst.msk [vmem:[#allocation2] sm:$0xff] %vm1400_vm4, %v1909_v57  ;;  %v1896_v7 = vsel %vm1275_vm3, %v1799_v59, 0.0  ;;  %v1897_v11 = vsel %vm1275_vm3, %v1800_v60, 0.0  ;;  %v1898_v13 = vsel %vm1275_vm3, %v1801_v61, 0.0  ;;  %v1745_v15 = vmul.f32 %v4858_v16, %v4810_v34 }
 0x2ed   : > { %1830 = vrot.lane.b32.xlu0 %v1781_v37, %s4235_s26  ;;  %v1910_v17 = vpack.c.bf16 %v1896_v7, %v1895_v23  ;;  %v1911_v18 = vpack.c.bf16 %v1898_v13, %v1897_v11  ;;  %v1899_v40 = vsel %vm1275_vm3, %v1802_v1, 0.0  ;;  %v1900_v41 = vsel %vm1275_vm3, %v1803_v5, 0.0 }
 0x2ee   : > { %v1912_v52 = vpack.c.bf16 %v1900_v41, %v1899_v40  ;;  %v1766_v42 = vmul.f32 %v4863_v14, %v1744_v58  ;;  %v1767_v43 = vmul.f32 %v4863_v14, %v1745_v15  ;;  %v1746_v19 = vmul.f32 %v4858_v16, %v4812_v39 }
 0x2ef   : > { %1834 = vrot.lane.b32.xlu1 %v1799_v59, %s4235_s26  ;;  %1918 = vst.msk [vmem:[#allocation2 + $0x8] sm:$0xff] %vm1400_vm4, %v1910_v17  ;;  %1919 = vst.msk [vmem:[#allocation2 + $0x10] sm:$0xff] %vm1400_vm4, %v1911_v18  ;;  %v1747_v34 = vmul.f32 %v4858_v16, %v4814_v9  ;;  %v1748_v20 = vmul.f32 %v4858_v16, %v4816_v35  ;;  %v1749_v45 = vmul.f32 %v4858_v16, %v4818_v56 }
 0x2f0   : > { %v1772_v46 = vmul.f32 %v4863_v14, %v1750_v25  ;;  %1920 = vst.msk [vmem:[#allocation2 + $0x18] sm:$0xff] %vm1400_vm4, %v1912_v52  ;;  %v1788_v39 = vadd.f32 %v4876_v27, %v1766_v42  ;;  %v1789_v21 = vadd.f32 %v4876_v27, %v1767_v43  ;;  %v1768_v48 = vmul.f32 %v4863_v14, %v1746_v19 }
 0x2f1   : > { %v1751_v22 = vmul.f32 %v4858_v16, %v4822_v49  ;;  %1836 = vrot.lane.b32.xlu0 %v1800_v60, %s4235_s26  ;;  %v1769_v9 = vmul.f32 %v4863_v14, %v1747_v34  ;;  %v1770_v35 = vmul.f32 %v4863_v14, %v1748_v20  ;;  %v1771_v56 = vmul.f32 %v4863_v14, %v1749_v45 }
 0x2f2   : > { %v1794_v50 = vadd.f32 %v4876_v27, %v1772_v46  ;;  %v1804_v25 = vmul.f32 0.0, %v1788_v39  ;;  %v1805_v24 = vmul.f32 0.0, %v1789_v21  ;;  %v1790_v51 = vadd.f32 %v4876_v27, %v1768_v48 }
 0x2f3   : > { %v1773_v26 = vmul.f32 %v4863_v14, %v1751_v22  ;;  %1838 = vrot.lane.b32.xlu1 %v1801_v61, %s4235_s26  ;;  %v1791_v49 = vadd.f32 %v4876_v27, %v1769_v9  ;;  %v1792_v16 = vadd.f32 %v4876_v27, %v1770_v35  ;;  %v1793_v28 = vadd.f32 %v4876_v27, %v1771_v56 }
 0x2f4   : > { %v1810_v10 = vmul.f32 0.0, %v1794_v50  ;;  %v1901_v62 = vsel %vm1275_vm3, %v1804_v25, 0.0  ;;  %v1902_v0 = vsel %vm1275_vm3, %v1805_v24, 0.0  ;;  %v1806_v29 = vmul.f32 0.0, %v1790_v51 }
 0x2f5   : > { %v1795_v63 = vadd.f32 %v4876_v27, %v1773_v26  ;;  %1840 = vrot.lane.b32.xlu0 %v1802_v1, %s4235_s26  ;;  %v1913_v31 = vpack.c.bf16 %v1902_v0, %v1901_v62  ;;  %v1807_v14 = vmul.f32 0.0, %v1791_v49  ;;  %v1808_v30 = vmul.f32 0.0, %v1792_v16 }
 0x2f6   : > { %v1809_v2 = vmul.f32 0.0, %v1793_v28  ;;  %v1903_v32 = vsel %vm1275_vm3, %v1806_v29, 0.0  ;;  %v1907_v3 = vsel %vm1275_vm3, %v1810_v10, 0.0 }
 0x2f7   : > { %v1811_v4 = vmul.f32 0.0, %v1795_v63  ;;  %1842 = vrot.lane.b32.xlu1 %v1803_v5, %s4235_s26  ;;  %1921 = vst.msk [vmem:[#allocation2 + $0x20] sm:$0xff] %vm1400_vm4, %v1913_v31  ;;  %v1904_v33 = vsel %vm1275_vm3, %v1807_v14, 0.0  ;;  %v1905_v6 = vsel %vm1275_vm3, %v1808_v30, 0.0 }
 0x2f8   : > { %v1906_v27 = vsel %vm1275_vm3, %v1809_v2, 0.0  ;;  %v1914_v37 = vpack.c.bf16 %v1904_v33, %v1903_v32 }
 0x2f9   : > { %v1915_v38 = vpack.c.bf16 %v1906_v27, %v1905_v6  ;;  %v1908_v12 = vsel %vm1275_vm3, %v1811_v4, 0.0  ;;  %1844 = vrot.lane.b32.xlu0 %v1804_v25, %s4235_s26 }
 0x2fa   : > { %v1916_v8 = vpack.c.bf16 %v1908_v12, %v1907_v3  ;;  %1922 = vst.msk [vmem:[#allocation2 + $0x28] sm:$0xff] %vm1400_vm4, %v1914_v37 }
 0x2fb   : > { %1923 = vst.msk [vmem:[#allocation2 + $0x30] sm:$0xff] %vm1400_vm4, %v1915_v38  ;;  %1846 = vrot.lane.b32.xlu1 %v1805_v24, %s4235_s26 }
 0x2fc   : > { %1924 = vst.msk [vmem:[#allocation2 + $0x38] sm:$0xff] %vm1400_vm4, %v1916_v8 }
 0x2fd   : > { %1848 = vrot.lane.b32.xlu0 %v1806_v29, %s4235_s26 }
 0x2ff   : > { %1850 = vrot.lane.b32.xlu1 %v1807_v14, %s4235_s26 }
 0x301   : > { %1852 = vrot.lane.b32.xlu0 %v1808_v30, %s4235_s26 }
 0x303   : > { %1854 = vrot.lane.b32.xlu1 %v1809_v2, %s4235_s26 }
 0x305   : > { %1856 = vrot.lane.b32.xlu0 %v1810_v10, %s4235_s26 }
 0x307   : > { %1858 = vrot.lane.b32.xlu1 %v1811_v4, %s4235_s26 }
 0x35b   : > { %v1829_v44 = vpop.permute.xlu0 %1828 }
 0x35c   : > { %1877 = vst.msk [vmem:[#allocation4] sm:$0xff] %vm1876_vm5, %v1829_v44 }
 0x35d   : > { %v1833_v47 = vpop.permute.xlu1 %1832 }
 0x35e   : > { %1879 = vst.msk [vmem:[#allocation4 + $0x10] sm:$0xff] %vm1876_vm5, %v1833_v47 }
 0x35f   : > { %v1831_v36 = vpop.permute.xlu0 %1830 }
 0x360   : > { %1878 = vst.msk [vmem:[#allocation4 + $0x8] sm:$0xff] %vm1876_vm5, %v1831_v36 }
 0x361   : > { %v1835_v53 = vpop.permute.xlu1 %1834 }
 0x362   : > { %1880 = vst.msk [vmem:[#allocation4 + $0x18] sm:$0xff] %vm1876_vm5, %v1835_v53 }
 0x363   : > { %v1837_v54 = vpop.permute.xlu0 %1836 }
 0x364   : > { %1881 = vst.msk [vmem:[#allocation4 + $0x20] sm:$0xff] %vm1876_vm5, %v1837_v54 }
 0x365   : > { %v1839_v55 = vpop.permute.xlu1 %1838 }
 0x366   : > { %1882 = vst.msk [vmem:[#allocation4 + $0x28] sm:$0xff] %vm1876_vm5, %v1839_v55 }
 0x367   : > { %v1841_v57 = vpop.permute.xlu0 %1840 }
 0x368   : > { %1883 = vst.msk [vmem:[#allocation4 + $0x30] sm:$0xff] %vm1876_vm5, %v1841_v57 }
 0x369   : > { %v1843_v59 = vpop.permute.xlu1 %1842 }
 0x36a   : > { %1884 = vst.msk [vmem:[#allocation4 + $0x38] sm:$0xff] %vm1876_vm5, %v1843_v59 }
 0x36b   : > { %v1845_v60 = vpop.permute.xlu0 %1844 }
 0x36c   : > { %1885 = vst.msk [vmem:[#allocation4 + $0x40] sm:$0xff] %vm1876_vm5, %v1845_v60 }
 0x36d   : > { %v1847_v61 = vpop.permute.xlu1 %1846 }
 0x36e   : > { %1886 = vst.msk [vmem:[#allocation4 + $0x48] sm:$0xff] %vm1876_vm5, %v1847_v61 }
 0x36f   : > { %v1849_v23 = vpop.permute.xlu0 %1848 }
 0x370   : > { %1887 = vst.msk [vmem:[#allocation4 + $0x50] sm:$0xff] %vm1876_vm5, %v1849_v23 }
 0x371   : > { %v1851_v1 = vpop.permute.xlu1 %1850 }
 0x372   : > { %1888 = vst.msk [vmem:[#allocation4 + $0x58] sm:$0xff] %vm1876_vm5, %v1851_v1 }
 0x373   : > { %v1853_v5 = vpop.permute.xlu0 %1852 }
 0x374   : > { %1889 = vst.msk [vmem:[#allocation4 + $0x60] sm:$0xff] %vm1876_vm5, %v1853_v5 }
 0x375   : > { %v1855_v58 = vpop.permute.xlu1 %1854 }
 0x376   : > { %1890 = vst.msk [vmem:[#allocation4 + $0x68] sm:$0xff] %vm1876_vm5, %v1855_v58 }
 0x377   : > { %v1857_v7 = vpop.permute.xlu0 %1856 }
 0x378   : > { %1891 = vst.msk [vmem:[#allocation4 + $0x70] sm:$0xff] %vm1876_vm5, %v1857_v7 }
 0x379   : > { %v1859_v11 = vpop.permute.xlu1 %1858 }
 0x37a   : > { %1892 = vst.msk [vmem:[#allocation4 + $0x78] sm:$0xff] %vm1876_vm5, %v1859_v11 }
 0x37b PF: > { %p1925_p7 = scmp.eq.s32.totalorder %s4225_s21, 3 }
 0x37c   : > { %v4993_v13 = vld [vmem:[#allocation4] sm:$0xff] (%p1925_p7)  ;;  %v4995_v15 = vld [vmem:[#allocation4 + $0x10] sm:$0xff] (%p1925_p7)  ;;  %s4236_s27 = smov (%p1925_p7), 118   ;;  %v5001_v17 = vld [vmem:[#allocation4 + $0x8] sm:$0xff] (%p1925_p7)  ;;  %vm2010_vm6 = vcmask (%p1925_p7), 80896   ;;  %vm2135_vm7 = vcmask (%p1925_p7), 130048  }
 0x37d   : > { %1929 = sbr.rel (!%p1925_p7) target bundleno = 2036 (0x7f4), region = 108  ;;  %1962 = vrot.lane.b32.xlu0 (%p1925_p7), %v4993_v13, %s4236_s27  ;;  %1966 = vrot.lane.b32.xlu1 (%p1925_p7), %v4995_v15, %s4236_s27  ;;  %v5003_v18 = vld [vmem:[#allocation4 + $0x18] sm:$0xff] (%p1925_p7)  ;;  %v2027_v40 = vld [vmem:[%s5813_s12] sm:$0xff] (%p1925_p7)  ;;  %v2028_v41 = vld [vmem:[%s5813_s12 + $0x8] sm:$0xff] (%p1925_p7)  ;;  %vm2688_vm8 = vcmask (%p1925_p7), 1045504   ;;  %vm4237_vm9 = vmmov (%p1925_p7), 1  }
 0x37e   : > { %v5015_v52 = vld [vmem:[#allocation4 + $0x20] sm:$0xff] (%p1925_p7)  ;;  %v5017_v42 = vld [vmem:[#allocation4 + $0x28] sm:$0xff] (%p1925_p7)  ;;  %v4007_v43 = vpack.c.bf16 (%p1925_p7), %v2028_v41, %v2027_v40  ;;  %v5023_v19 = vld [vmem:[#allocation4 + $0x30] sm:$0xff] (%p1925_p7)  ;;  %s4238_s24 = smov (%p1925_p7), 20   ;;  %vm2611_vm11 = vcmask (%p1925_p7), 162816   ;;  %vm2639_vm12 = vcmask (%p1925_p7), 244736  }
 0x37f   : > { %v5025_v34 = vld [vmem:[#allocation4 + $0x38] sm:$0xff] (%p1925_p7)  ;;  %v5031_v20 = vld [vmem:[#allocation4 + $0x40] sm:$0xff] (%p1925_p7)  ;;  %v5033_v45 = vld [vmem:[#allocation4 + $0x48] sm:$0xff] (%p1925_p7)  ;;  %vm2837_vm13 = vcmask (%p1925_p7), 31744  }
 0x380   : > { %4008 = vmatprep.subr.bf16.mxu0 (%p1925_p7), %v4007_v43  ;;  %v5039_v46 = vld [vmem:[#allocation4 + $0x50] sm:$0xff] (%p1925_p7)  ;;  %v5041_v39 = vld [vmem:[#allocation4 + $0x58] sm:$0xff] (%p1925_p7)  ;;  %v5047_v21 = vld [vmem:[#allocation4 + $0x60] sm:$0xff] (%p1925_p7) }
 0x381   : > { %1964 = vrot.lane.b32.xlu0 (%p1925_p7), %v5001_v17, %s4236_s27  ;;  %1968 = vrot.lane.b32.xlu1 (%p1925_p7), %v5003_v18, %s4236_s27  ;;  %v5049_v48 = vld [vmem:[#allocation4 + $0x68] sm:$0xff] (%p1925_p7)  ;;  %v5055_v22 = vld [vmem:[#allocation4 + $0x70] sm:$0xff] (%p1925_p7)  ;;  %v5057_v9 = vld [vmem:[#allocation4 + $0x78] sm:$0xff] (%p1925_p7) }
 0x382   : > { %4010 = vmatpush3.bf16.msra.mxu0 (%p1925_p7), %v4007_v43  ;;  %v2097_v35 = vld [vmem:[#allocation3] sm:$0xff] (%p1925_p7)  ;;  %v2099_v24 = vld [vmem:[#allocation3 + $0x10] sm:$0xff] (%p1925_p7)  ;;  %v2098_v49 = vld [vmem:[#allocation3 + $0x8] sm:$0xff] (%p1925_p7) }
 0x383   : > { %v2100_v0 = vld [vmem:[#allocation3 + $0x18] sm:$0xff] (%p1925_p7)  ;;  %v2101_v31 = vld [vmem:[#allocation3 + $0x20] sm:$0xff] (%p1925_p7)  ;;  %v2102_v3 = vld [vmem:[#allocation3 + $0x28] sm:$0xff] (%p1925_p7) }
 0x384   : > { %v2103_v6 = vld [vmem:[#allocation3 + $0x30] sm:$0xff]  ;;  %v2104_v8 = vld [vmem:[#allocation3 + $0x38] sm:$0xff]  ;;  %v2105_v36 = vld [vmem:[#allocation3 + $0x40] sm:$0xff] }
 0x385   : > { %1970 = vrot.lane.b32.xlu0 %v5015_v52, %s4236_s27  ;;  %1972 = vrot.lane.b32.xlu1 %v5017_v42, %s4236_s27  ;;  %v2106_v59 = vld [vmem:[#allocation3 + $0x48] sm:$0xff]  ;;  %v2107_v23 = vld [vmem:[#allocation3 + $0x50] sm:$0xff]  ;;  %v2108_v11 = vld [vmem:[#allocation3 + $0x58] sm:$0xff] }
 0x386   : > { %v2109_v43 = vld [vmem:[#allocation3 + $0x60] sm:$0xff]  ;;  %vm4016_vm10 = vmpackc.low %vm2688_vm8, %vm4237_vm9 }
 0x389   : > { %1974 = vrot.lane.b32.xlu0 %v5023_v19, %s4236_s27  ;;  %1976 = vrot.lane.b32.xlu1 %v5025_v34, %s4236_s27 }
 0x38d   : > { %1978 = vrot.lane.b32.xlu0 %v5031_v20, %s4236_s27  ;;  %1980 = vrot.lane.b32.xlu1 %v5033_v45, %s4236_s27 }
 0x391   : > { %1982 = vrot.lane.b32.xlu0 %v5039_v46, %s4236_s27  ;;  %1984 = vrot.lane.b32.xlu1 %v5041_v39, %s4236_s27 }
 0x395   : > { %1986 = vrot.lane.b32.xlu0 %v5047_v21, %s4236_s27  ;;  %1988 = vrot.lane.b32.xlu1 %v5049_v48, %s4236_s27 }
 0x399   : > { %1990 = vrot.lane.b32.xlu0 %v5055_v22, %s4236_s27  ;;  %1992 = vrot.lane.b32.xlu1 %v5057_v9, %s4236_s27 }
 0x3ef   : > { %v1963_v56 = vpop.permute.xlu0 %1962  ;;  %v1967_v50 = vpop.permute.xlu1 %1966 }
 0x3f0   : > { %v2011_v25 = vsel %vm2010_vm6, %v1963_v56, 0.0  ;;  %v2013_v51 = vsel %vm2010_vm6, %v1967_v50, 0.0 }
 0x3f1   : > { %v2113_v26 = vadd.f32 %v2097_v35, %v2011_v25  ;;  %v2115_v10 = vadd.f32 %v2099_v24, %v2013_v51  ;;  %v2110_v24 = vld [vmem:[#allocation3 + $0x68] sm:$0xff] }
 0x3f3   : > { %3876 = vmatprep.mubr.msk.f32.mxu0 %vm2135_vm7, %v2113_v26  ;;  %v1965_v16 = vpop.permute.xlu0 %1964  ;;  %v1969_v28 = vpop.permute.xlu1 %1968 }
 0x3f4   : > { %v2012_v62 = vsel %vm2010_vm6, %v1965_v16, 0.0  ;;  %v2014_v29 = vsel %vm2010_vm6, %v1969_v28, 0.0 }
 0x3f5   : > { %v2114_v63 = vadd.f32 %v2098_v49, %v2012_v62  ;;  %v2116_v14 = vadd.f32 %v2100_v0, %v2014_v29  ;;  %v2111_v49 = vld [vmem:[#allocation3 + $0x70] sm:$0xff]  ;;  %v2112_v0 = vld [vmem:[#allocation3 + $0x78] sm:$0xff] }
 0x3f7   : > { %3877 = vmatmul.mubr.msk.f32.vlgmr.msra.gmra.mrb[0].mxu0 %vm2135_vm7, %v2114_v63  ;;  %v1971_v30 = vpop.permute.xlu0 %1970  ;;  %v1973_v2 = vpop.permute.xlu1 %1972 }
 0x3f8   : > { %3879 = vmatprep.mubr.msk.f32.mxu0 %vm2135_vm7, %v2115_v10  ;;  %v2015_v32 = vsel %vm2010_vm6, %v1971_v30, 0.0  ;;  %v2016_v4 = vsel %vm2010_vm6, %v1973_v2, 0.0 }
 0x3f9   : > { %v2117_v33 = vadd.f32 %v2101_v31, %v2015_v32  ;;  %v2118_v27 = vadd.f32 %v2102_v3, %v2016_v4 }
 0x3fb   : > { %3880 = vmatmul.mubr.msk.f32.gmra.mrb[2].mxu0 %vm2135_vm7, %v2116_v14  ;;  %v1975_v37 = vpop.permute.xlu0 %1974  ;;  %v1977_v38 = vpop.permute.xlu1 %1976  ;;  %v5098_v14 = vld [vmem:[%s5814_s13] ss:$0 sm:$0xff] }
 0x3fc   : > { %3882 = vmatprep.mubr.msk.f32.mxu0 %vm2135_vm7, %v2117_v33  ;;  %v2017_v12 = vsel %vm2010_vm6, %v1975_v37, 0.0  ;;  %v2018_v44 = vsel %vm2010_vm6, %v1977_v38, 0.0 }
 0x3fd   : > { %v2119_v47 = vadd.f32 %v2103_v6, %v2017_v12  ;;  %v2120_v53 = vadd.f32 %v2104_v8, %v2018_v44 }
 0x3ff   : > { %3883 = vmatmul.mubr.msk.f32.gmra.mrb[4].mxu0 %vm2135_vm7, %v2118_v27  ;;  %v1979_v54 = vpop.permute.xlu0 %1978  ;;  %v1981_v55 = vpop.permute.xlu1 %1980 }
 0x400   : > { %3885 = vmatprep.mubr.msk.f32.mxu0 %vm2135_vm7, %v2119_v47  ;;  %v2019_v57 = vsel %vm2010_vm6, %v1979_v54, 0.0  ;;  %v2020_v60 = vsel %vm2010_vm6, %v1981_v55, 0.0 }
 0x401   : > { %v2121_v61 = vadd.f32 %v2105_v36, %v2019_v57  ;;  %v2122_v1 = vadd.f32 %v2106_v59, %v2020_v60 }
 0x403   : > { %3886 = vmatmul.mubr.msk.f32.gmra.mrb[6].mxu0 %vm2135_vm7, %v2120_v53  ;;  %v1983_v5 = vpop.permute.xlu0 %1982  ;;  %v1985_v58 = vpop.permute.xlu1 %1984 }
 0x404   : > { %3888 = vmatprep.mubr.msk.f32.mxu0 %vm2135_vm7, %v2121_v61  ;;  %v2021_v7 = vsel %vm2010_vm6, %v1983_v5, 0.0  ;;  %v2022_v40 = vsel %vm2010_vm6, %v1985_v58, 0.0 }
 0x405   : > { %v2123_v41 = vadd.f32 %v2107_v23, %v2021_v7  ;;  %v2124_v35 = vadd.f32 %v2108_v11, %v2022_v40 }
 0x407   : > { %3889 = vmatmul.mubr.msk.f32.gmra.mrb[8].mxu0 %vm2135_vm7, %v2122_v1  ;;  %v1987_v56 = vpop.permute.xlu0 %1986  ;;  %v1989_v50 = vpop.permute.xlu1 %1988 }
 0x408   : > { %3891 = vmatprep.mubr.msk.f32.mxu0 %vm2135_vm7, %v2123_v41  ;;  %v2023_v25 = vsel %vm2010_vm6, %v1987_v56, 0.0  ;;  %v2024_v51 = vsel %vm2010_vm6, %v1989_v50, 0.0 }
 0x409   : > { %v2125_v26 = vadd.f32 %v2109_v43, %v2023_v25  ;;  %v2126_v16 = vadd.f32 %v2110_v24, %v2024_v51 }
 0x40b   : > { %3892 = vmatmul.mubr.msk.f32.gmra.mrb[10].mxu0 %vm2135_vm7, %v2124_v35  ;;  %v1991_v28 = vpop.permute.xlu0 %1990  ;;  %v1993_v10 = vpop.permute.xlu1 %1992 }
 0x40c   : > { %3894 = vmatprep.mubr.msk.f32.mxu0 %vm2135_vm7, %v2125_v26  ;;  %v2025_v62 = vsel %vm2010_vm6, %v1991_v28, 0.0  ;;  %v2026_v29 = vsel %vm2010_vm6, %v1993_v10, 0.0 }
 0x40d   : > { %v2127_v63 = vadd.f32 %v2111_v49, %v2025_v62  ;;  %v2128_v31 = vadd.f32 %v2112_v0, %v2026_v29 }
 0x40f   : > { %3895 = vmatmul.mubr.msk.f32.gmra.mrb[12].mxu0 %vm2135_vm7, %v2126_v16 }
 0x410   : > { %3897 = vmatprep.mubr.msk.f32.mxu0 %vm2135_vm7, %v2127_v63 }
 0x413   : > { %3898 = vmatmul.mubr.msk.f32.gmra.mrb[14].mxu0 %vm2135_vm7, %v2128_v31 }
 0x4ca   : > { %v3878_v30 = vpop.f32.mrb[0].mxu0 }
 0x4cb   : > { %v5101_v2 = vadd.f32 %v3878_v30, %v5098_v14  ;;  %v2250_v32 = vpop.f32.mrb[1].mxu0 }
 0x4cc   : > { %v5104_v3 = vadd.f32 %v5098_v14, %v2250_v32 }
 0x4cd   : > { %v2346_v4 = vsel %vm2010_vm6, %v5101_v2, 0.0 }
 0x4ce   : > { %v2345_v33 = vsel %vm2010_vm6, %v5104_v3, 0.0  ;;  %v3881_v6 = vpop.f32.mrb[2].mxu0 }
 0x4cf   : > { %v2347_v27 = vadd.f32 %v2346_v4, %v2345_v33  ;;  %v5111_v37 = vadd.f32 %v3881_v6, %v5098_v14  ;;  %v2260_v38 = vpop.f32.mrb[3].mxu0 }
 0x4d0   : > { %v5114_v12 = vadd.f32 %v5098_v14, %v2260_v38 }
 0x4d1   : > { %v2332_v8 = vmul.f32 0.0, %v5111_v37 }
 0x4d2   : > { %v2331_v44 = vmul.f32 0.0, %v5114_v12  ;;  %v3884_v47 = vpop.f32.mrb[4].mxu0 }
 0x4d3   : > { %v5119_v36 = vadd.f32 %v3884_v47, %v5098_v14  ;;  %v2270_v53 = vpop.f32.mrb[5].mxu0  ;;  %v2350_v59 = vsel %vm2010_vm6, %v2332_v8, 0.0 }
 0x4d4   : > { %v2348_v54 = vsel %vm2010_vm6, %v2331_v44, 0.0  ;;  %v5123_v55 = vadd.f32 %v5098_v14, %v2270_v53 }
 0x4d5   : > { %v2349_v57 = vadd.f32 %v2348_v54, %v2347_v27  ;;  %v2334_v60 = vmul.f32 0.0, %v5119_v36 }
 0x4d6   : > { %v2333_v61 = vmul.f32 0.0, %v5123_v55  ;;  %v3887_v23 = vpop.f32.mrb[6].mxu0 }
 0x4d7   : > { %v2351_v1 = vadd.f32 %v2350_v59, %v2349_v57  ;;  %v5129_v5 = vadd.f32 %v3887_v23, %v5098_v14  ;;  %v2280_v58 = vpop.f32.mrb[7].mxu0  ;;  %v2354_v41 = vsel %vm2010_vm6, %v2334_v60, 0.0  ;;  %v2628_v23 = vld [vmem:[%s5817_s16] sm:$0xff] }
 0x4d8   : > { %v2352_v7 = vsel %vm2010_vm6, %v2333_v61, 0.0  ;;  %v5133_v11 = vadd.f32 %v5098_v14, %v2280_v58  ;;  %v2630_v58 = vld [vmem:[%s5817_s16 + $0x10] sm:$0xff] }
 0x4d9   : > { %v2353_v40 = vadd.f32 %v2352_v7, %v2351_v1  ;;  %v2336_v43 = vmul.f32 0.0, %v5129_v5  ;;  %v2629_v1 = vld [vmem:[%s5817_s16 + $0x8] sm:$0xff] }
 0x4da   : > { %v2335_v35 = vmul.f32 0.0, %v5133_v11  ;;  %v3890_v56 = vpop.f32.mrb[8].mxu0 }
 0x4db   : > { %v2355_v50 = vadd.f32 %v2354_v41, %v2353_v40  ;;  %v5139_v25 = vadd.f32 %v3890_v56, %v5098_v14  ;;  %v2290_v24 = vpop.f32.mrb[9].mxu0  ;;  %v2358_v16 = vsel %vm2010_vm6, %v2336_v43, 0.0  ;;  %v4011_v43 = vpack.c.bf16 %v2629_v1, %v2628_v23 }
 0x4dc   : > { %v2356_v51 = vsel %vm2010_vm6, %v2335_v35, 0.0  ;;  %v5143_v26 = vadd.f32 %v5098_v14, %v2290_v24  ;;  %v2631_v35 = vld [vmem:[%s5817_s16 + $0x18] sm:$0x3f] }
 0x4dd   : > { %v2357_v49 = vadd.f32 %v2356_v51, %v2355_v50  ;;  %v2338_v28 = vmul.f32 0.0, %v5139_v25  ;;  %v4015_v24 = vpack.c.bf16 %v2631_v35, %v2630_v58  ;;  %4012 = vmatprep.subr.bf16.mxu1 %v4011_v43 }
 0x4de   : > { %v2337_v10 = vmul.f32 0.0, %v5143_v26  ;;  %v3893_v62 = vpop.f32.mrb[10].mxu0  ;;  %4014 = vmatpush3.bf16.msra.mxu1 %v4011_v43 }
 0x4df   : > { %v2359_v0 = vadd.f32 %v2358_v16, %v2357_v49  ;;  %v5149_v29 = vadd.f32 %v3893_v62, %v5098_v14  ;;  %v2300_v63 = vpop.f32.mrb[11].mxu0  ;;  %v2362_v33 = vsel %vm2010_vm6, %v2338_v28, 0.0  ;;  %4017 = vmatprep.subr.msk.bf16.mxu1 %vm4016_vm10, %v4015_v24 }
 0x4e0   : > { %v2360_v31 = vsel %vm2010_vm6, %v2337_v10, 0.0  ;;  %v2301_v30 = vadd.f32 %v5098_v14, %v2300_v63 }
 0x4e1   : > { %v2361_v32 = vadd.f32 %v2360_v31, %v2359_v0  ;;  %v2340_v4 = vmul.f32 0.0, %v5149_v29 }
 0x4e2   : > { %v2339_v6 = vmul.f32 0.0, %v2301_v30  ;;  %v3896_v27 = vpop.f32.mrb[12].mxu0  ;;  %4020 = vmatpush3.bf16.msk.msra.mxu1 %vm4016_vm10, %v4015_v24 }
 0x4e3   : > { %v2363_v38 = vadd.f32 %v2362_v33, %v2361_v32  ;;  %v2316_v8 = vadd.f32 %v3896_v27, %v5098_v14  ;;  %v2310_v44 = vpop.f32.mrb[13].mxu0  ;;  %v2366_v54 = vsel %vm2010_vm6, %v2340_v4, 0.0 }
 0x4e4   : > { %v2364_v47 = vsel %vm2010_vm6, %v2339_v6, 0.0  ;;  %v2311_v53 = vadd.f32 %v5098_v14, %v2310_v44 }
 0x4e5   : > { %v2365_v57 = vadd.f32 %v2364_v47, %v2363_v38  ;;  %v2342_v59 = vmul.f32 0.0, %v2316_v8 }
 0x4e6   : > { %v2341_v60 = vmul.f32 0.0, %v2311_v53  ;;  %v3899_v61 = vpop.f32.mrb[14].mxu0 }
 0x4e7   : > { %v2367_v7 = vadd.f32 %v2366_v54, %v2365_v57  ;;  %v2326_v40 = vadd.f32 %v3899_v61, %v5098_v14  ;;  %v2320_v41 = vpop.f32.mrb[15].mxu0  ;;  %v2370_v49 = vsel %vm2010_vm6, %v2342_v59, 0.0 }
 0x4e8   : > { %v2368_v56 = vsel %vm2010_vm6, %v2341_v60, 0.0  ;;  %v2321_v50 = vadd.f32 %v5098_v14, %v2320_v41 }
 0x4e9   : > { %v2369_v51 = vadd.f32 %v2368_v56, %v2367_v7  ;;  %v2344_v16 = vmul.f32 0.0, %v2326_v40 }
 0x4ea   : > { %v2343_v28 = vmul.f32 0.0, %v2321_v50 }
 0x4eb   : > { %v2371_v10 = vadd.f32 %v2370_v49, %v2369_v51  ;;  %v2374_v63 = vsel %vm2010_vm6, %v2344_v16, 0.0 }
 0x4ec   : > { %v2372_v62 = vsel %vm2010_vm6, %v2343_v28, 0.0 }
 0x4ed   : > { %v2373_v0 = vadd.f32 %v2372_v62, %v2371_v10 }
 0x4ef   : > { %v2375_v31 = vadd.f32 %v2374_v63, %v2373_v0 }
 0x4f1   : > { %v2376_v14 = vrot.slane %v2375_v31, 4 }
 0x4f3   : > { %v2377_v32 = vadd.f32 %v2376_v14, %v2375_v31 }
 0x4f5   : > { %v2378_v4 = vrot.slane %v2377_v32, 2 }
 0x4f7   : > { %v2379_v33 = vadd.f32 %v2378_v4, %v2377_v32 }
 0x4f9   : > { %v2380_v6 = vrot.slane %v2379_v33, 1 }
 0x4fb   : > { %v2381_v27 = vadd.f32 %v2380_v6, %v2379_v33 }
 0x4fd   : > { %v2382_v38 = vmul.f32 0.0625, %v2381_v27 }
 0x4ff   : > { %v5178_v44 = vsub.f32 %v5104_v3, %v2382_v38  ;;  %v5181_v47 = vsub.f32 %v5101_v2, %v2382_v38  ;;  %v5184_v54 = vsub.f32 %v5114_v12, %v2382_v38  ;;  %v5187_v57 = vsub.f32 %v5111_v37, %v2382_v38 }
 0x500   : > { %v5190_v59 = vsub.f32 %v5123_v55, %v2382_v38  ;;  %v5193_v60 = vsub.f32 %v5119_v36, %v2382_v38  ;;  %v5196_v61 = vsub.f32 %v5133_v11, %v2382_v38  ;;  %v5199_v3 = vsub.f32 %v5129_v5, %v2382_v38 }
 0x501   : > { %v5202_v2 = vsub.f32 %v5143_v26, %v2382_v38  ;;  %v5205_v12 = vsub.f32 %v5139_v25, %v2382_v38  ;;  %v5207_v37 = vsub.f32 %v2301_v30, %v2382_v38  ;;  %v5210_v55 = vsub.f32 %v5149_v29, %v2382_v38 }
 0x502   : > { %v5212_v23 = vsub.f32 %v2311_v53, %v2382_v38  ;;  %v5214_v36 = vsub.f32 %v2316_v8, %v2382_v38  ;;  %v5216_v11 = vsub.f32 %v2321_v50, %v2382_v38  ;;  %v5218_v1 = vsub.f32 %v2326_v40, %v2382_v38 }
 0x503   : > { %v2401_v5 = vmul.f32 0.0, %v5184_v54  ;;  %v2402_v26 = vmul.f32 0.0, %v5187_v57  ;;  %v2415_v25 = vmul.f32 %v5178_v44, %v5178_v44  ;;  %v2416_v30 = vmul.f32 %v5181_v47, %v5181_v47 }
 0x504   : > { %v2403_v53 = vmul.f32 0.0, %v5190_v59  ;;  %v2404_v8 = vmul.f32 0.0, %v5193_v60  ;;  %v2405_v35 = vmul.f32 0.0, %v5196_v61  ;;  %v2406_v24 = vmul.f32 0.0, %v5199_v3 }
 0x505   : > { %v2417_v29 = vmul.f32 %v2401_v5, %v2401_v5  ;;  %v2418_v58 = vmul.f32 %v2402_v26, %v2402_v26  ;;  %v2431_v7 = vsel %vm2010_vm6, %v2415_v25, 0.0  ;;  %v2432_v40 = vsel %vm2010_vm6, %v2416_v30, 0.0 }
 0x506   : > { %v2433_v41 = vadd.f32 %v2432_v40, %v2431_v7  ;;  %v2419_v56 = vmul.f32 %v2403_v53, %v2403_v53  ;;  %v2420_v51 = vmul.f32 %v2404_v8, %v2404_v8  ;;  %v2407_v28 = vmul.f32 0.0, %v5202_v2 }
 0x507   : > { %v2434_v43 = vsel %vm2010_vm6, %v2417_v29, 0.0  ;;  %v2436_v49 = vsel %vm2010_vm6, %v2418_v58, 0.0  ;;  %v2421_v10 = vmul.f32 %v2405_v35, %v2405_v35  ;;  %v2408_v63 = vmul.f32 0.0, %v5205_v12 }
 0x508   : > { %v2435_v50 = vadd.f32 %v2434_v43, %v2433_v41  ;;  %v2438_v62 = vsel %vm2010_vm6, %v2419_v56, 0.0  ;;  %v2422_v31 = vmul.f32 %v2406_v24, %v2406_v24  ;;  %v2440_v14 = vsel %vm2010_vm6, %v2420_v51, 0.0 }
 0x509   : > { %v2409_v4 = vmul.f32 0.0, %v5207_v37  ;;  %v2423_v33 = vmul.f32 %v2407_v28, %v2407_v28  ;;  %v2442_v6 = vsel %vm2010_vm6, %v2421_v10, 0.0  ;;  %v2410_v38 = vmul.f32 0.0, %v5210_v55 }
 0x50a   : > { %v2437_v16 = vadd.f32 %v2436_v49, %v2435_v50  ;;  %v2424_v5 = vmul.f32 %v2408_v63, %v2408_v63  ;;  %v2444_v26 = vsel %vm2010_vm6, %v2422_v31, 0.0  ;;  %v2411_v30 = vmul.f32 0.0, %v5212_v23 }
 0x50b   : > { %v2425_v29 = vmul.f32 %v2409_v4, %v2409_v4  ;;  %v2446_v53 = vsel %vm2010_vm6, %v2423_v33, 0.0  ;;  %v2412_v58 = vmul.f32 0.0, %v5214_v36  ;;  %v2426_v7 = vmul.f32 %v2410_v38, %v2410_v38 }
 0x50c   : > { %v2439_v0 = vadd.f32 %v2438_v62, %v2437_v16  ;;  %v2448_v40 = vsel %vm2010_vm6, %v2424_v5, 0.0  ;;  %v2413_v43 = vmul.f32 0.0, %v5216_v11  ;;  %v2427_v35 = vmul.f32 %v2411_v30, %v2411_v30 }
 0x50d   : > { %v2450_v56 = vsel %vm2010_vm6, %v2425_v29, 0.0  ;;  %v2414_v24 = vmul.f32 0.0, %v5218_v1  ;;  %v2428_v51 = vmul.f32 %v2412_v58, %v2412_v58  ;;  %v2452_v49 = vsel %vm2010_vm6, %v2426_v7, 0.0 }
 0x50e   : > { %v2441_v32 = vadd.f32 %v2440_v14, %v2439_v0  ;;  %v2429_v28 = vmul.f32 %v2413_v43, %v2413_v43  ;;  %v2454_v10 = vsel %vm2010_vm6, %v2427_v35, 0.0  ;;  %v5268_v43 = vld [vmem:[%s5816_s15] ss:$0 sm:$0xff] }
 0x50f   : > { %v2430_v0 = vmul.f32 %v2414_v24, %v2414_v24  ;;  %v2456_v63 = vsel %vm2010_vm6, %v2428_v51, 0.0 }
 0x510   : > { %v2443_v27 = vadd.f32 %v2442_v6, %v2441_v32  ;;  %v2458_v14 = vsel %vm2010_vm6, %v2429_v28, 0.0 }
 0x511   : > { %v2460_v4 = vsel %vm2010_vm6, %v2430_v0, 0.0 }
 0x512   : > { %v2445_v25 = vadd.f32 %v2444_v26, %v2443_v27 }
 0x514   : > { %v2447_v8 = vadd.f32 %v2446_v53, %v2445_v25 }
 0x516   : > { %v2449_v41 = vadd.f32 %v2448_v40, %v2447_v8  ;;  %v5257_v8 = vld [vmem:[%s5815_s14] ss:$0 sm:$0xff] }
 0x518   : > { %v2451_v50 = vadd.f32 %v2450_v56, %v2449_v41 }
 0x51a   : > { %v2453_v16 = vadd.f32 %v2452_v49, %v2451_v50 }
 0x51c   : > { %v2455_v62 = vadd.f32 %v2454_v10, %v2453_v16 }
 0x51e   : > { %v2457_v31 = vadd.f32 %v2456_v63, %v2455_v62 }
 0x520   : > { %v2459_v32 = vadd.f32 %v2458_v14, %v2457_v31 }
 0x522   : > { %v2461_v33 = vadd.f32 %v2460_v4, %v2459_v32 }
 0x524   : > { %v2462_v6 = vrot.slane %v2461_v33, 4 }
 0x526   : > { %v2463_v27 = vadd.f32 %v2462_v6, %v2461_v33 }
 0x528   : > { %v2464_v38 = vrot.slane %v2463_v27, 2 }
 0x52a   : > { %v2465_v5 = vadd.f32 %v2464_v38, %v2463_v27 }
 0x52c   : > { %v2466_v26 = vrot.slane %v2465_v5, 1 }
 0x52e   : > { %v2467_v25 = vadd.f32 %v2466_v26, %v2465_v5 }
 0x530   : > { %v2468_v30 = vmul.f32 0.0625, %v2467_v25 }
 0x532   : > { %v2469_v29 = vadd.f32 1e-05, %v2468_v30 }
 0x534   : > { %4107 = vrsqrt.f32 %v2469_v29 }
 0x53e   : > { %v4108_v53 = vpop.eup %4107 }
 0x53f   : > { %v5260_v58 = vmul.f32 %v4108_v53, %v5216_v11  ;;  %v2472_v7 = vmul.f32 %v4108_v53, %v5181_v47  ;;  %v2471_v40 = vmul.f32 %v4108_v53, %v5178_v44  ;;  %v2474_v41 = vmul.f32 %v4108_v53, %v5187_v57 }
 0x540   : > { %v2473_v35 = vmul.f32 %v4108_v53, %v5184_v54  ;;  %v2476_v56 = vmul.f32 %v4108_v53, %v5193_v60  ;;  %v2475_v50 = vmul.f32 %v4108_v53, %v5190_v59  ;;  %v2478_v11 = vmul.f32 %v4108_v53, %v5199_v3 }
 0x541   : > { %v2494_v24 = vmul.f32 %v5257_v8, %v2472_v7  ;;  %v2493_v47 = vmul.f32 %v5257_v8, %v2471_v40  ;;  %v2496_v44 = vmul.f32 %v5257_v8, %v2474_v41  ;;  %v2477_v57 = vmul.f32 %v4108_v53, %v5196_v61 }
 0x542   : > { %v2495_v51 = vmul.f32 %v5257_v8, %v2473_v35  ;;  %v2498_v49 = vmul.f32 %v5257_v8, %v2476_v56  ;;  %v2497_v3 = vmul.f32 %v5257_v8, %v2475_v50  ;;  %v2480_v61 = vmul.f32 %v4108_v53, %v5205_v12 }
 0x543   : > { %v2516_v54 = vadd.f32 %v5268_v43, %v2494_v24  ;;  %v2515_v60 = vadd.f32 %v5268_v43, %v2493_v47  ;;  %v2518_v59 = vadd.f32 %v5268_v43, %v2496_v44  ;;  %v2479_v28 = vmul.f32 %v4108_v53, %v5202_v2 }
 0x544   : > { %v2517_v16 = vadd.f32 %v5268_v43, %v2495_v51  ;;  %v2520_v10 = vadd.f32 %v5268_v43, %v2498_v49  ;;  %v2500_v62 = vmul.f32 %v5257_v8, %v2478_v11  ;;  %v2499_v0 = vmul.f32 %v5257_v8, %v2477_v57 }
 0x545   : > { %2565 = vrot.lane.b32.xlu1 %v2516_v54, %s4238_s24  ;;  %2563 = vrot.lane.b32.xlu0 %v2515_v60, %s4238_s24  ;;  %v2534_v63 = vmul.f32 0.0, %v2518_v59  ;;  %v2519_v14 = vadd.f32 %v5268_v43, %v2497_v3  ;;  %v2482_v32 = vmul.f32 %v4108_v53, %v5210_v55  ;;  %v2481_v4 = vmul.f32 %v4108_v53, %v5207_v37 }
 0x546   : > { %v2533_v31 = vmul.f32 0.0, %v2517_v16  ;;  %v2484_v33 = vmul.f32 %v4108_v53, %v5214_v36  ;;  %v2483_v12 = vmul.f32 %v4108_v53, %v5212_v23  ;;  %v2486_v2 = vmul.f32 %v4108_v53, %v5218_v1 }
 0x547   : > { %v2522_v6 = vadd.f32 %v5268_v43, %v2500_v62  ;;  %v2521_v27 = vadd.f32 %v5268_v43, %v2499_v0  ;;  %v2536_v38 = vmul.f32 0.0, %v2520_v10  ;;  %v2535_v5 = vmul.f32 0.0, %v2519_v14 }
 0x548   : > { %v2502_v55 = vmul.f32 %v5257_v8, %v2480_v61  ;;  %v2501_v37 = vmul.f32 %v5257_v8, %v2479_v28  ;;  %v2504_v25 = vmul.f32 %v5257_v8, %v2482_v32  ;;  %v2503_v30 = vmul.f32 %v5257_v8, %v2481_v4 }
 0x549   : > { %2569 = vrot.lane.b32.xlu1 %v2534_v63, %s4238_s24  ;;  %2567 = vrot.lane.b32.xlu0 %v2533_v31, %s4238_s24  ;;  %v2538_v23 = vmul.f32 0.0, %v2522_v6  ;;  %v2537_v36 = vmul.f32 0.0, %v2521_v27  ;;  %v2506_v29 = vmul.f32 %v5257_v8, %v2484_v33  ;;  %v2505_v53 = vmul.f32 %v5257_v8, %v2483_v12 }
 0x54a   : > { %v2524_v1 = vadd.f32 %v5268_v43, %v2502_v55  ;;  %v2523_v26 = vadd.f32 %v5268_v43, %v2501_v37  ;;  %v2526_v41 = vadd.f32 %v5268_v43, %v2504_v25  ;;  %v2525_v35 = vadd.f32 %v5268_v43, %v2503_v30 }
 0x54b   : > { %v2508_v56 = vmul.f32 %v5257_v8, %v2486_v2  ;;  %v2507_v50 = vmul.f32 %v5257_v8, %v5260_v58  ;;  %v2528_v47 = vadd.f32 %v5268_v43, %v2506_v29  ;;  %v2527_v44 = vadd.f32 %v5268_v43, %v2505_v53 }
 0x54c   : > { %v2540_v7 = vmul.f32 0.0, %v2524_v1  ;;  %v2539_v40 = vmul.f32 0.0, %v2523_v26  ;;  %v2542_v11 = vmul.f32 0.0, %v2526_v41  ;;  %v2541_v24 = vmul.f32 0.0, %v2525_v35 }
 0x54d   : > { %2573 = vrot.lane.b32.xlu1 %v2536_v38, %s4238_s24  ;;  %2571 = vrot.lane.b32.xlu0 %v2535_v5, %s4238_s24  ;;  %v2544_v57 = vmul.f32 0.0, %v2528_v47  ;;  %v2543_v51 = vmul.f32 0.0, %v2527_v44  ;;  %v2530_v49 = vadd.f32 %v5268_v43, %v2508_v56  ;;  %v2529_v54 = vadd.f32 %v5268_v43, %v2507_v50 }
 0x54f   : > { %v2546_v8 = vmul.f32 0.0, %v2530_v49  ;;  %v2545_v58 = vmul.f32 0.0, %v2529_v54 }
 0x551   : > { %2577 = vrot.lane.b32.xlu1 %v2538_v23, %s4238_s24  ;;  %2575 = vrot.lane.b32.xlu0 %v2537_v36, %s4238_s24 }
 0x555   : > { %2581 = vrot.lane.b32.xlu1 %v2540_v7, %s4238_s24  ;;  %2579 = vrot.lane.b32.xlu0 %v2539_v40, %s4238_s24 }
 0x559   : > { %2585 = vrot.lane.b32.xlu1 %v2542_v11, %s4238_s24  ;;  %2583 = vrot.lane.b32.xlu0 %v2541_v24, %s4238_s24 }
 0x55d   : > { %2589 = vrot.lane.b32.xlu1 %v2544_v57, %s4238_s24  ;;  %2587 = vrot.lane.b32.xlu0 %v2543_v51, %s4238_s24 }
 0x561   : > { %2593 = vrot.lane.b32.xlu1 %v2546_v8, %s4238_s24  ;;  %2591 = vrot.lane.b32.xlu0 %v2545_v58, %s4238_s24 }
 0x5b7   : > { %v2566_v60 = vpop.permute.xlu1 %2565  ;;  %v2564_v59 = vpop.permute.xlu0 %2563 }
 0x5b8   : > { %v2613_v3 = vsel %vm2611_vm11, %v5001_v17, %v2566_v60  ;;  %v2612_v43 = vsel %vm2611_vm11, %v4993_v13, %v2564_v59 }
 0x5b9   : > { %3908 = vmatprep.mubr.msk.f32.mxu1 %vm2639_vm12, %v2612_v43 }
 0x5ba   : > { %3909 = vmatmul.mubr.msk.f32.vlgmr.msra.gmra.mrb[0].mxu1 %vm2639_vm12, %v2613_v3 }
 0x5bb   : > { %v2570_v16 = vpop.permute.xlu1 %2569  ;;  %v2568_v61 = vpop.permute.xlu0 %2567 }
 0x5bc   : > { %v2615_v28 = vsel %vm2611_vm11, %v5003_v18, %v2570_v16  ;;  %v2614_v10 = vsel %vm2611_vm11, %v4995_v15, %v2568_v61 }
 0x5bd   : > { %3911 = vmatprep.mubr.msk.f32.mxu1 %vm2639_vm12, %v2614_v10 }
 0x5be   : > { %3912 = vmatmul.mubr.msk.f32.gmra.mrb[2].mxu1 %vm2639_vm12, %v2615_v28 }
 0x5bf   : > { %v2574_v17 = vpop.permute.xlu1 %2573  ;;  %v2572_v62 = vpop.permute.xlu0 %2571 }
 0x5c0   : > { %v2617_v13 = vsel %vm2611_vm11, %v5017_v42, %v2574_v17  ;;  %v2616_v0 = vsel %vm2611_vm11, %v5015_v52, %v2572_v62 }
 0x5c1   : > { %3914 = vmatprep.mubr.msk.f32.mxu1 %vm2639_vm12, %v2616_v0 }
 0x5c2   : > { %3915 = vmatmul.mubr.msk.f32.gmra.mrb[4].mxu1 %vm2639_vm12, %v2617_v13 }
 0x5c3   : > { %v2578_v18 = vpop.permute.xlu1 %2577  ;;  %v2576_v63 = vpop.permute.xlu0 %2575 }
 0x5c4   : > { %v2619_v15 = vsel %vm2611_vm11, %v5025_v34, %v2578_v18  ;;  %v2618_v31 = vsel %vm2611_vm11, %v5023_v19, %v2576_v63 }
 0x5c5   : > { %3917 = vmatprep.mubr.msk.f32.mxu1 %vm2639_vm12, %v2618_v31 }
 0x5c6   : > { %3918 = vmatmul.mubr.msk.f32.gmra.mrb[6].mxu1 %vm2639_vm12, %v2619_v15 }
 0x5c7   : > { %v2582_v42 = vpop.permute.xlu1 %2581  ;;  %v2580_v14 = vpop.permute.xlu0 %2579 }
 0x5c8   : > { %v2621_v52 = vsel %vm2611_vm11, %v5033_v45, %v2582_v42  ;;  %v2620_v32 = vsel %vm2611_vm11, %v5031_v20, %v2580_v14 }
 0x5c9   : > { %3920 = vmatprep.mubr.msk.f32.mxu1 %vm2639_vm12, %v2620_v32 }
 0x5ca   : > { %3921 = vmatmul.mubr.msk.f32.gmra.mrb[8].mxu1 %vm2639_vm12, %v2621_v52 }
 0x5cb   : > { %v2586_v34 = vpop.permute.xlu1 %2585  ;;  %v2584_v4 = vpop.permute.xlu0 %2583 }
 0x5cc   : > { %v2623_v19 = vsel %vm2611_vm11, %v5041_v39, %v2586_v34  ;;  %v2622_v33 = vsel %vm2611_vm11, %v5039_v46, %v2584_v4 }
 0x5cd   : > { %3923 = vmatprep.mubr.msk.f32.mxu1 %vm2639_vm12, %v2622_v33 }
 0x5ce   : > { %3924 = vmatmul.mubr.msk.f32.gmra.mrb[10].mxu1 %vm2639_vm12, %v2623_v19 }
 0x5cf   : > { %v2590_v45 = vpop.permute.xlu1 %2589  ;;  %v2588_v12 = vpop.permute.xlu0 %2587 }
 0x5d0   : > { %v2625_v20 = vsel %vm2611_vm11, %v5049_v48, %v2590_v45  ;;  %v2624_v2 = vsel %vm2611_vm11, %v5047_v21, %v2588_v12  ;;  %v3675_v21 = vld [vmem:[%s5818_s17] ss:$0 sm:$0xff] }
 0x5d1   : > { %3926 = vmatprep.mubr.msk.f32.mxu1 %vm2639_vm12, %v2624_v2 }
 0x5d2   : > { %3927 = vmatmul.mubr.msk.f32.gmra.mrb[12].mxu1 %vm2639_vm12, %v2625_v20 }
 0x5d3   : > { %v2594_v39 = vpop.permute.xlu1 %2593  ;;  %v2592_v6 = vpop.permute.xlu0 %2591 }
 0x5d4   : > { %v2627_v46 = vsel %vm2611_vm11, %v5057_v9, %v2594_v39  ;;  %v2626_v27 = vsel %vm2611_vm11, %v5055_v22, %v2592_v6 }
 0x5d5   : > { %3929 = vmatprep.mubr.msk.f32.mxu1 %vm2639_vm12, %v2626_v27 }
 0x5d6   : > { %3930 = vmatmul.mubr.msk.f32.gmra.mrb[14].mxu1 %vm2639_vm12, %v2627_v46 }
 0x68d   : > { %v3910_v48 = vpop.f32.mrb[0].mxu1 }
 0x68e   : > { %v2758_v38 = vpop.f32.mrb[1].mxu1  ;;  %v5438_v63 = vadd.f32 %v3910_v48, %v3675_v21 }
 0x68f   : > { %v5430_v62 = vadd.f32 %v3675_v21, %v2758_v38 }
 0x690   : > { %v2841_v42 = vsel %vm2837_vm13, %v5438_v63, -inf }
 0x691   : > { %v3913_v5 = vpop.f32.mrb[2].mxu1  ;;  %v2838_v31 = vsel %vm2837_vm13, %v5430_v62, -inf }
 0x692   : > { %v5382_v55 = vadd.f32 %v3913_v5, %v3675_v21  ;;  %v2768_v37 = vpop.f32.mrb[3].mxu1 }
 0x693   : > { %v5384_v23 = vadd.f32 %v3675_v21, %v2768_v37 }
 0x694   : > { %v2847_v22 = vsel %vm2837_vm13, %v5382_v55, -inf }
 0x695   : > { %2848 = vmax.xlane.f32.xlu1 %v2847_v22  ;;  %v3916_v9 = vpop.f32.mrb[4].mxu1  ;;  %v2844_v36 = vsel %vm2837_vm13, %v5384_v23, -inf }
 0x696   : > { %v5390_v1 = vadd.f32 %v3916_v9, %v3675_v21  ;;  %2845 = vmax.xlane.f32.xlu0 %v2844_v36  ;;  %v2778_v26 = vpop.f32.mrb[5].mxu1 }
 0x697   : > { %v5394_v30 = vadd.f32 %v3675_v21, %v2778_v26 }
 0x698   : > { %v2853_v25 = vsel %vm2837_vm13, %v5390_v1, -inf }
 0x699   : > { %v3919_v29 = vpop.f32.mrb[6].mxu1  ;;  %v2850_v35 = vsel %vm2837_vm13, %v5394_v30, -inf }
 0x69a   : > { %2854 = vmax.xlane.f32.xlu0 %v2853_v25  ;;  %v2788_v53 = vpop.f32.mrb[7].mxu1  ;;  %v5398_v40 = vadd.f32 %v3919_v29, %v3675_v21 }
 0x69b   : > { %v5396_v7 = vadd.f32 %v3675_v21, %v2788_v53 }
 0x69c   : > { %v2859_v44 = vsel %vm2837_vm13, %v5398_v40, -inf }
 0x69d   : > { %v3922_v41 = vpop.f32.mrb[8].mxu1  ;;  %v2856_v56 = vsel %vm2837_vm13, %v5396_v7, -inf }
 0x69e   : > { %2851 = vmax.xlane.f32.xlu0 %v2850_v35  ;;  %2857 = vmax.xlane.f32.xlu1 %v2856_v56  ;;  %v2798_v50 = vpop.f32.mrb[9].mxu1  ;;  %v5406_v24 = vadd.f32 %v3922_v41, %v3675_v21 }
 0x69f   : > { %v5404_v11 = vadd.f32 %v3675_v21, %v2798_v50 }
 0x6a0   : > { %v2865_v58 = vsel %vm2837_vm13, %v5406_v24, -inf }
 0x6a1   : > { %v3925_v47 = vpop.f32.mrb[10].mxu1  ;;  %v2862_v57 = vsel %vm2837_vm13, %v5404_v11, -inf }
 0x6a2   : > { %2860 = vmax.xlane.f32.xlu0 %v2859_v44  ;;  %2863 = vmax.xlane.f32.xlu1 %v2862_v57  ;;  %v2808_v51 = vpop.f32.mrb[11].mxu1  ;;  %v5414_v54 = vadd.f32 %v3925_v47, %v3675_v21 }
 0x6a3   : > { %v5412_v49 = vadd.f32 %v3675_v21, %v2808_v51 }
 0x6a4   : > { %v2871_v61 = vsel %vm2837_vm13, %v5414_v54, -inf }
 0x6a5   : > { %v3928_v8 = vpop.f32.mrb[12].mxu1  ;;  %v2868_v60 = vsel %vm2837_vm13, %v5412_v49, -inf }
 0x6a6   : > { %2866 = vmax.xlane.f32.xlu0 %v2865_v58  ;;  %2869 = vmax.xlane.f32.xlu1 %v2868_v60  ;;  %v2818_v59 = vpop.f32.mrb[13].mxu1  ;;  %v5422_v43 = vadd.f32 %v3928_v8, %v3675_v21 }
 0x6a7   : > { %v5420_v3 = vadd.f32 %v3675_v21, %v2818_v59 }
 0x6a8   : > { %v2877_v0 = vsel %vm2837_vm13, %v5422_v43, -inf }
 0x6a9   : > { %v3931_v16 = vpop.f32.mrb[14].mxu1  ;;  %v2874_v28 = vsel %vm2837_vm13, %v5420_v3, -inf }
 0x6aa   : > { %2872 = vmax.xlane.f32.xlu0 %v2871_v61  ;;  %2875 = vmax.xlane.f32.xlu1 %v2874_v28  ;;  %v2828_v10 = vpop.f32.mrb[15].mxu1  ;;  %v5432_v13 = vadd.f32 %v3931_v16, %v3675_v21 }
 0x6ab   : > { %v5428_v17 = vadd.f32 %v3675_v21, %v2828_v10 }
 0x6ac   : > { %v2883_v15 = vsel %vm2837_vm13, %v5432_v13, -inf }
 0x6ad   : > { %v2880_v18 = vsel %vm2837_vm13, %v5428_v17, -inf }
 0x6ae   : > { %2878 = vmax.xlane.f32.xlu0 %v2877_v0  ;;  %2881 = vmax.xlane.f32.xlu1 %v2880_v18 }
 0x6b2   : > { %2884 = vmax.xlane.f32.xlu0 %v2883_v15  ;;  %2839 = vmax.xlane.f32.xlu1 %v2838_v31 }
 0x6b6   : > { %2842 = vmax.xlane.f32.xlu0 %v2841_v42 }
 0x722   : > { %v2849_v14 = vpop.xlane.xlu1 %2848 }
 0x723   : > { %v2889_v52 = vsub.f32 %v5382_v55, %v2849_v14  ;;  %v2846_v32 = vpop.xlane.xlu0 %2845 }
 0x724   : > { %v2888_v34 = vsub.f32 %v5384_v23, %v2846_v32 }
 0x725   : > { %v2908_v4 = vmul.f32 1.442695, %v2889_v52 }
 0x726   : > { %v2906_v19 = vmul.f32 1.442695, %v2888_v34 }
 0x727   : > { %4109 = vpow2.f32 %v2908_v4  ;;  %v2855_v33 = vpop.xlane.xlu0 %2854 }
 0x728   : > { %4111 = vpow2.f32 %v2906_v19  ;;  %v2891_v45 = vsub.f32 %v5390_v1, %v2855_v33 }
 0x72a   : > { %v2912_v12 = vmul.f32 1.442695, %v2891_v45 }
 0x72b   : > { %v2858_v20 = vpop.xlane.xlu1 %2857  ;;  %v2852_v2 = vpop.xlane.xlu0 %2851 }
 0x72c   : > { %4113 = vpow2.f32 %v2912_v12  ;;  %v2892_v39 = vsub.f32 %v5396_v7, %v2858_v20  ;;  %v2890_v6 = vsub.f32 %v5394_v30, %v2852_v2 }
 0x72e   : > { %v2910_v46 = vmul.f32 1.442695, %v2890_v6  ;;  %v2914_v27 = vmul.f32 1.442695, %v2892_v39 }
 0x72f   : > { %v2864_v48 = vpop.xlane.xlu1 %2863  ;;  %v2861_v38 = vpop.xlane.xlu0 %2860 }
 0x730   : > { %v2894_v21 = vsub.f32 %v5404_v11, %v2864_v48  ;;  %v2893_v5 = vsub.f32 %v5398_v40, %v2861_v38  ;;  %4115 = vpow2.f32 %v2910_v46 }
 0x731   : > { %v5453_v55 = vpop.eup %4109  ;;  %4117 = vpow2.f32 %v2914_v27 }
 0x732   : > { %v5455_v37 = vpop.eup %4111  ;;  %v2916_v23 = vmul.f32 1.442695, %v2893_v5  ;;  %v2943_v22 = vsel %vm2837_vm13, %v5453_v55, 0.0  ;;  %v2918_v9 = vmul.f32 1.442695, %v2894_v21 }
 0x733   : > { %v2870_v36 = vpop.xlane.xlu1 %2869  ;;  %2944 = vadd.xlane.f32.xlu0 %v2943_v22  ;;  %v2867_v1 = vpop.xlane.xlu0 %2866  ;;  %v2940_v26 = vsel %vm2837_vm13, %v5455_v37, 0.0 }
 0x734   : > { %v2896_v25 = vsub.f32 %v5412_v49, %v2870_v36  ;;  %v2895_v30 = vsub.f32 %v5406_v24, %v2867_v1  ;;  %2941 = vadd.xlane.f32.xlu1 %v2940_v26  ;;  %4119 = vpow2.f32 %v2916_v23 }
 0x735   : > { %4121 = vpow2.f32 %v2918_v9 }
 0x736   : > { %v5463_v29 = vpop.eup %4113  ;;  %v2920_v53 = vmul.f32 1.442695, %v2895_v30  ;;  %v2922_v7 = vmul.f32 1.442695, %v2896_v25 }
 0x737   : > { %v2876_v40 = vpop.xlane.xlu1 %2875  ;;  %v2873_v41 = vpop.xlane.xlu0 %2872  ;;  %v2949_v35 = vsel %vm2837_vm13, %v5463_v29, 0.0 }
 0x738   : > { %v2898_v56 = vsub.f32 %v5420_v3, %v2876_v40  ;;  %v2897_v50 = vsub.f32 %v5414_v54, %v2873_v41  ;;  %2950 = vadd.xlane.f32.xlu0 %v2949_v35  ;;  %4123 = vpow2.f32 %v2920_v53 }
 0x739   : > { %4125 = vpow2.f32 %v2922_v7 }
 0x73a   : > { %v2924_v11 = vmul.f32 1.442695, %v2897_v50  ;;  %v5469_v24 = vpop.eup %4115  ;;  %v2926_v47 = vmul.f32 1.442695, %v2898_v56 }
 0x73b   : > { %v2882_v44 = vpop.xlane.xlu1 %2881  ;;  %v2879_v57 = vpop.xlane.xlu0 %2878  ;;  %v2946_v8 = vsel %vm2837_vm13, %v5469_v24, 0.0 }
 0x73c   : > { %v2900_v51 = vsub.f32 %v5428_v17, %v2882_v44  ;;  %v2899_v49 = vsub.f32 %v5422_v43, %v2879_v57  ;;  %v5475_v58 = vpop.eup %4117  ;;  %4127 = vpow2.f32 %v2924_v11  ;;  %2947 = vadd.xlane.f32.xlu1 %v2946_v8 }
 0x73d   : > { %4129 = vpow2.f32 %v2926_v47  ;;  %v2952_v43 = vsel %vm2837_vm13, %v5475_v58, 0.0 }
 0x73e   : > { %v2928_v54 = vmul.f32 1.442695, %v2899_v49  ;;  %v5477_v60 = vpop.eup %4119  ;;  %v2930_v59 = vmul.f32 1.442695, %v2900_v51 }
 0x73f   : > { %v2840_v3 = vpop.xlane.xlu1 %2839  ;;  %v2885_v16 = vpop.xlane.xlu0 %2884  ;;  %v2955_v10 = vsel %vm2837_vm13, %v5477_v60, 0.0 }
 0x740   : > { %v2886_v61 = vsub.f32 %v5430_v62, %v2840_v3  ;;  %v2901_v28 = vsub.f32 %v5432_v13, %v2885_v16  ;;  %v5485_v17 = vpop.eup %4121  ;;  %4131 = vpow2.f32 %v2928_v54  ;;  %2953 = vadd.xlane.f32.xlu1 %v2952_v43  ;;  %2956 = vadd.xlane.f32.xlu0 %v2955_v10 }
 0x741   : > { %4133 = vpow2.f32 %v2930_v59  ;;  %v2958_v13 = vsel %vm2837_vm13, %v5485_v17, 0.0 }
 0x742   : > { %v2932_v0 = vmul.f32 1.442695, %v2901_v28  ;;  %v5487_v18 = vpop.eup %4123  ;;  %v2902_v15 = vmul.f32 1.442695, %v2886_v61 }
 0x743   : > { %v2843_v31 = vpop.xlane.xlu0 %2842  ;;  %v2961_v42 = vsel %vm2837_vm13, %v5487_v18, 0.0  ;;  %v5494_v14 = vpop.eup %4125 }
 0x744   : > { %v2887_v62 = vsub.f32 %v5438_v63, %v2843_v31  ;;  %4135 = vpow2.f32 %v2932_v0  ;;  %2959 = vadd.xlane.f32.xlu1 %v2958_v13  ;;  %2962 = vadd.xlane.f32.xlu0 %v2961_v42  ;;  %v2964_v34 = vsel %vm2837_vm13, %v5494_v14, 0.0 }
 0x745   : > { %4137 = vpow2.f32 %v2902_v15 }
 0x746   : > { %v2904_v52 = vmul.f32 1.442695, %v2887_v62  ;;  %v5496_v32 = vpop.eup %4127 }
 0x747   : > { %v2967_v63 = vsel %vm2837_vm13, %v5496_v32, 0.0  ;;  %v5502_v4 = vpop.eup %4129 }
 0x748   : > { %4139 = vpow2.f32 %v2904_v52  ;;  %2965 = vadd.xlane.f32.xlu1 %v2964_v34  ;;  %2968 = vadd.xlane.f32.xlu0 %v2967_v63  ;;  %v2970_v33 = vsel %vm2837_vm13, %v5502_v4, 0.0 }
 0x74a   : > { %v5504_v19 = vpop.eup %4131 }
 0x74b   : > { %v2973_v45 = vsel %vm2837_vm13, %v5504_v19, 0.0  ;;  %v5510_v12 = vpop.eup %4133 }
 0x74c   : > { %2971 = vadd.xlane.f32.xlu1 %v2970_v33  ;;  %2974 = vadd.xlane.f32.xlu0 %v2973_v45  ;;  %v2976_v2 = vsel %vm2837_vm13, %v5510_v12, 0.0 }
 0x74e   : > { %v5512_v20 = vpop.eup %4135 }
 0x74f   : > { %v2979_v39 = vsel %vm2837_vm13, %v5512_v20, 0.0  ;;  %v5518_v6 = vpop.eup %4137 }
 0x750   : > { %2977 = vadd.xlane.f32.xlu1 %v2976_v2  ;;  %2980 = vadd.xlane.f32.xlu0 %v2979_v39  ;;  %v2934_v48 = vsel %vm2837_vm13, %v5518_v6, 0.0 }
 0x752   : > { %v5520_v46 = vpop.eup %4139 }
 0x753   : > { %v2937_v27 = vsel %vm2837_vm13, %v5520_v46, 0.0 }
 0x754   : > { %2935 = vadd.xlane.f32.xlu1 %v2934_v48  ;;  %2938 = vadd.xlane.f32.xlu0 %v2937_v27 }
 0x7c0   : > { %v2945_v38 = vpop.xlane.xlu0 %2944 }
 0x7c1   : > { %4141 = vrcp.f32 %v2945_v38  ;;  %v2942_v21 = vpop.xlane.xlu1 %2941 }
 0x7c2   : > { %4143 = vrcp.f32 %v2942_v21 }
 0x7c5   : > { %v2951_v5 = vpop.xlane.xlu0 %2950 }
 0x7c6   : > { %4145 = vrcp.f32 %v2951_v5 }
 0x7c9   : > { %v2948_v23 = vpop.xlane.xlu1 %2947 }
 0x7ca   : > { %4147 = vrcp.f32 %v2948_v23 }
 0x7cb   : > { %v4142_v22 = vpop.eup %4141 }
 0x7cc   : > { %v4144_v9 = vpop.eup %4143  ;;  %v2989_v36 = vmul.f32 %v4142_v22, %v5453_v55 }
 0x7cd   : > { %v2987_v1 = vmul.f32 %v4144_v9, %v5455_v37  ;;  %v2954_v25 = vpop.xlane.xlu1 %2953  ;;  %v2957_v30 = vpop.xlane.xlu0 %2956 }
 0x7ce   : > { %v3017_v26 = vmul.f32 0.0, %v2989_v36  ;;  %4149 = vrcp.f32 %v2954_v25 }
 0x7cf   : > { %v3016_v53 = vmul.f32 0.0, %v2987_v1  ;;  %4151 = vrcp.f32 %v2957_v30 }
 0x7d0   : > { %v4146_v7 = vpop.eup %4145  ;;  %3033 = vst.msk [vmem:[%s5819_s18 + $0x18] sm:$0xff] %vm2837_vm13, %v3017_v26  ;;  %v3049_v40 = vsel %vm2837_vm13, %v3017_v26, 0.0 }
 0x7d1   : > { %3032 = vst.msk [vmem:[%s5819_s18 + $0x10] sm:$0xff] %vm2837_vm13, %v3016_v53  ;;  %v3048_v55 = vsel %vm2837_vm13, %v3016_v53, 0.0  ;;  %v2993_v37 = vmul.f32 %v4146_v7, %v5463_v29  ;;  %v2960_v35 = vpop.xlane.xlu1 %2959  ;;  %v2963_v56 = vpop.xlane.xlu0 %2962 }
 0x7d2   : > { %v3063_v41 = vpack.c.bf16 %v3049_v40, %v3048_v55  ;;  %4153 = vrcp.f32 %v2960_v35 }
 0x7d3   : > { %v3019_v50 = vmul.f32 0.0, %v2993_v37  ;;  %4155 = vrcp.f32 %v2963_v56 }
 0x7d4   : > { %3071 = vst.msk [vmem:[#allocation2 + $0x8] sm:$0xff] %vm2135_vm7, %v3063_v41  ;;  %v4148_v11 = vpop.eup %4147 }
 0x7d5   : > { %3035 = vst.msk [vmem:[%s5819_s18 + $0x28] sm:$0xff] %vm2837_vm13, %v3019_v50  ;;  %v2991_v47 = vmul.f32 %v4148_v11, %v5469_v24  ;;  %v2966_v44 = vpop.xlane.xlu1 %2965  ;;  %v2969_v57 = vpop.xlane.xlu0 %2968  ;;  %v3051_v8 = vsel %vm2837_vm13, %v3019_v50, 0.0 }
 0x7d6   : > { %4157 = vrcp.f32 %v2966_v44 }
 0x7d7   : > { %v3018_v29 = vmul.f32 0.0, %v2991_v47  ;;  %4159 = vrcp.f32 %v2969_v57 }
 0x7d8   : > { %v4150_v51 = vpop.eup %4149 }
 0x7d9   : > { %v4152_v49 = vpop.eup %4151  ;;  %3034 = vst.msk [vmem:[%s5819_s18 + $0x20] sm:$0xff] %vm2837_vm13, %v3018_v29  ;;  %v3050_v54 = vsel %vm2837_vm13, %v3018_v29, 0.0  ;;  %v2995_v59 = vmul.f32 %v4150_v51, %v5475_v58  ;;  %v2972_v3 = vpop.xlane.xlu1 %2971 }
 0x7da   : > { %v2975_v24 = vpop.xlane.xlu0 %2974  ;;  %v3064_v16 = vpack.c.bf16 %v3051_v8, %v3050_v54  ;;  %v2997_v61 = vmul.f32 %v4152_v49, %v5477_v60  ;;  %4161 = vrcp.f32 %v2972_v3 }
 0x7db   : > { %v3020_v28 = vmul.f32 0.0, %v2995_v59  ;;  %4163 = vrcp.f32 %v2975_v24 }
 0x7dc   : > { %v4154_v43 = vpop.eup %4153  ;;  %3072 = vst.msk [vmem:[#allocation2 + $0x10] sm:$0xff] %vm2135_vm7, %v3064_v16  ;;  %v3021_v10 = vmul.f32 0.0, %v2997_v61 }
 0x7dd   : > { %v4156_v0 = vpop.eup %4155  ;;  %3036 = vst.msk [vmem:[%s5819_s18 + $0x30] sm:$0xff] %vm2837_vm13, %v3020_v28  ;;  %v3052_v58 = vsel %vm2837_vm13, %v3020_v28, 0.0  ;;  %v2999_v15 = vmul.f32 %v4154_v43, %v5485_v17  ;;  %v2978_v31 = vpop.xlane.xlu1 %2977 }
 0x7de   : > { %v2981_v62 = vpop.xlane.xlu0 %2980  ;;  %3037 = vst.msk [vmem:[%s5819_s18 + $0x38] sm:$0xff] %vm2837_vm13, %v3021_v10  ;;  %v3053_v60 = vsel %vm2837_vm13, %v3021_v10, 0.0  ;;  %v3001_v13 = vmul.f32 %v4156_v0, %v5487_v18  ;;  %4165 = vrcp.f32 %v2978_v31 }
 0x7df   : > { %v3065_v42 = vpack.c.bf16 %v3053_v60, %v3052_v58  ;;  %v3022_v52 = vmul.f32 0.0, %v2999_v15  ;;  %4167 = vrcp.f32 %v2981_v62 }
 0x7e0   : > { %v4158_v34 = vpop.eup %4157  ;;  %v3023_v63 = vmul.f32 0.0, %v3001_v13 }
 0x7e1   : > { %v4160_v33 = vpop.eup %4159  ;;  %3073 = vst.msk [vmem:[#allocation2 + $0x18] sm:$0xff] %vm2135_vm7, %v3065_v42  ;;  %v3054_v17 = vsel %vm2837_vm13, %v3022_v52, 0.0  ;;  %v3003_v45 = vmul.f32 %v4158_v34, %v5494_v14  ;;  %v2936_v2 = vpop.xlane.xlu1 %2935 }
 0x7e2   : > { %3038 = vst.msk [vmem:[%s5819_s18 + $0x40] sm:$0xff] %vm2837_vm13, %v3022_v52  ;;  %v2939_v18 = vpop.xlane.xlu0 %2938  ;;  %3039 = vst.msk [vmem:[%s5819_s18 + $0x48] sm:$0xff] %vm2837_vm13, %v3023_v63  ;;  %v3055_v39 = vsel %vm2837_vm13, %v3023_v63, 0.0  ;;  %v3005_v27 = vmul.f32 %v4160_v33, %v5496_v32  ;;  %4169 = vrcp.f32 %v2936_v2 }
 0x7e3   : > { %v3066_v48 = vpack.c.bf16 %v3055_v39, %v3054_v17  ;;  %v3024_v38 = vmul.f32 0.0, %v3003_v45  ;;  %4171 = vrcp.f32 %v2939_v18 }
 0x7e4   : > { %v4162_v21 = vpop.eup %4161  ;;  %v3025_v5 = vmul.f32 0.0, %v3005_v27 }
 0x7e5   : > { %v4164_v23 = vpop.eup %4163  ;;  %3074 = vst.msk [vmem:[#allocation2 + $0x20] sm:$0xff] %vm2135_vm7, %v3066_v48  ;;  %v3056_v14 = vsel %vm2837_vm13, %v3024_v38, 0.0  ;;  %v3007_v22 = vmul.f32 %v4162_v21, %v5502_v4 }
 0x7e6   : > { %3040 = vst.msk [vmem:[%s5819_s18 + $0x50] sm:$0xff] %vm2837_vm13, %v3024_v38  ;;  %3041 = vst.msk [vmem:[%s5819_s18 + $0x58] sm:$0xff] %vm2837_vm13, %v3025_v5  ;;  %v3057_v32 = vsel %vm2837_vm13, %v3025_v5, 0.0  ;;  %v3009_v9 = vmul.f32 %v4164_v23, %v5504_v19 }
 0x7e7   : > { %v3067_v36 = vpack.c.bf16 %v3057_v32, %v3056_v14  ;;  %v3026_v1 = vmul.f32 0.0, %v3007_v22 }
 0x7e8   : > { %v4166_v26 = vpop.eup %4165  ;;  %v3027_v25 = vmul.f32 0.0, %v3009_v9 }
 0x7e9   : > { %v4168_v30 = vpop.eup %4167  ;;  %3075 = vst.msk [vmem:[#allocation2 + $0x28] sm:$0xff] %vm2135_vm7, %v3067_v36  ;;  %v3058_v4 = vsel %vm2837_vm13, %v3026_v1, 0.0  ;;  %v3011_v53 = vmul.f32 %v4166_v26, %v5510_v12 }
 0x7ea   : > { %3042 = vst.msk [vmem:[%s5819_s18 + $0x60] sm:$0xff] %vm2837_vm13, %v3026_v1  ;;  %3043 = vst.msk [vmem:[%s5819_s18 + $0x68] sm:$0xff] %vm2837_vm13, %v3027_v25  ;;  %v3059_v19 = vsel %vm2837_vm13, %v3027_v25, 0.0  ;;  %v3013_v7 = vmul.f32 %v4168_v30, %v5512_v20 }
 0x7eb   : > { %v3068_v40 = vpack.c.bf16 %v3059_v19, %v3058_v4  ;;  %v3028_v55 = vmul.f32 0.0, %v3011_v53 }
 0x7ec   : > { %v4170_v37 = vpop.eup %4169  ;;  %v3029_v41 = vmul.f32 0.0, %v3013_v7 }
 0x7ed   : > { %v4172_v35 = vpop.eup %4171  ;;  %3076 = vst.msk [vmem:[#allocation2 + $0x30] sm:$0xff] %vm2135_vm7, %v3068_v40  ;;  %v3060_v12 = vsel %vm2837_vm13, %v3028_v55, 0.0  ;;  %v2983_v56 = vmul.f32 %v4170_v37, %v5518_v6 }
 0x7ee   : > { %3044 = vst.msk [vmem:[%s5819_s18 + $0x70] sm:$0xff] %vm2837_vm13, %v3028_v55  ;;  %3045 = vst.msk [vmem:[%s5819_s18 + $0x78] sm:$0xff] %vm2837_vm13, %v3029_v41  ;;  %v3061_v20 = vsel %vm2837_vm13, %v3029_v41, 0.0  ;;  %v2985_v50 = vmul.f32 %v4172_v35, %v5520_v46 }
 0x7ef   : > { %v3069_v11 = vpack.c.bf16 %v3061_v20, %v3060_v12  ;;  %3030 = vst.msk [vmem:[%s5819_s18] sm:$0xff] %vm2837_vm13, %v2983_v56  ;;  %v3046_v47 = vsel %vm2837_vm13, %v2983_v56, 0.0 }
 0x7f0   : > { %3031 = vst.msk [vmem:[%s5819_s18 + $0x8] sm:$0xff] %vm2837_vm13, %v2985_v50  ;;  %v3047_v6 = vsel %vm2837_vm13, %v2985_v50, 0.0 }
 0x7f1   : > { %3077 = vst.msk [vmem:[#allocation2 + $0x38] sm:$0xff] %vm2135_vm7, %v3069_v11  ;;  %v3062_v44 = vpack.c.bf16 %v3047_v6, %v3046_v47 }
 0x7f3   : > { %3070 = vst.msk [vmem:[#allocation2] sm:$0xff] %vm2135_vm7, %v3062_v44 }
 0x7f4 PF: > { %v3101_v57 = vld [vmem:[#allocation2 + $0x8] sm:$0xff]  ;;  %v3102_v29 = vld [vmem:[#allocation2 + $0x10] sm:$0xff]  ;;  %s5831_s28 = sld [smem:[#allocation13_spill]]  ;;  %v3103_v8 = vld [vmem:[#allocation2 + $0x18] sm:$0xff]  ;;  %vm3256_vm14 = vcmask 130048   ;;  %vm3485_vm15 = vcmask (%p1925_p7), 31744  }
 0x7f5   : > { %v3104_v54 = vld [vmem:[#allocation2 + $0x20] sm:$0xff]  ;;  %v3105_v59 = vld [vmem:[#allocation2 + $0x28] sm:$0xff]  ;;  %v3106_v3 = vld [vmem:[#allocation2 + $0x30] sm:$0xff]  ;;  %v4239_v40 = vmov (%p1925_p7), 0.0|0.0   ;;  %vm4240_vm0 = vmmov (%p1925_p7), 0   ;;  %v4241_v11 = vmov (%p1925_p7), 0.0  }
 0x7f6   : > { %v3366_v53 = vld [vmem:[%s5819_s18] sm:$0xff] (%p1925_p7)  ;;  %v3368_v35 = vld [vmem:[%s5819_s18 + $0x10] sm:$0xff] (%p1925_p7)  ;;  %v3369_v12 = vld [vmem:[%s5819_s18 + $0x18] sm:$0xff] (%p1925_p7)  ;;  %s5832_s30 = sld [smem:[#allocation12_spill]] (%p1925_p7)  ;;  %vm3527_vm1 = vcmask (%p1925_p7), 24576   ;;  %vm3534_vm2 = vcmask (%p1925_p7), 0  }
 0x7f7   : > { %v3367_v19 = vld [vmem:[%s5819_s18 + $0x8] sm:$0xff] (%p1925_p7)  ;;  %v4025_v6 = vpack.c.bf16 (%p1925_p7), %v3369_v12, %v3368_v35 }
 0x7f8   : > { %v3107_v24 = vld [vmem:[#allocation2 + $0x38] sm:$0xff]  ;;  %v4022_v37 = vpack.c.bf16 (%p1925_p7), %v3367_v19, %v3366_v53 }
 0x7fa   : > { %v3100_v46 = vld [vmem:[#allocation2] sm:$0xff]  ;;  %v4175_v16 = vld [vmem:[%s5831_s28 + $0x8] sm:$0xff]   ;;  %v4177_v28 = vld [vmem:[%s5831_s28 + $0x10] sm:$0xff]  }
 0x7fb   : > { %3932 = vmatprep.subr.bf16.mxu0 %v3100_v46  ;;  %4049 = vmatprep.subr.bf16.mxu1 %v3100_v46  ;;  %v4173_v51 = vld [vmem:[%s5831_s28] sm:$0xff]   ;;  %v4176_v61 = vld [vmem:[%s5831_s28 + $0x28] sm:$0xff]   ;;  %v4178_v43 = vld [vmem:[%s5831_s28 + $0x30] sm:$0xff]  }
 0x7fc   : > { %3933 = vmatpush3.bf16.msra.mxu0 %v3100_v46  ;;  %4057 = vmatpush3.bf16.msra.mxu1 %v3100_v46  ;;  %v4174_v49 = vld [vmem:[%s5831_s28 + $0x20] sm:$0xff]   ;;  %v4179_v10 = vld [vmem:[%s5831_s28 + $0x18] sm:$0xff]  }
 0x7fd   : > { %3934 = vmatprep.subr.bf16.mxu0 %v3101_v57  ;;  %4050 = vmatprep.subr.bf16.mxu1 %v3101_v57  ;;  %v4180_v0 = vld [vmem:[%s5831_s28 + $0x38] sm:$0xff]  }
 0x7fe   : > { %3948 = vmatprep.mubr.bf16.mxu0 %v4173_v51  ;;  %3956 = vmatprep.mubr.bf16.mxu1 %v4174_v49 }
 0x800   : > { %3935 = vmatpush3.bf16.msra.mxu0 %v3101_v57  ;;  %4058 = vmatpush3.bf16.msra.mxu1 %v3101_v57  ;;  %v3370_v57 = vld [vmem:[%s5819_s18 + $0x20] sm:$0xff] (%p1925_p7) }
 0x801   : > { %3936 = vmatprep.subr.bf16.mxu0 %v3102_v29  ;;  %4051 = vmatprep.subr.bf16.mxu1 %v3102_v29 }
 0x804   : > { %3937 = vmatpush3.bf16.msra.mxu0 %v3102_v29  ;;  %4059 = vmatpush3.bf16.msra.mxu1 %v3102_v29 }
 0x805   : > { %3938 = vmatprep.subr.bf16.mxu0 %v3103_v8  ;;  %4052 = vmatprep.subr.bf16.mxu1 %v3103_v8 }
 0x808   : > { %3939 = vmatpush3.bf16.msra.mxu0 %v3103_v8  ;;  %4060 = vmatpush3.bf16.msra.mxu1 %v3103_v8  ;;  %v3371_v8 = vld [vmem:[%s5819_s18 + $0x28] sm:$0xff] (%p1925_p7) }
 0x809   : > { %3940 = vmatprep.subr.bf16.mxu0 %v3104_v54  ;;  %4053 = vmatprep.subr.bf16.mxu1 %v3104_v54 }
 0x80c   : > { %3941 = vmatpush3.bf16.msra.mxu0 %v3104_v54  ;;  %4061 = vmatpush3.bf16.msra.mxu1 %v3104_v54 }
 0x80d   : > { %3942 = vmatprep.subr.bf16.mxu0 %v3105_v59  ;;  %4054 = vmatprep.subr.bf16.mxu1 %v3105_v59 }
 0x810   : > { %3943 = vmatpush3.bf16.msra.mxu0 %v3105_v59  ;;  %4062 = vmatpush3.bf16.msra.mxu1 %v3105_v59 }
 0x811   : > { %3944 = vmatprep.subr.bf16.mxu0 %v3106_v3  ;;  %4055 = vmatprep.subr.bf16.mxu1 %v3106_v3 }
 0x814   : > { %3945 = vmatpush3.bf16.msra.mxu0 %v3106_v3  ;;  %4063 = vmatpush3.bf16.msra.mxu1 %v3106_v3 }
 0x815   : > { %3946 = vmatprep.subr.bf16.mxu0 %v3107_v24  ;;  %4056 = vmatprep.subr.bf16.mxu1 %v3107_v24 }
 0x818   : > { %3947 = vmatpush3.bf16.msra.mxu0 %v3107_v24  ;;  %4064 = vmatpush3.bf16.msra.mxu1 %v3107_v24 }
 0x819   : > { %4021 = vmatprep.subr.bf16.mxu0 (%p1925_p7), %v4239_v40 }
 0x81b   : > { %3949 = vmatmul.mubr.bf16.vlgmr.msra.gmra.mrb[0].mxu0 %v4175_v16  ;;  %3957 = vmatmul.mubr.bf16.vlgmr.msra.gmra.mrb[0].mxu1 %v4176_v61 }
 0x81c   : > { %3952 = vmatprep.mubr.bf16.mxu0 %v4177_v28  ;;  %3960 = vmatprep.mubr.bf16.mxu1 %v4178_v43  ;;  %v4028_v43 = vpack.c.bf16 (%p1925_p7), %v3371_v8, %v3370_v57 }
 0x81d   : > { %4023 = vmatpush3.bf16.msra.mxu0 (%p1925_p7), %v4022_v37 }
 0x81e   : > { %4024 = vmatprep.subr.bf16.mxu0 (%p1925_p7), %v4239_v40 }
 0x821   : > { %4026 = vmatpush3.bf16.msra.mxu0 (%p1925_p7), %v4025_v6 }
 0x822   : > { %4027 = vmatprep.subr.bf16.mxu0 (%p1925_p7), %v4239_v40 }
 0x823   : > { %3953 = vmatmul.mubr.bf16.gmra.mrb[4].mxu0 %v4179_v10  ;;  %3961 = vmatmul.mubr.bf16.gmra.mrb[4].mxu1 %v4180_v0  ;;  %v3372_v10 = vld [vmem:[%s5819_s18 + $0x30] sm:$0xff] (%p1925_p7) }
 0x824   : > { %3996 = vmatprep.mubr.msk.f32.mxu0 (%p1925_p7), %vm4240_vm0, %v4241_v11 }
 0x825   : > { %4029 = vmatpush3.bf16.msra.mxu0 (%p1925_p7), %v4028_v43 }
 0x826   : > { %4030 = vmatprep.subr.bf16.mxu0 (%p1925_p7), %v4239_v40 }
 0x8ee   : > { %v3950_v58 = vpop.f32.mrb[0].mxu0  ;;  %v3958_v15 = vpop.f32.mrb[0].mxu1 }
 0x8ef   : > { %3259 = vst.msk [vmem:[#allocation5 + $0x10] sm:$0xff] %vm3256_vm14, %v3950_v58  ;;  %3267 = vst.msk [vmem:[#allocation5 + $0x50] sm:$0xff] %vm3256_vm14, %v3958_v15  ;;  %v3190_v31 = vpop.f32.mrb[1].mxu0  ;;  %v3222_v62 = vpop.f32.mrb[1].mxu1  ;;  %v3373_v15 = vld [vmem:[%s5819_s18 + $0x38] sm:$0xff] (%p1925_p7) }
 0x8f0   : > { %3257 = vst.msk [vmem:[#allocation5] sm:$0xff] %vm3256_vm14, %v3190_v31  ;;  %3265 = vst.msk [vmem:[#allocation5 + $0x40] sm:$0xff] %vm3256_vm14, %v3222_v62  ;;  %v3951_v60 = vpop.f32.mrb[2].mxu0  ;;  %v3959_v13 = vpop.f32.mrb[2].mxu1 }
 0x8f1   : > { %3260 = vst.msk [vmem:[#allocation5 + $0x18] sm:$0xff] %vm3256_vm14, %v3951_v60  ;;  %3268 = vst.msk [vmem:[#allocation5 + $0x58] sm:$0xff] %vm3256_vm14, %v3959_v13  ;;  %v3193_v42 = vpop.f32.mrb[3].mxu0  ;;  %v3225_v52 = vpop.f32.mrb[3].mxu1 }
 0x8f2   : > { %3258 = vst.msk [vmem:[#allocation5 + $0x8] sm:$0xff] %vm3256_vm14, %v3193_v42  ;;  %3266 = vst.msk [vmem:[#allocation5 + $0x48] sm:$0xff] %vm3256_vm14, %v3225_v52 }
 0x8f6   : > { %v3331_v34 = vld [vmem:[#allocation5 + $0x10] sm:$0xff]  ;;  %v3954_v33 = vpop.f32.mrb[4].mxu0  ;;  %v3962_v17 = vpop.f32.mrb[4].mxu1 }
 0x8f7   : > { %v3339_v63 = vld [vmem:[#allocation5 + $0x50] sm:$0xff]  ;;  %3349 = vst.msk [vmem:[#allocation3 + $0x10] sm:$0xff] %vm3256_vm14, %v3331_v34  ;;  %v3329_v45 = vld [vmem:[#allocation5] sm:$0xff]  ;;  %3263 = vst.msk [vmem:[#allocation5 + $0x30] sm:$0xff] %vm3256_vm14, %v3954_v33  ;;  %v3206_v18 = vpop.f32.mrb[5].mxu0  ;;  %v3238_v39 = vpop.f32.mrb[5].mxu1  ;;  %v4031_v34 = vpack.c.bf16 (%p1925_p7), %v3373_v15, %v3372_v10 }
 0x8f8   : > { %3357 = vst.msk [vmem:[#allocation3 + $0x50] sm:$0xff] %vm3256_vm14, %v3339_v63  ;;  %v3337_v2 = vld [vmem:[#allocation5 + $0x40] sm:$0xff]  ;;  %3271 = vst.msk [vmem:[#allocation5 + $0x70] sm:$0xff] %vm3256_vm14, %v3962_v17  ;;  %v3332_v27 = vld [vmem:[#allocation5 + $0x18] sm:$0xff]  ;;  %v3955_v38 = vpop.f32.mrb[6].mxu0  ;;  %v3963_v21 = vpop.f32.mrb[6].mxu1 }
 0x8f9   : > { %3347 = vst.msk [vmem:[#allocation3] sm:$0xff] %vm3256_vm14, %v3329_v45  ;;  %3355 = vst.msk [vmem:[#allocation3 + $0x40] sm:$0xff] %vm3256_vm14, %v3337_v2  ;;  %v3340_v48 = vld [vmem:[#allocation5 + $0x58] sm:$0xff]  ;;  %v3330_v5 = vld [vmem:[#allocation5 + $0x8] sm:$0xff]  ;;  %v3209_v14 = vpop.f32.mrb[7].mxu0  ;;  %v3241_v22 = vpop.f32.mrb[7].mxu1  ;;  %4032 = vmatpush3.bf16.msra.mxu0 (%p1925_p7), %v4031_v34 }
 0x8fa   : > { %3261 = vst.msk [vmem:[#allocation5 + $0x20] sm:$0xff] %vm3256_vm14, %v3206_v18  ;;  %3269 = vst.msk [vmem:[#allocation5 + $0x60] sm:$0xff] %vm3256_vm14, %v3238_v39  ;;  %v3338_v23 = vld [vmem:[#allocation5 + $0x48] sm:$0xff]  ;;  %v3374_v63 = vld [vmem:[%s5819_s18 + $0x40] sm:$0xff] (%p1925_p7)  ;;  %4033 = vmatprep.subr.bf16.mxu0 (%p1925_p7), %v4239_v40 }
 0x8fb   : > { %3350 = vst.msk [vmem:[#allocation3 + $0x18] sm:$0xff] %vm3256_vm14, %v3332_v27  ;;  %3358 = vst.msk [vmem:[#allocation3 + $0x58] sm:$0xff] %vm3256_vm14, %v3340_v48  ;;  %v3375_v45 = vld [vmem:[%s5819_s18 + $0x48] sm:$0xff] (%p1925_p7) }
 0x8fc   : > { %3264 = vst.msk [vmem:[#allocation5 + $0x38] sm:$0xff] %vm3256_vm14, %v3955_v38  ;;  %3272 = vst.msk [vmem:[#allocation5 + $0x78] sm:$0xff] %vm3256_vm14, %v3963_v21  ;;  %v4034_v21 = vpack.c.bf16 (%p1925_p7), %v3375_v45, %v3374_v63 }
 0x8fd   : > { %3348 = vst.msk [vmem:[#allocation3 + $0x8] sm:$0xff] %vm3256_vm14, %v3330_v5  ;;  %3356 = vst.msk [vmem:[#allocation3 + $0x48] sm:$0xff] %vm3256_vm14, %v3338_v23  ;;  %v3376_v5 = vld [vmem:[%s5819_s18 + $0x50] sm:$0xff] (%p1925_p7) }
 0x8fe   : > { %3262 = vst.msk [vmem:[#allocation5 + $0x28] sm:$0xff] %vm3256_vm14, %v3209_v14  ;;  %3270 = vst.msk [vmem:[#allocation5 + $0x68] sm:$0xff] %vm3256_vm14, %v3241_v22  ;;  %v3335_v32 = vld [vmem:[#allocation5 + $0x30] sm:$0xff]  ;;  %v3377_v22 = vld [vmem:[%s5819_s18 + $0x58] sm:$0xff] (%p1925_p7)  ;;  %4035 = vmatpush3.bf16.msra.mxu0 (%p1925_p7), %v4034_v21 }
 0x8ff   : > { %v3343_v9 = vld [vmem:[#allocation5 + $0x70] sm:$0xff]  ;;  %3353 = vst.msk [vmem:[#allocation3 + $0x30] sm:$0xff] %vm3256_vm14, %v3335_v32  ;;  %4036 = vmatprep.subr.bf16.mxu0 (%p1925_p7), %v4239_v40 }
 0x900   : > { %3361 = vst.msk [vmem:[#allocation3 + $0x70] sm:$0xff] %vm3256_vm14, %v3343_v9  ;;  %v3382_v7 = vld [vmem:[#allocation3] sm:$0xff] (%p1925_p7)  ;;  %v3384_v20 = vld [vmem:[#allocation3 + $0x10] sm:$0xff] (%p1925_p7) }
 0x901   : > { %v3333_v36 = vld [vmem:[#allocation5 + $0x20] sm:$0xff]  ;;  %3364 = sbr.rel (!%p1925_p7) target bundleno = 2689 (0xa81), region = 124  ;;  %v3469_v41 = vmul.f32 (%p1925_p7), %v3382_v7, %v3366_v53  ;;  %v3471_v44 = vmul.f32 (%p1925_p7), %v3384_v20, %v3368_v35  ;;  %v3392_v39 = vld [vmem:[#allocation3 + $0x50] sm:$0xff] (%p1925_p7)  ;;  %v3379_v7 = vld [vmem:[%s5819_s18 + $0x68] sm:$0xff] (%p1925_p7) }
 0x902   : > { %v3341_v1 = vld [vmem:[#allocation5 + $0x60] sm:$0xff]  ;;  %3351 = vst.msk [vmem:[#allocation3 + $0x20] sm:$0xff] %vm3256_vm14, %v3333_v36  ;;  %v3385_v50 = vld [vmem:[#allocation3 + $0x18] sm:$0xff] (%p1925_p7)  ;;  %v3479_v32 = vmul.f32 (%p1925_p7), %v3392_v39, %v3376_v5 }
 0x903   : > { %3359 = vst.msk [vmem:[#allocation3 + $0x60] sm:$0xff] %vm3256_vm14, %v3341_v1  ;;  %v3336_v26 = vld [vmem:[#allocation5 + $0x38] sm:$0xff]  ;;  %v3486_v47 = vsel (%p1925_p7), %vm3485_vm15, %v3469_v41, 0.0  ;;  %v3472_v46 = vmul.f32 (%p1925_p7), %v3385_v50, %v3369_v12  ;;  %v3489_v3 = vsel (%p1925_p7), %vm3485_vm15, %v3471_v44, 0.0  ;;  %v3390_v60 = vld [vmem:[#allocation3 + $0x40] sm:$0xff] (%p1925_p7)  ;;  %v3380_v50 = vld [vmem:[%s5819_s18 + $0x70] sm:$0xff] (%p1925_p7) }
 0x904   : > { %v3344_v25 = vld [vmem:[#allocation5 + $0x78] sm:$0xff]  ;;  %3354 = vst.msk [vmem:[#allocation3 + $0x38] sm:$0xff] %vm3256_vm14, %v3336_v26  ;;  %v3383_v55 = vld [vmem:[#allocation3 + $0x8] sm:$0xff] (%p1925_p7)  ;;  %v3477_v2 = vmul.f32 (%p1925_p7), %v3390_v60, %v3374_v63 }
 0x905   : > { %3362 = vst.msk [vmem:[#allocation3 + $0x78] sm:$0xff] %vm3256_vm14, %v3344_v25  ;;  %v3334_v30 = vld [vmem:[#allocation5 + $0x28] sm:$0xff]  ;;  %v3470_v56 = vmul.f32 (%p1925_p7), %v3383_v55, %v3367_v19  ;;  %v3491_v16 = vsel (%p1925_p7), %vm3485_vm15, %v3472_v46, 0.0  ;;  %v3393_v23 = vld [vmem:[#allocation3 + $0x58] sm:$0xff] (%p1925_p7)  ;;  %v3505_v19 = vsel (%p1925_p7), %vm3485_vm15, %v3479_v32, 0.0 }
 0x906   : > { %v3342_v4 = vld [vmem:[#allocation5 + $0x68] sm:$0xff]  ;;  %3352 = vst.msk [vmem:[#allocation3 + $0x28] sm:$0xff] %vm3256_vm14, %v3334_v30  ;;  %v3388_v24 = vld [vmem:[#allocation3 + $0x30] sm:$0xff] (%p1925_p7)  ;;  %v3501_v14 = vsel (%p1925_p7), %vm3485_vm15, %v3477_v2, 0.0  ;;  %v3480_v26 = vmul.f32 (%p1925_p7), %v3393_v23, %v3377_v22  ;;  %v4037_v30 = vpack.c.bf16 (%p1925_p7), %v3377_v22, %v3376_v5 }
 0x907   : > { %3360 = vst.msk [vmem:[#allocation3 + $0x68] sm:$0xff] %vm3256_vm14, %v3342_v4  ;;  %v3487_v49 = vsel (%p1925_p7), %vm3485_vm15, %v3470_v56, 0.0  ;;  %v3475_v31 = vmul.f32 (%p1925_p7), %v3388_v24, %v3372_v10  ;;  %v3391_v33 = vld [vmem:[#allocation3 + $0x48] sm:$0xff] (%p1925_p7)  ;;  %v3378_v4 = vld [vmem:[%s5819_s18 + $0x60] sm:$0xff] (%p1925_p7)  ;;  %v3396_v41 = vld [vmem:[#allocation3 + $0x70] sm:$0xff] (%p1925_p7) }
 0x908   : > { %v3488_v59 = vadd.f32 %v3487_v49, %v3486_v47  ;;  %v3478_v48 = vmul.f32 %v3391_v33, %v3375_v45  ;;  %v3507_v35 = vsel %vm3485_vm15, %v3480_v26, 0.0  ;;  %4038 = vmatpush3.bf16.msra.mxu0 %v4037_v30  ;;  %v4040_v20 = vpack.c.bf16 %v3379_v7, %v3378_v4  ;;  %v3381_v47 = vld [vmem:[%s5819_s18 + $0x78] sm:$0xff] }
 0x909   : > { %v3386_v29 = vld [vmem:[#allocation3 + $0x20] sm:$0xff]  ;;  %v3497_v17 = vsel %vm3485_vm15, %v3475_v31, 0.0  ;;  %4039 = vmatprep.subr.bf16.mxu0 %v4239_v40  ;;  %v3483_v6 = vmul.f32 %v3396_v41, %v3380_v50 }
 0x90a   : > { %v3473_v54 = vmul.f32 %v3386_v29, %v3370_v57  ;;  %v3490_v28 = vadd.f32 %v3489_v3, %v3488_v59  ;;  %v3394_v36 = vld [vmem:[#allocation3 + $0x60] sm:$0xff]  ;;  %v3503_v1 = vsel %vm3485_vm15, %v3478_v48, 0.0  ;;  %v4043_v29 = vpack.c.bf16 %v3381_v47, %v3380_v50 }
 0x90b   : > { %v3389_v0 = vld [vmem:[#allocation3 + $0x38] sm:$0xff]  ;;  %v3481_v55 = vmul.f32 %v3394_v36, %v3378_v4 }
 0x90c   : > { %v3493_v58 = vsel %vm3485_vm15, %v3473_v54, 0.0  ;;  %v3492_v62 = vadd.f32 %v3491_v16, %v3490_v28  ;;  %v3476_v42 = vmul.f32 %v3389_v0, %v3373_v15  ;;  %4041 = vmatpush3.bf16.msra.mxu0 %v4040_v20  ;;  %v3398_v54 = vld [vmem:[%s5832_s30] sm:$0x1]  ;;  %v3397_v59 = vld [vmem:[#allocation3 + $0x78] sm:$0xff] }
 0x90d   : > { %v3387_v51 = vld [vmem:[#allocation3 + $0x28] sm:$0xff]  ;;  %v3509_v11 = vsel %vm3485_vm15, %v3481_v55, 0.0  ;;  %4042 = vmatprep.subr.bf16.mxu0 %v4239_v40  ;;  %v3484_v3 = vmul.f32 %v3397_v59, %v3381_v47 }
 0x90e   : > { %v3474_v61 = vmul.f32 %v3387_v51, %v3371_v8  ;;  %v3494_v52 = vadd.f32 %v3493_v58, %v3492_v62  ;;  %v3499_v27 = vsel %vm3485_vm15, %v3476_v42, 0.0  ;;  %v3395_v53 = vld [vmem:[#allocation3 + $0x68] sm:$0xff]  ;;  %v3513_v51 = vsel %vm3485_vm15, %v3483_v6, 0.0  ;;  %v3365_v42 = vld [vmem:[#allocation6] sm:$0x1] }
 0x90f   : > { %v3482_v12 = vmul.f32 %v3395_v53, %v3379_v7  ;;  %v3515_v24 = vsel %vm3485_vm15, %v3484_v3, 0.0 }
 0x910   : > { %v3495_v13 = vsel %vm3485_vm15, %v3474_v61, 0.0  ;;  %4044 = vmatpush3.bf16.msra.mxu0 %v4043_v29 }
 0x911   : > { %v3496_v18 = vadd.f32 %v3495_v13, %v3494_v52  ;;  %v3511_v46 = vsel %vm3485_vm15, %v3482_v12, 0.0 }
 0x913   : > { %v3498_v38 = vadd.f32 %v3497_v17, %v3496_v18  ;;  %3997 = vmatmul.mubr.f32.vlgmr.msra.gmra.mrb[0].mxu0 %v3398_v54 }
 0x915   : > { %v3500_v9 = vadd.f32 %v3499_v27, %v3498_v38 }
 0x917   : > { %v3502_v25 = vadd.f32 %v3501_v14, %v3500_v9 }
 0x919   : > { %v3504_v37 = vadd.f32 %v3503_v1, %v3502_v25 }
 0x91b   : > { %v3506_v56 = vadd.f32 %v3505_v19, %v3504_v37 }
 0x91d   : > { %v3508_v44 = vadd.f32 %v3507_v35, %v3506_v56 }
 0x91f   : > { %v3510_v57 = vadd.f32 %v3509_v11, %v3508_v44 }
 0x921   : > { %v3512_v49 = vadd.f32 %v3511_v46, %v3510_v57 }
 0x923   : > { %v3514_v8 = vadd.f32 %v3513_v51, %v3512_v49 }
 0x925   : > { %v3516_v16 = vadd.f32 %v3515_v24, %v3514_v8 }
 0x927   : > { %v3517_v61 = vrot.slane %v3516_v16, 4 }
 0x929   : > { %v3518_v28 = vadd.f32 %v3517_v61, %v3516_v16 }
 0x92b   : > { %v3519_v43 = vrot.slane %v3518_v28, 2 }
 0x92d   : > { %v3520_v10 = vadd.f32 %v3519_v43, %v3518_v28 }
 0x92f   : > { %v3521_v40 = vrot.slane %v3520_v10, 1 }
 0x931   : > { %v3522_v31 = vadd.f32 %v3521_v40, %v3520_v10 }
 0x933   : > { %v3523_v60 = vsel %vm3485_vm15, %v3522_v31, 0.0 }
 0x9e6   : > { %v3465_v0 = vpop.f32.mrb[0].mxu0 }
 0x9e7   : > { %v3526_v58 = vmul.f32 %v3465_v0, %v3465_v0  ;;  %v3998_v15 = vpop.f32.mrb[1].mxu0 }
 0x9e9   : > { %v3528_v62 = vsel %vm3527_vm1, %v3526_v58, 0.0 }
 0x9ea   : > { %3529 = vadd.xlane.f32.xlu0 %v3528_v62 }
 0x9ee   : > { %3524 = vadd.xlane.f32.xlu0 %v3523_v60 }
 0xa77   : > { %v3530_v13 = vpop.xlane.xlu0 %3529 }
 0xa78   : > { %v3531_v52 = vmul.f32 %v3530_v13, %v3365_v42 }
 0xa7b   : > { %v3525_v34 = vpop.xlane.xlu0 %3524 }
 0xa7c   : > { %v3532_v63 = vsub.f32 %v3525_v34, %v3531_v52 }
 0xa7e   : > { %v3533_v33 = vmul.f32 %v3532_v63, %v3365_v42 }
 0xa80   : > { %3535 = vst.msk [vmem:[#allocation7] sm:$0x1] %vm3534_vm2, %v3533_v33 }
 0xa81 PF: > { %s5833_s24 = sadd.s32 4294967295, %s4233_s22   ;;  %s4242_s26 = smov [#allocation7]  }
 0xa82   : > { %p5766_p8 = scmp.eq.s32.totalorder %s5833_s24, 3  ;;  %s3546_s27 = sshll.u32 %s4242_s26, 4  ;;  %s3547_s27 = int_to_ptr.vmem [resolvable:$true] %s3546_s27 }
 0xa83   : > { %s4181_s21 = scalar_lea.vmem %s3547_s27, 16  ;;  %s4187_s29 = scalar_lea.vmem %s3547_s27, 32 }
 0xa84   : > { %p4182_p9 = scmp.ne.s32.totalorder %s3547_s27, %s4181_s21  ;;  %p4188_p12 = scmp.lt.s32.totalorder %s3547_s27, %s3547_s27 }
 0xa85   : > { %p4189_p13 = scmp.lt.s32.totalorder %s4187_s29, %s4181_s21 }
 0xa86   : > { %p4183_p10 = pnand %p4182_p9, %p5766_p8 }
 0xa87   : > { %p4190_p0 = por %p4189_p13, %p4188_p12 }
 0xa88   : > { %p4184_p11 = pneg %p4183_p10 }
 0xa8a   : > { %p4191_p1 = pnand %p4190_p0, %p4184_p11 }
 0xa8c   : > { %4194 = shalt.err (!%p4191_p1)
}
 0xa8d   : > { %s4195_s2 = scalar_lea.hbm %s5820_s19, 16 }
 0xa8e   : > { %p4196_p2 = scmp.ne.s32.totalorder %s5820_s19, %s4195_s2  ;;  %p4201_p5 = scmp.lt.u32.totalorder %s4195_s2, %s5820_s19 }
 0xa90   : > { %p4197_p3 = pnand %p4196_p2, %p5766_p8 }
 0xa92   : > { %p4198_p4 = pneg %p4197_p3 }
 0xa94   : > { %p4203_p6 = pnand %p4201_p5, %p4198_p4 }
 0xa96   : > { %4206 = shalt.err (!%p4203_p6)
}
 0xa97   : > { %4066 = dma.vmem_to_hbm [thread:$0]  (%p5766_p8), %s3547_s27, 16, %s5820_s19, [#allocation8]  }
 0xa98   : > { %4220 = dma.done.wait (%p5766_p8), [#allocation8], 16  }
 0xa99   : > { %4222 = vsyncadd (%p5766_p8), [#allocation8], 4294967280 }
 0xa9a PF: > { %s33_s22 = sadd.s32 1, %s4233_s22   ;;  %s5835_s21 = smov %s4229_s1 }
 0xa9b   : > { %p30_p7 = scmp.ge.s32.totalorder %s33_s22, 6   ;;  %s5836_s1 = smov %s5838_s23 }
 0xa9d   :  { %32 = sbr.rel (!%p30_p7) target bundleno = 12 (0xc), region = 161 }
 0xaa4   :  { %3562 = vsyncpa [#allocation8], 1 }
 0xaa5   :  { %3564 = vsyncpa [#allocation8 + $0x1], 1 }

</bundles_post_ra>
